<compile_context>
chip_gen: v7x
topology: tpu7x:2x2x1
jax: 0.10.0
libtpu: 0.0.40
codegen_flags: <defaults>
</compile_context>

<pallas_src>
import jax
import jax.numpy as jnp
from jax.experimental import pallas as pl
from jax.experimental.pallas import tpu as pltpu

D1 = 2048          # synthetic cat_net branch-1 feature width (lane-aligned)
D2 = 1633          # synthetic cat_net branch-2 feature width (D1 + D2 = 3681)
D2P = 1664         # D2 lane-padded to 13 * 128
HID = 64           # fc: Linear(8, 64)
NGATE = 2          # fc1: Linear(64, 2)
NCLS = 10          # head: Linear(3681, 10)
NP = 128           # head output lane-padded to 128
MAX_TB = 512       # batch tile (fits comfortably in v7x's 64 MiB VMEM)


def _round_up(x, m):
    return (x + m - 1) // m * m


def _row_stats(x, n_real, pad_lanes=0):
    """Per-row max / min / mean / unbiased-std of a bf16 [TB, D] tile.

    Lanes >= n_real (the last `pad_lanes` lanes) must be exact zeros.
    Returns four f32 [TB, 1] tensors (torch semantics: std divides by N-1).
    """
    TB, D = x.shape

    # --- max / min on the bf16 tile (cheap VPU passes). Only the last
    #     128-lane chunk needs masking against the zero padding. ---
    if pad_lanes == 0:
        mx = jnp.max(x, axis=1, keepdims=True).astype(jnp.float32)
        mn = jnp.min(x, axis=1, keepdims=True).astype(jnp.float32)
    else:
        body = x[:, :D - 128]
        tail = x[:, D - 128:]
        real_tail = 128 - pad_lanes
        tmask = jax.lax.broadcasted_iota(jnp.int32, tail.shape, 1) < real_tail
        mx = jnp.maximum(
            jnp.max(body, axis=1, keepdims=True),
            jnp.max(jnp.where(tmask, tail, float("-inf")), axis=1, keepdims=True),
        ).astype(jnp.float32)
        mn = jnp.minimum(
            jnp.min(body, axis=1, keepdims=True),
            jnp.min(jnp.where(tmask, tail, float("inf")), axis=1, keepdims=True),
        ).astype(jnp.float32)

    # --- single f32-accumulation pass for mean / std, chunked over 128-lane
    #     slices (no full-width f32 copy), shifted by the per-row mid-range
    #     c = (max+min)/2 to avoid catastrophic cancellation. ---
    c = 0.5 * (mx + mn)                                    # [TB, 1]
    acc_s = jnp.zeros((TB, 128), jnp.float32)
    acc_ss = jnp.zeros((TB, 128), jnp.float32)
    for j in range(D // 128):
        d = x[:, j * 128:(j + 1) * 128].astype(jnp.float32) - c
        acc_s = acc_s + d
        acc_ss = acc_ss + d * d
    s = jnp.sum(acc_s, axis=1, keepdims=True)              # [TB, 1]
    ss = jnp.sum(acc_ss, axis=1, keepdims=True)
    if pad_lanes:
        # padding lanes are exact zeros, so each contributed d = -c; remove them.
        s = s + float(pad_lanes) * c
        ss = ss - float(pad_lanes) * (c * c)
    n = float(n_real)
    mean = c + s / n
    var = jnp.maximum(ss - (s * s) / n, 0.0) / float(n_real - 1)
    return mx, mn, mean, jnp.sqrt(var)


def nima_kernel(x1_ref, x2_ref,
                fc_w_ref, fc_b_ref,
                fc1_w_ref, fc1_b_ref,
                hw1_ref, hw2_ref, hb_ref,
                out_ref):
    x1 = x1_ref[...]                                   # [TB, D1]  bf16
    x2 = x2_ref[...]                                   # [TB, D2P] bf16, lanes >= D2 zero
    TB = x1.shape[0]

    # ---- per-branch statistics (the 8 inputs of fc) ----
    s1 = _row_stats(x1, D1)                            # max, min, mean, std of x1
    s2 = _row_stats(x2, D2, pad_lanes=D2P - D2)        # max, min, mean, std of x2
    stats8 = (*s1, *s2)                                # torch.cat order

    # ---- fc: Linear(8, 64) as a sum of rank-1 updates (no in-kernel concat,
    #      no 8-wide matmul), then Tanh (self.relu = nn.Tanh()) ----
    fc_w = fc_w_ref[...]                               # [8, HID] f32
    acc = jnp.broadcast_to(fc_b_ref[...], (TB, HID))
    for i, s in enumerate(stats8):
        acc = acc + s * fc_w[i:i + 1, :]               # [TB,1] * [1,HID]
    h = jnp.tanh(acc)                                  # [TB, HID]

    # ---- fc1: Linear(64, 2) + sigmoid gate, as two VPU dot-reductions
    #      (fc1_w stored [out, in] = [2, 64]) ----
    g0 = jnp.sum(h * fc1_w_ref[0:1, :], axis=1, keepdims=True) + fc1_b_ref[:, 0:1]
    g1 = jnp.sum(h * fc1_w_ref[1:2, :], axis=1, keepdims=True) + fc1_b_ref[:, 1:2]
    g0 = pl.reciprocal(1.0 + jnp.exp(-g0), approx=True)        # sigmoid, [TB,1]
    g1 = pl.reciprocal(1.0 + jnp.exp(-g1), approx=True)

    # ---- head: relu(x*g) @ W == g * (relu(x) @ W) since g = sigmoid(.) > 0.
    #      ReLU directly on the bf16 tiles -> bf16 MXU operands; the per-row
    #      gate scaling happens in f32 on the small [TB, NP] results.
    #      (Dropout p=0.75 is identity in eval mode.) ----
    p1 = jnp.dot(jnp.maximum(x1, 0.0), hw1_ref[...],
                 preferred_element_type=jnp.float32)           # [TB, NP]
    p2 = jnp.dot(jnp.maximum(x2, 0.0), hw2_ref[...],
                 preferred_element_type=jnp.float32)
    logits = g0 * p1 + g1 * p2 + hb_ref[...]                   # cols >= NCLS are 0

    # ---- softmax over the real 10 classes only ----
    col_mask = jax.lax.broadcasted_iota(jnp.int32, logits.shape, 1) < NCLS
    m = jnp.max(jnp.where(col_mask, logits, float("-inf")), axis=1, keepdims=True)
    e = jnp.where(col_mask, jnp.exp(logits - m), 0.0)
    inv = pl.reciprocal(jnp.sum(e, axis=1, keepdims=True), approx=True)
    out_ref[...] = (e * inv).astype(out_ref.dtype)


def nima_forward(x, params):
    """x: [B, C, H, W] NCHW. Returns softmax probabilities [B, 10]."""
    B = x.shape[0]

    # --- batch tile selection: multiple of 16 (bf16 sublanes); pick TB so the
    #     grid has >= 2 steps whenever B allows (v7x has 2 TensorCores). ---
    B16 = _round_up(B, 16)
    if B16 <= 16:
        TB = 16
    else:
        TB = min(MAX_TB, _round_up(B16 // 2, 16))
    B_pad = _round_up(B16, TB)

    # --- synthetic cat_net() stand-in (plain-JAX glue, see TODO above).
    #     Rows are padded *before* the projection and base_w2 is column-padded,
    #     so x1/x2 come out already [B_pad, D*] with exact-zero padding (no
    #     extra jnp.pad read/write of the activations). ---
    feat = x.reshape(B, -1).astype(jnp.float32)                     # [B, C*H*W]
    featp = jnp.pad(feat, ((0, B_pad - B), (0, 0)))                 # [B_pad, F]
    x1p = (featp @ params["base_w1"]).astype(jnp.bfloat16)          # [B_pad, D1]
    x2p = (featp @ params["base_w2"]).astype(jnp.bfloat16)          # [B_pad, D2P]

    def wspec(shape):
        return pl.BlockSpec(shape, lambda i: (0,) * len(shape))

    out_pad = pl.pallas_call(
        nima_kernel,
        out_shape=jax.ShapeDtypeStruct((B_pad, NP), jnp.float32),
        grid=(B_pad // TB,),
        in_specs=[
            pl.BlockSpec((TB, D1), lambda i: (i, 0)),               # x1 tile
            pl.BlockSpec((TB, D2P), lambda i: (i, 0)),              # x2 tile
            wspec((8, HID)),                                        # fc_w
            wspec((1, HID)),                                        # fc_b
            wspec((NGATE, HID)),                                    # fc1_w [out,in]
            wspec((1, NGATE)),                                      # fc1_b
            wspec((D1, NP)),                                        # head_w1 (bf16)
            wspec((D2P, NP)),                                       # head_w2 (bf16)
            wspec((1, NP)),                                         # head_b  (f32)
        ],
        out_specs=pl.BlockSpec((TB, NP), lambda i: (i, 0)),
        compiler_params=pltpu.CompilerParams(
            dimension_semantics=("parallel",),
            vmem_limit_bytes=48 * 1024 * 1024),
    )(x1p, x2p,
      params["fc_w"], params["fc_b"],
      params["fc1_w"], params["fc1_b"],
      params["head_w1"], params["head_w2"], params["head_b"])

    return out_pad[:B, :NCLS]


def init_params(key, in_features):
    ks = jax.random.split(key, 8)
    scale = 0.05

    # synthetic backbone projections (plain-JAX glue); base_w2 column-padded so
    # x2 is produced already lane-padded with exact zeros.
    base_w1 = scale * jax.random.normal(ks[0], (in_features, D1), jnp.float32)
    base_w2 = scale * jax.random.normal(ks[1], (in_features, D2), jnp.float32)
    base_w2 = jnp.pad(base_w2, ((0, 0), (0, D2P - D2)))

    # head: Linear(3681, 10) split row-wise into the two branches, zero-padded
    # to lane multiples, stored bf16 (MXU operands).
    head_w1 = scale * jax.random.normal(ks[6], (D1, NCLS), jnp.float32)
    head_w2 = scale * jax.random.normal(ks[7], (D2, NCLS), jnp.float32)
    head_b = jnp.zeros((1, NCLS), jnp.float32)

    return {
        "base_w1": base_w1,
        "base_w2": base_w2,
        # fc: Linear(8, 64) stored [in, out]; bias kept 2-D [1, out]
        "fc_w": scale * jax.random.normal(ks[2], (8, HID), jnp.float32),
        "fc_b": scale * jax.random.normal(ks[3], (1, HID), jnp.float32),
        # fc1: Linear(64, 2) stored [out, in] for in-kernel VPU dot-reductions
        "fc1_w": scale * jax.random.normal(ks[4], (NGATE, HID), jnp.float32),
        "fc1_b": scale * jax.random.normal(ks[5], (1, NGATE), jnp.float32),
        # head (padded, bf16 weights / f32 bias)
        "head_w1": jnp.pad(head_w1, ((0, 0), (0, NP - NCLS))).astype(jnp.bfloat16),
        "head_w2": jnp.pad(head_w2, ((0, D2P - D2), (0, NP - NCLS))).astype(jnp.bfloat16),
        "head_b": jnp.pad(head_b, ((0, 0), (0, NP - NCLS))),
    }


if __name__ == "__main__":
    key = jax.random.PRNGKey(0)
    k_x, k_p = jax.random.split(key)

    B, C, H, W = 2, 4, 16, 16
    x = jax.random.normal(k_x, (B, C, H, W), jnp.float32)   # NCHW input
    params = init_params(k_p, C * H * W)

    out = jax.block_until_ready(nima_forward(x, params))

    assert out.shape == (B, NCLS)
    assert bool(jnp.all(jnp.isfinite(out)))
    # softmax rows sum to ~1 (approx reciprocal -> relaxed tolerance)
    assert bool(jnp.allclose(jnp.sum(out, axis=1), 1.0, atol=2e-3))
    print("KERNEL_OK")
</pallas_src>

<mosaic_0001>
module attributes {stable_mosaic.version = 11 : i64} {
  func.func @nima_kernel(%arg0: i32, %arg1: memref<16x2048xbf16, #tpu.memory_space<vmem>>, %arg2: memref<16x1664xbf16, #tpu.memory_space<vmem>>, %arg3: memref<8x64xf32, #tpu.memory_space<vmem>>, %arg4: memref<1x64xf32, #tpu.memory_space<vmem>>, %arg5: memref<2x64xf32, #tpu.memory_space<vmem>>, %arg6: memref<1x2xf32, #tpu.memory_space<vmem>>, %arg7: memref<2048x128xbf16, #tpu.memory_space<vmem>>, %arg8: memref<1664x128xbf16, #tpu.memory_space<vmem>>, %arg9: memref<1x128xf32, #tpu.memory_space<vmem>>, %arg10: memref<16x128xf32, #tpu.memory_space<vmem>>) attributes {dimension_semantics = [#tpu.dimension_semantics<parallel>], iteration_bounds = array<i64: 1>, scalar_prefetch = 0 : i64, scratch_operands = 0 : i64, tpu.core_type = #tpu.core_type<tc>, window_params = [{transform_indices = @transform_0, window_bounds = array<i64: 16, 2048>}, {transform_indices = @transform_1, window_bounds = array<i64: 16, 1664>}, {pipeline_mode = #tpu.pipeline_mode<synchronous>, transform_indices = @transform_2, window_bounds = array<i64: 8, 64>}, {pipeline_mode = #tpu.pipeline_mode<synchronous>, transform_indices = @transform_3, window_bounds = array<i64: 1, 64>}, {pipeline_mode = #tpu.pipeline_mode<synchronous>, transform_indices = @transform_4, window_bounds = array<i64: 2, 64>}, {pipeline_mode = #tpu.pipeline_mode<synchronous>, transform_indices = @transform_5, window_bounds = array<i64: 1, 2>}, {pipeline_mode = #tpu.pipeline_mode<synchronous>, transform_indices = @transform_6, window_bounds = array<i64: 2048, 128>}, {pipeline_mode = #tpu.pipeline_mode<synchronous>, transform_indices = @transform_7, window_bounds = array<i64: 1664, 128>}, {pipeline_mode = #tpu.pipeline_mode<synchronous>, transform_indices = @transform_8, window_bounds = array<i64: 1, 128>}, {transform_indices = @transform_9, window_bounds = array<i64: 16, 128>}]} {
    %c0 = arith.constant 0 : index
    %c0_0 = arith.constant 0 : index
    %0 = vector.load %arg1[%c0, %c0_0] : memref<16x2048xbf16, #tpu.memory_space<vmem>>, vector<16x2048xbf16>
    %c0_1 = arith.constant 0 : index
    %c0_2 = arith.constant 0 : index
    %1 = vector.load %arg2[%c0_1, %c0_2] : memref<16x1664xbf16, #tpu.memory_space<vmem>>, vector<16x1664xbf16>
    %cst = arith.constant dense<0xFF80> : vector<16xbf16>
    %2 = vector.multi_reduction <maximumf>, %0, %cst [1] : vector<16x2048xbf16> to vector<16xbf16>
    %3 = vector.shape_cast %2 : vector<16xbf16> to vector<16x1xbf16>
    %4 = arith.extf %3 : vector<16x1xbf16> to vector<16x1xf32>
    %cst_3 = arith.constant dense<0x7F80> : vector<16xbf16>
    %5 = vector.multi_reduction <minimumf>, %0, %cst_3 [1] : vector<16x2048xbf16> to vector<16xbf16>
    %6 = vector.shape_cast %5 : vector<16xbf16> to vector<16x1xbf16>
    %7 = arith.extf %6 : vector<16x1xbf16> to vector<16x1xf32>
    %8 = arith.addf %4, %7 : vector<16x1xf32>
    %cst_4 = arith.constant 5.000000e-01 : f32
    %9 = vector.broadcast %cst_4 : f32 to vector<16x1xf32>
    %10 = arith.mulf %9, %8 : vector<16x1xf32>
    %cst_5 = arith.constant 0.000000e+00 : f32
    %11 = vector.broadcast %cst_5 : f32 to vector<16x128xf32>
    %cst_6 = arith.constant 0.000000e+00 : f32
    %12 = vector.broadcast %cst_6 : f32 to vector<16x128xf32>
    %13 = vector.extract_strided_slice %0 {offsets = [0, 0], sizes = [16, 128], strides = [1, 1]} : vector<16x2048xbf16> to vector<16x128xbf16>
    %14 = arith.extf %13 : vector<16x128xbf16> to vector<16x128xf32>
    %15 = vector.broadcast %10 : vector<16x1xf32> to vector<16x128xf32>
    %16 = arith.subf %14, %15 : vector<16x128xf32>
    %17 = arith.addf %11, %16 : vector<16x128xf32>
    %18 = arith.mulf %16, %16 : vector<16x128xf32>
    %19 = arith.addf %12, %18 : vector<16x128xf32>
    %20 = vector.extract_strided_slice %0 {offsets = [0, 128], sizes = [16, 128], strides = [1, 1]} : vector<16x2048xbf16> to vector<16x128xbf16>
    %21 = arith.extf %20 : vector<16x128xbf16> to vector<16x128xf32>
    %22 = vector.broadcast %10 : vector<16x1xf32> to vector<16x128xf32>
    %23 = arith.subf %21, %22 : vector<16x128xf32>
    %24 = arith.addf %17, %23 : vector<16x128xf32>
    %25 = arith.mulf %23, %23 : vector<16x128xf32>
    %26 = arith.addf %19, %25 : vector<16x128xf32>
    %27 = vector.extract_strided_slice %0 {offsets = [0, 256], sizes = [16, 128], strides = [1, 1]} : vector<16x2048xbf16> to vector<16x128xbf16>
    %28 = arith.extf %27 : vector<16x128xbf16> to vector<16x128xf32>
    %29 = vector.broadcast %10 : vector<16x1xf32> to vector<16x128xf32>
    %30 = arith.subf %28, %29 : vector<16x128xf32>
    %31 = arith.addf %24, %30 : vector<16x128xf32>
    %32 = arith.mulf %30, %30 : vector<16x128xf32>
    %33 = arith.addf %26, %32 : vector<16x128xf32>
    %34 = vector.extract_strided_slice %0 {offsets = [0, 384], sizes = [16, 128], strides = [1, 1]} : vector<16x2048xbf16> to vector<16x128xbf16>
    %35 = arith.extf %34 : vector<16x128xbf16> to vector<16x128xf32>
    %36 = vector.broadcast %10 : vector<16x1xf32> to vector<16x128xf32>
    %37 = arith.subf %35, %36 : vector<16x128xf32>
    %38 = arith.addf %31, %37 : vector<16x128xf32>
    %39 = arith.mulf %37, %37 : vector<16x128xf32>
    %40 = arith.addf %33, %39 : vector<16x128xf32>
    %41 = vector.extract_strided_slice %0 {offsets = [0, 512], sizes = [16, 128], strides = [1, 1]} : vector<16x2048xbf16> to vector<16x128xbf16>
    %42 = arith.extf %41 : vector<16x128xbf16> to vector<16x128xf32>
    %43 = vector.broadcast %10 : vector<16x1xf32> to vector<16x128xf32>
    %44 = arith.subf %42, %43 : vector<16x128xf32>
    %45 = arith.addf %38, %44 : vector<16x128xf32>
    %46 = arith.mulf %44, %44 : vector<16x128xf32>
    %47 = arith.addf %40, %46 : vector<16x128xf32>
    %48 = vector.extract_strided_slice %0 {offsets = [0, 640], sizes = [16, 128], strides = [1, 1]} : vector<16x2048xbf16> to vector<16x128xbf16>
    %49 = arith.extf %48 : vector<16x128xbf16> to vector<16x128xf32>
    %50 = vector.broadcast %10 : vector<16x1xf32> to vector<16x128xf32>
    %51 = arith.subf %49, %50 : vector<16x128xf32>
    %52 = arith.addf %45, %51 : vector<16x128xf32>
    %53 = arith.mulf %51, %51 : vector<16x128xf32>
    %54 = arith.addf %47, %53 : vector<16x128xf32>
    %55 = vector.extract_strided_slice %0 {offsets = [0, 768], sizes = [16, 128], strides = [1, 1]} : vector<16x2048xbf16> to vector<16x128xbf16>
    %56 = arith.extf %55 : vector<16x128xbf16> to vector<16x128xf32>
    %57 = vector.broadcast %10 : vector<16x1xf32> to vector<16x128xf32>
    %58 = arith.subf %56, %57 : vector<16x128xf32>
    %59 = arith.addf %52, %58 : vector<16x128xf32>
    %60 = arith.mulf %58, %58 : vector<16x128xf32>
    %61 = arith.addf %54, %60 : vector<16x128xf32>
    %62 = vector.extract_strided_slice %0 {offsets = [0, 896], sizes = [16, 128], strides = [1, 1]} : vector<16x2048xbf16> to vector<16x128xbf16>
    %63 = arith.extf %62 : vector<16x128xbf16> to vector<16x128xf32>
    %64 = vector.broadcast %10 : vector<16x1xf32> to vector<16x128xf32>
    %65 = arith.subf %63, %64 : vector<16x128xf32>
    %66 = arith.addf %59, %65 : vector<16x128xf32>
    %67 = arith.mulf %65, %65 : vector<16x128xf32>
    %68 = arith.addf %61, %67 : vector<16x128xf32>
    %69 = vector.extract_strided_slice %0 {offsets = [0, 1024], sizes = [16, 128], strides = [1, 1]} : vector<16x2048xbf16> to vector<16x128xbf16>
    %70 = arith.extf %69 : vector<16x128xbf16> to vector<16x128xf32>
    %71 = vector.broadcast %10 : vector<16x1xf32> to vector<16x128xf32>
    %72 = arith.subf %70, %71 : vector<16x128xf32>
    %73 = arith.addf %66, %72 : vector<16x128xf32>
    %74 = arith.mulf %72, %72 : vector<16x128xf32>
    %75 = arith.addf %68, %74 : vector<16x128xf32>
    %76 = vector.extract_strided_slice %0 {offsets = [0, 1152], sizes = [16, 128], strides = [1, 1]} : vector<16x2048xbf16> to vector<16x128xbf16>
    %77 = arith.extf %76 : vector<16x128xbf16> to vector<16x128xf32>
    %78 = vector.broadcast %10 : vector<16x1xf32> to vector<16x128xf32>
    %79 = arith.subf %77, %78 : vector<16x128xf32>
    %80 = arith.addf %73, %79 : vector<16x128xf32>
    %81 = arith.mulf %79, %79 : vector<16x128xf32>
    %82 = arith.addf %75, %81 : vector<16x128xf32>
    %83 = vector.extract_strided_slice %0 {offsets = [0, 1280], sizes = [16, 128], strides = [1, 1]} : vector<16x2048xbf16> to vector<16x128xbf16>
    %84 = arith.extf %83 : vector<16x128xbf16> to vector<16x128xf32>
    %85 = vector.broadcast %10 : vector<16x1xf32> to vector<16x128xf32>
    %86 = arith.subf %84, %85 : vector<16x128xf32>
    %87 = arith.addf %80, %86 : vector<16x128xf32>
    %88 = arith.mulf %86, %86 : vector<16x128xf32>
    %89 = arith.addf %82, %88 : vector<16x128xf32>
    %90 = vector.extract_strided_slice %0 {offsets = [0, 1408], sizes = [16, 128], strides = [1, 1]} : vector<16x2048xbf16> to vector<16x128xbf16>
    %91 = arith.extf %90 : vector<16x128xbf16> to vector<16x128xf32>
    %92 = vector.broadcast %10 : vector<16x1xf32> to vector<16x128xf32>
    %93 = arith.subf %91, %92 : vector<16x128xf32>
    %94 = arith.addf %87, %93 : vector<16x128xf32>
    %95 = arith.mulf %93, %93 : vector<16x128xf32>
    %96 = arith.addf %89, %95 : vector<16x128xf32>
    %97 = vector.extract_strided_slice %0 {offsets = [0, 1536], sizes = [16, 128], strides = [1, 1]} : vector<16x2048xbf16> to vector<16x128xbf16>
    %98 = arith.extf %97 : vector<16x128xbf16> to vector<16x128xf32>
    %99 = vector.broadcast %10 : vector<16x1xf32> to vector<16x128xf32>
    %100 = arith.subf %98, %99 : vector<16x128xf32>
    %101 = arith.addf %94, %100 : vector<16x128xf32>
    %102 = arith.mulf %100, %100 : vector<16x128xf32>
    %103 = arith.addf %96, %102 : vector<16x128xf32>
    %104 = vector.extract_strided_slice %0 {offsets = [0, 1664], sizes = [16, 128], strides = [1, 1]} : vector<16x2048xbf16> to vector<16x128xbf16>
    %105 = arith.extf %104 : vector<16x128xbf16> to vector<16x128xf32>
    %106 = vector.broadcast %10 : vector<16x1xf32> to vector<16x128xf32>
    %107 = arith.subf %105, %106 : vector<16x128xf32>
    %108 = arith.addf %101, %107 : vector<16x128xf32>
    %109 = arith.mulf %107, %107 : vector<16x128xf32>
    %110 = arith.addf %103, %109 : vector<16x128xf32>
    %111 = vector.extract_strided_slice %0 {offsets = [0, 1792], sizes = [16, 128], strides = [1, 1]} : vector<16x2048xbf16> to vector<16x128xbf16>
    %112 = arith.extf %111 : vector<16x128xbf16> to vector<16x128xf32>
    %113 = vector.broadcast %10 : vector<16x1xf32> to vector<16x128xf32>
    %114 = arith.subf %112, %113 : vector<16x128xf32>
    %115 = arith.addf %108, %114 : vector<16x128xf32>
    %116 = arith.mulf %114, %114 : vector<16x128xf32>
    %117 = arith.addf %110, %116 : vector<16x128xf32>
    %118 = vector.extract_strided_slice %0 {offsets = [0, 1920], sizes = [16, 128], strides = [1, 1]} : vector<16x2048xbf16> to vector<16x128xbf16>
    %119 = arith.extf %118 : vector<16x128xbf16> to vector<16x128xf32>
    %120 = vector.broadcast %10 : vector<16x1xf32> to vector<16x128xf32>
    %121 = arith.subf %119, %120 : vector<16x128xf32>
    %122 = arith.addf %115, %121 : vector<16x128xf32>
    %123 = arith.mulf %121, %121 : vector<16x128xf32>
    %124 = arith.addf %117, %123 : vector<16x128xf32>
    %cst_7 = arith.constant dense<0.000000e+00> : vector<16xf32>
    %125 = vector.multi_reduction <add>, %122, %cst_7 [1] : vector<16x128xf32> to vector<16xf32>
    %126 = vector.shape_cast %125 : vector<16xf32> to vector<16x1xf32>
    %cst_8 = arith.constant dense<0.000000e+00> : vector<16xf32>
    %127 = vector.multi_reduction <add>, %124, %cst_8 [1] : vector<16x128xf32> to vector<16xf32>
    %128 = vector.shape_cast %127 : vector<16xf32> to vector<16x1xf32>
    %cst_9 = arith.constant 2.048000e+03 : f32
    %129 = vector.broadcast %cst_9 : f32 to vector<16x1xf32>
    %130 = arith.divf %126, %129 : vector<16x1xf32>
    %131 = arith.addf %10, %130 : vector<16x1xf32>
    %132 = arith.mulf %126, %126 : vector<16x1xf32>
    %cst_10 = arith.constant 2.048000e+03 : f32
    %133 = vector.broadcast %cst_10 : f32 to vector<16x1xf32>
    %134 = arith.divf %132, %133 : vector<16x1xf32>
    %135 = arith.subf %128, %134 : vector<16x1xf32>
    %cst_11 = arith.constant 0.000000e+00 : f32
    %136 = vector.broadcast %cst_11 : f32 to vector<16x1xf32>
    %137 = arith.maximumf %135, %136 : vector<16x1xf32>
    %cst_12 = arith.constant 2.047000e+03 : f32
    %138 = vector.broadcast %cst_12 : f32 to vector<16x1xf32>
    %139 = arith.divf %137, %138 : vector<16x1xf32>
    %140 = math.sqrt %139 : vector<16x1xf32>
    %141 = vector.extract_strided_slice %1 {offsets = [0, 0], sizes = [16, 1536], strides = [1, 1]} : vector<16x1664xbf16> to vector<16x1536xbf16>
    %142 = vector.extract_strided_slice %1 {offsets = [0, 1536], sizes = [16, 128], strides = [1, 1]} : vector<16x1664xbf16> to vector<16x128xbf16>
    %143 = tpu.iota {dimensions = array<i32: 1>} : vector<16x128xi32>
    %c97_i32 = arith.constant 97 : i32
    %144 = vector.broadcast %c97_i32 : i32 to vector<16x128xi32>
    %145 = arith.cmpi slt, %143, %144 : vector<16x128xi32>
    %cst_13 = arith.constant dense<0xFF80> : vector<16xbf16>
    %146 = vector.multi_reduction <maximumf>, %141, %cst_13 [1] : vector<16x1536xbf16> to vector<16xbf16>
    %147 = vector.shape_cast %146 : vector<16xbf16> to vector<16x1xbf16>
    %cst_14 = arith.constant 0xFF800000 : f32
    %148 = arith.truncf %cst_14 : f32 to bf16
    %149 = vector.broadcast %148 : bf16 to vector<16x128xbf16>
    %150 = arith.select %145, %142, %149 : vector<16x128xi1>, vector<16x128xbf16>
    %cst_15 = arith.constant dense<0xFF80> : vector<16xbf16>
    %151 = vector.multi_reduction <maximumf>, %150, %cst_15 [1] : vector<16x128xbf16> to vector<16xbf16>
    %152 = vector.shape_cast %151 : vector<16xbf16> to vector<16x1xbf16>
    %153 = arith.maximumf %147, %152 : vector<16x1xbf16>
    %154 = arith.extf %153 : vector<16x1xbf16> to vector<16x1xf32>
    %cst_16 = arith.constant dense<0x7F80> : vector<16xbf16>
    %155 = vector.multi_reduction <minimumf>, %141, %cst_16 [1] : vector<16x1536xbf16> to vector<16xbf16>
    %156 = vector.shape_cast %155 : vector<16xbf16> to vector<16x1xbf16>
    %cst_17 = arith.constant 0x7F800000 : f32
    %157 = arith.truncf %cst_17 : f32 to bf16
    %158 = vector.broadcast %157 : bf16 to vector<16x128xbf16>
    %159 = arith.select %145, %142, %158 : vector<16x128xi1>, vector<16x128xbf16>
    %cst_18 = arith.constant dense<0x7F80> : vector<16xbf16>
    %160 = vector.multi_reduction <minimumf>, %159, %cst_18 [1] : vector<16x128xbf16> to vector<16xbf16>
    %161 = vector.shape_cast %160 : vector<16xbf16> to vector<16x1xbf16>
    %162 = arith.minimumf %156, %161 : vector<16x1xbf16>
    %163 = arith.extf %162 : vector<16x1xbf16> to vector<16x1xf32>
    %164 = arith.addf %154, %163 : vector<16x1xf32>
    %cst_19 = arith.constant 5.000000e-01 : f32
    %165 = vector.broadcast %cst_19 : f32 to vector<16x1xf32>
    %166 = arith.mulf %165, %164 : vector<16x1xf32>
    %cst_20 = arith.constant 0.000000e+00 : f32
    %167 = vector.broadcast %cst_20 : f32 to vector<16x128xf32>
    %cst_21 = arith.constant 0.000000e+00 : f32
    %168 = vector.broadcast %cst_21 : f32 to vector<16x128xf32>
    %169 = vector.extract_strided_slice %1 {offsets = [0, 0], sizes = [16, 128], strides = [1, 1]} : vector<16x1664xbf16> to vector<16x128xbf16>
    %170 = arith.extf %169 : vector<16x128xbf16> to vector<16x128xf32>
    %171 = vector.broadcast %166 : vector<16x1xf32> to vector<16x128xf32>
    %172 = arith.subf %170, %171 : vector<16x128xf32>
    %173 = arith.addf %167, %172 : vector<16x128xf32>
    %174 = arith.mulf %172, %172 : vector<16x128xf32>
    %175 = arith.addf %168, %174 : vector<16x128xf32>
    %176 = vector.extract_strided_slice %1 {offsets = [0, 128], sizes = [16, 128], strides = [1, 1]} : vector<16x1664xbf16> to vector<16x128xbf16>
    %177 = arith.extf %176 : vector<16x128xbf16> to vector<16x128xf32>
    %178 = vector.broadcast %166 : vector<16x1xf32> to vector<16x128xf32>
    %179 = arith.subf %177, %178 : vector<16x128xf32>
    %180 = arith.addf %173, %179 : vector<16x128xf32>
    %181 = arith.mulf %179, %179 : vector<16x128xf32>
    %182 = arith.addf %175, %181 : vector<16x128xf32>
    %183 = vector.extract_strided_slice %1 {offsets = [0, 256], sizes = [16, 128], strides = [1, 1]} : vector<16x1664xbf16> to vector<16x128xbf16>
    %184 = arith.extf %183 : vector<16x128xbf16> to vector<16x128xf32>
    %185 = vector.broadcast %166 : vector<16x1xf32> to vector<16x128xf32>
    %186 = arith.subf %184, %185 : vector<16x128xf32>
    %187 = arith.addf %180, %186 : vector<16x128xf32>
    %188 = arith.mulf %186, %186 : vector<16x128xf32>
    %189 = arith.addf %182, %188 : vector<16x128xf32>
    %190 = vector.extract_strided_slice %1 {offsets = [0, 384], sizes = [16, 128], strides = [1, 1]} : vector<16x1664xbf16> to vector<16x128xbf16>
    %191 = arith.extf %190 : vector<16x128xbf16> to vector<16x128xf32>
    %192 = vector.broadcast %166 : vector<16x1xf32> to vector<16x128xf32>
    %193 = arith.subf %191, %192 : vector<16x128xf32>
    %194 = arith.addf %187, %193 : vector<16x128xf32>
    %195 = arith.mulf %193, %193 : vector<16x128xf32>
    %196 = arith.addf %189, %195 : vector<16x128xf32>
    %197 = vector.extract_strided_slice %1 {offsets = [0, 512], sizes = [16, 128], strides = [1, 1]} : vector<16x1664xbf16> to vector<16x128xbf16>
    %198 = arith.extf %197 : vector<16x128xbf16> to vector<16x128xf32>
    %199 = vector.broadcast %166 : vector<16x1xf32> to vector<16x128xf32>
    %200 = arith.subf %198, %199 : vector<16x128xf32>
    %201 = arith.addf %194, %200 : vector<16x128xf32>
    %202 = arith.mulf %200, %200 : vector<16x128xf32>
    %203 = arith.addf %196, %202 : vector<16x128xf32>
    %204 = vector.extract_strided_slice %1 {offsets = [0, 640], sizes = [16, 128], strides = [1, 1]} : vector<16x1664xbf16> to vector<16x128xbf16>
    %205 = arith.extf %204 : vector<16x128xbf16> to vector<16x128xf32>
    %206 = vector.broadcast %166 : vector<16x1xf32> to vector<16x128xf32>
    %207 = arith.subf %205, %206 : vector<16x128xf32>
    %208 = arith.addf %201, %207 : vector<16x128xf32>
    %209 = arith.mulf %207, %207 : vector<16x128xf32>
    %210 = arith.addf %203, %209 : vector<16x128xf32>
    %211 = vector.extract_strided_slice %1 {offsets = [0, 768], sizes = [16, 128], strides = [1, 1]} : vector<16x1664xbf16> to vector<16x128xbf16>
    %212 = arith.extf %211 : vector<16x128xbf16> to vector<16x128xf32>
    %213 = vector.broadcast %166 : vector<16x1xf32> to vector<16x128xf32>
    %214 = arith.subf %212, %213 : vector<16x128xf32>
    %215 = arith.addf %208, %214 : vector<16x128xf32>
    %216 = arith.mulf %214, %214 : vector<16x128xf32>
    %217 = arith.addf %210, %216 : vector<16x128xf32>
    %218 = vector.extract_strided_slice %1 {offsets = [0, 896], sizes = [16, 128], strides = [1, 1]} : vector<16x1664xbf16> to vector<16x128xbf16>
    %219 = arith.extf %218 : vector<16x128xbf16> to vector<16x128xf32>
    %220 = vector.broadcast %166 : vector<16x1xf32> to vector<16x128xf32>
    %221 = arith.subf %219, %220 : vector<16x128xf32>
    %222 = arith.addf %215, %221 : vector<16x128xf32>
    %223 = arith.mulf %221, %221 : vector<16x128xf32>
    %224 = arith.addf %217, %223 : vector<16x128xf32>
    %225 = vector.extract_strided_slice %1 {offsets = [0, 1024], sizes = [16, 128], strides = [1, 1]} : vector<16x1664xbf16> to vector<16x128xbf16>
    %226 = arith.extf %225 : vector<16x128xbf16> to vector<16x128xf32>
    %227 = vector.broadcast %166 : vector<16x1xf32> to vector<16x128xf32>
    %228 = arith.subf %226, %227 : vector<16x128xf32>
    %229 = arith.addf %222, %228 : vector<16x128xf32>
    %230 = arith.mulf %228, %228 : vector<16x128xf32>
    %231 = arith.addf %224, %230 : vector<16x128xf32>
    %232 = vector.extract_strided_slice %1 {offsets = [0, 1152], sizes = [16, 128], strides = [1, 1]} : vector<16x1664xbf16> to vector<16x128xbf16>
    %233 = arith.extf %232 : vector<16x128xbf16> to vector<16x128xf32>
    %234 = vector.broadcast %166 : vector<16x1xf32> to vector<16x128xf32>
    %235 = arith.subf %233, %234 : vector<16x128xf32>
    %236 = arith.addf %229, %235 : vector<16x128xf32>
    %237 = arith.mulf %235, %235 : vector<16x128xf32>
    %238 = arith.addf %231, %237 : vector<16x128xf32>
    %239 = vector.extract_strided_slice %1 {offsets = [0, 1280], sizes = [16, 128], strides = [1, 1]} : vector<16x1664xbf16> to vector<16x128xbf16>
    %240 = arith.extf %239 : vector<16x128xbf16> to vector<16x128xf32>
    %241 = vector.broadcast %166 : vector<16x1xf32> to vector<16x128xf32>
    %242 = arith.subf %240, %241 : vector<16x128xf32>
    %243 = arith.addf %236, %242 : vector<16x128xf32>
    %244 = arith.mulf %242, %242 : vector<16x128xf32>
    %245 = arith.addf %238, %244 : vector<16x128xf32>
    %246 = vector.extract_strided_slice %1 {offsets = [0, 1408], sizes = [16, 128], strides = [1, 1]} : vector<16x1664xbf16> to vector<16x128xbf16>
    %247 = arith.extf %246 : vector<16x128xbf16> to vector<16x128xf32>
    %248 = vector.broadcast %166 : vector<16x1xf32> to vector<16x128xf32>
    %249 = arith.subf %247, %248 : vector<16x128xf32>
    %250 = arith.addf %243, %249 : vector<16x128xf32>
    %251 = arith.mulf %249, %249 : vector<16x128xf32>
    %252 = arith.addf %245, %251 : vector<16x128xf32>
    %253 = vector.extract_strided_slice %1 {offsets = [0, 1536], sizes = [16, 128], strides = [1, 1]} : vector<16x1664xbf16> to vector<16x128xbf16>
    %254 = arith.extf %253 : vector<16x128xbf16> to vector<16x128xf32>
    %255 = vector.broadcast %166 : vector<16x1xf32> to vector<16x128xf32>
    %256 = arith.subf %254, %255 : vector<16x128xf32>
    %257 = arith.addf %250, %256 : vector<16x128xf32>
    %258 = arith.mulf %256, %256 : vector<16x128xf32>
    %259 = arith.addf %252, %258 : vector<16x128xf32>
    %cst_22 = arith.constant dense<0.000000e+00> : vector<16xf32>
    %260 = vector.multi_reduction <add>, %257, %cst_22 [1] : vector<16x128xf32> to vector<16xf32>
    %261 = vector.shape_cast %260 : vector<16xf32> to vector<16x1xf32>
    %cst_23 = arith.constant dense<0.000000e+00> : vector<16xf32>
    %262 = vector.multi_reduction <add>, %259, %cst_23 [1] : vector<16x128xf32> to vector<16xf32>
    %263 = vector.shape_cast %262 : vector<16xf32> to vector<16x1xf32>
    %cst_24 = arith.constant 3.100000e+01 : f32
    %264 = vector.broadcast %cst_24 : f32 to vector<16x1xf32>
    %265 = arith.mulf %264, %166 : vector<16x1xf32>
    %266 = arith.addf %261, %265 : vector<16x1xf32>
    %267 = arith.mulf %166, %166 : vector<16x1xf32>
    %cst_25 = arith.constant 3.100000e+01 : f32
    %268 = vector.broadcast %cst_25 : f32 to vector<16x1xf32>
    %269 = arith.mulf %268, %267 : vector<16x1xf32>
    %270 = arith.subf %263, %269 : vector<16x1xf32>
    %cst_26 = arith.constant 1.633000e+03 : f32
    %271 = vector.broadcast %cst_26 : f32 to vector<16x1xf32>
    %272 = arith.divf %266, %271 : vector<16x1xf32>
    %273 = arith.addf %166, %272 : vector<16x1xf32>
    %274 = arith.mulf %266, %266 : vector<16x1xf32>
    %cst_27 = arith.constant 1.633000e+03 : f32
    %275 = vector.broadcast %cst_27 : f32 to vector<16x1xf32>
    %276 = arith.divf %274, %275 : vector<16x1xf32>
    %277 = arith.subf %270, %276 : vector<16x1xf32>
    %cst_28 = arith.constant 0.000000e+00 : f32
    %278 = vector.broadcast %cst_28 : f32 to vector<16x1xf32>
    %279 = arith.maximumf %277, %278 : vector<16x1xf32>
    %cst_29 = arith.constant 1.632000e+03 : f32
    %280 = vector.broadcast %cst_29 : f32 to vector<16x1xf32>
    %281 = arith.divf %279, %280 : vector<16x1xf32>
    %282 = math.sqrt %281 : vector<16x1xf32>
    %c0_30 = arith.constant 0 : index
    %c0_31 = arith.constant 0 : index
    %283 = vector.load %arg3[%c0_30, %c0_31] : memref<8x64xf32, #tpu.memory_space<vmem>>, vector<8x64xf32>
    %c0_32 = arith.constant 0 : index
    %c0_33 = arith.constant 0 : index
    %284 = vector.load %arg4[%c0_32, %c0_33] : memref<1x64xf32, #tpu.memory_space<vmem>>, vector<1x64xf32>
    %285 = vector.shape_cast %284 : vector<1x64xf32> to vector<1x64xf32>
    %286 = vector.broadcast %285 : vector<1x64xf32> to vector<16x64xf32>
    %287 = vector.extract_strided_slice %283 {offsets = [0, 0], sizes = [1, 64], strides = [1, 1]} : vector<8x64xf32> to vector<1x64xf32>
    %288 = vector.broadcast %4 : vector<16x1xf32> to vector<16x64xf32>
    %289 = vector.broadcast %287 : vector<1x64xf32> to vector<16x64xf32>
    %290 = arith.mulf %288, %289 : vector<16x64xf32>
    %291 = arith.addf %286, %290 : vector<16x64xf32>
    %292 = vector.extract_strided_slice %283 {offsets = [1, 0], sizes = [1, 64], strides = [1, 1]} : vector<8x64xf32> to vector<1x64xf32>
    %293 = vector.broadcast %7 : vector<16x1xf32> to vector<16x64xf32>
    %294 = vector.broadcast %292 : vector<1x64xf32> to vector<16x64xf32>
    %295 = arith.mulf %293, %294 : vector<16x64xf32>
    %296 = arith.addf %291, %295 : vector<16x64xf32>
    %297 = vector.extract_strided_slice %283 {offsets = [2, 0], sizes = [1, 64], strides = [1, 1]} : vector<8x64xf32> to vector<1x64xf32>
    %298 = vector.broadcast %131 : vector<16x1xf32> to vector<16x64xf32>
    %299 = vector.broadcast %297 : vector<1x64xf32> to vector<16x64xf32>
    %300 = arith.mulf %298, %299 : vector<16x64xf32>
    %301 = arith.addf %296, %300 : vector<16x64xf32>
    %302 = vector.extract_strided_slice %283 {offsets = [3, 0], sizes = [1, 64], strides = [1, 1]} : vector<8x64xf32> to vector<1x64xf32>
    %303 = vector.broadcast %140 : vector<16x1xf32> to vector<16x64xf32>
    %304 = vector.broadcast %302 : vector<1x64xf32> to vector<16x64xf32>
    %305 = arith.mulf %303, %304 : vector<16x64xf32>
    %306 = arith.addf %301, %305 : vector<16x64xf32>
    %307 = vector.extract_strided_slice %283 {offsets = [4, 0], sizes = [1, 64], strides = [1, 1]} : vector<8x64xf32> to vector<1x64xf32>
    %308 = vector.broadcast %154 : vector<16x1xf32> to vector<16x64xf32>
    %309 = vector.broadcast %307 : vector<1x64xf32> to vector<16x64xf32>
    %310 = arith.mulf %308, %309 : vector<16x64xf32>
    %311 = arith.addf %306, %310 : vector<16x64xf32>
    %312 = vector.extract_strided_slice %283 {offsets = [5, 0], sizes = [1, 64], strides = [1, 1]} : vector<8x64xf32> to vector<1x64xf32>
    %313 = vector.broadcast %163 : vector<16x1xf32> to vector<16x64xf32>
    %314 = vector.broadcast %312 : vector<1x64xf32> to vector<16x64xf32>
    %315 = arith.mulf %313, %314 : vector<16x64xf32>
    %316 = arith.addf %311, %315 : vector<16x64xf32>
    %317 = vector.extract_strided_slice %283 {offsets = [6, 0], sizes = [1, 64], strides = [1, 1]} : vector<8x64xf32> to vector<1x64xf32>
    %318 = vector.broadcast %273 : vector<16x1xf32> to vector<16x64xf32>
    %319 = vector.broadcast %317 : vector<1x64xf32> to vector<16x64xf32>
    %320 = arith.mulf %318, %319 : vector<16x64xf32>
    %321 = arith.addf %316, %320 : vector<16x64xf32>
    %322 = vector.extract_strided_slice %283 {offsets = [7, 0], sizes = [1, 64], strides = [1, 1]} : vector<8x64xf32> to vector<1x64xf32>
    %323 = vector.broadcast %282 : vector<16x1xf32> to vector<16x64xf32>
    %324 = vector.broadcast %322 : vector<1x64xf32> to vector<16x64xf32>
    %325 = arith.mulf %323, %324 : vector<16x64xf32>
    %326 = arith.addf %321, %325 : vector<16x64xf32>
    %327 = math.tanh %326 : vector<16x64xf32>
    %c0_34 = arith.constant 0 : index
    %c0_35 = arith.constant 0 : index
    %328 = vector.load %arg5[%c0_34, %c0_35] : memref<2x64xf32, #tpu.memory_space<vmem>>, vector<1x64xf32>
    %329 = vector.broadcast %328 : vector<1x64xf32> to vector<16x64xf32>
    %330 = arith.mulf %327, %329 : vector<16x64xf32>
    %cst_36 = arith.constant dense<0.000000e+00> : vector<16xf32>
    %331 = vector.multi_reduction <add>, %330, %cst_36 [1] : vector<16x64xf32> to vector<16xf32>
    %332 = vector.shape_cast %331 : vector<16xf32> to vector<16x1xf32>
    %c0_37 = arith.constant 0 : index
    %c0_38 = arith.constant 0 : index
    %333 = vector.load %arg6[%c0_37, %c0_38] : memref<1x2xf32, #tpu.memory_space<vmem>>, vector<1x1xf32>
    %334 = vector.broadcast %333 : vector<1x1xf32> to vector<16x1xf32>
    %335 = arith.addf %332, %334 : vector<16x1xf32>
    %c1 = arith.constant 1 : index
    %c0_39 = arith.constant 0 : index
    %336 = vector.load %arg5[%c1, %c0_39] : memref<2x64xf32, #tpu.memory_space<vmem>>, vector<1x64xf32>
    %337 = vector.broadcast %336 : vector<1x64xf32> to vector<16x64xf32>
    %338 = arith.mulf %327, %337 : vector<16x64xf32>
    %cst_40 = arith.constant dense<0.000000e+00> : vector<16xf32>
    %339 = vector.multi_reduction <add>, %338, %cst_40 [1] : vector<16x64xf32> to vector<16xf32>
    %340 = vector.shape_cast %339 : vector<16xf32> to vector<16x1xf32>
    %c0_41 = arith.constant 0 : index
    %c1_42 = arith.constant 1 : index
    %341 = vector.load %arg6[%c0_41, %c1_42] : memref<1x2xf32, #tpu.memory_space<vmem>>, vector<1x1xf32>
    %342 = vector.broadcast %341 : vector<1x1xf32> to vector<16x1xf32>
    %343 = arith.addf %340, %342 : vector<16x1xf32>
    %cst_43 = arith.constant 0.000000e+00 : f32
    %344 = vector.broadcast %cst_43 : f32 to vector<16x1xf32>
    %345 = arith.subf %344, %335 : vector<16x1xf32>
    %346 = math.exp %345 : vector<16x1xf32>
    %cst_44 = arith.constant 1.000000e+00 : f32
    %347 = vector.broadcast %cst_44 : f32 to vector<16x1xf32>
    %348 = arith.addf %347, %346 : vector<16x1xf32>
    %349 = tpu.reciprocal %348 {approx = true} : vector<16x1xf32> -> vector<16x1xf32>
    %cst_45 = arith.constant 0.000000e+00 : f32
    %350 = vector.broadcast %cst_45 : f32 to vector<16x1xf32>
    %351 = arith.subf %350, %343 : vector<16x1xf32>
    %352 = math.exp %351 : vector<16x1xf32>
    %cst_46 = arith.constant 1.000000e+00 : f32
    %353 = vector.broadcast %cst_46 : f32 to vector<16x1xf32>
    %354 = arith.addf %353, %352 : vector<16x1xf32>
    %355 = tpu.reciprocal %354 {approx = true} : vector<16x1xf32> -> vector<16x1xf32>
    %cst_47 = arith.constant 0.000000e+00 : bf16
    %356 = vector.broadcast %cst_47 : bf16 to vector<16x2048xbf16>
    %357 = arith.maximumf %0, %356 : vector<16x2048xbf16>
    %c0_48 = arith.constant 0 : index
    %c0_49 = arith.constant 0 : index
    %358 = vector.load %arg7[%c0_48, %c0_49] : memref<2048x128xbf16, #tpu.memory_space<vmem>>, vector<2048x128xbf16>
    %cst_50 = arith.constant dense<0.000000e+00> : vector<16x128xf32>
    %359 = tpu.matmul %357, %358, %cst_50 {dimension_numbers = #tpu.dot_dimension_numbers<[1], [0], [0], [1], [0, 0, 1, 1], [], []>} : vector<16x2048xbf16>, vector<2048x128xbf16>, vector<16x128xf32> -> vector<16x128xf32>
    %cst_51 = arith.constant 0.000000e+00 : bf16
    %360 = vector.broadcast %cst_51 : bf16 to vector<16x1664xbf16>
    %361 = arith.maximumf %1, %360 : vector<16x1664xbf16>
    %c0_52 = arith.constant 0 : index
    %c0_53 = arith.constant 0 : index
    %362 = vector.load %arg8[%c0_52, %c0_53] : memref<1664x128xbf16, #tpu.memory_space<vmem>>, vector<1664x128xbf16>
    %cst_54 = arith.constant dense<0.000000e+00> : vector<16x128xf32>
    %363 = tpu.matmul %361, %362, %cst_54 {dimension_numbers = #tpu.dot_dimension_numbers<[1], [0], [0], [1], [0, 0, 1, 1], [], []>} : vector<16x1664xbf16>, vector<1664x128xbf16>, vector<16x128xf32> -> vector<16x128xf32>
    %364 = vector.broadcast %349 : vector<16x1xf32> to vector<16x128xf32>
    %365 = arith.mulf %364, %359 : vector<16x128xf32>
    %366 = vector.broadcast %355 : vector<16x1xf32> to vector<16x128xf32>
    %367 = arith.mulf %366, %363 : vector<16x128xf32>
    %368 = arith.addf %365, %367 : vector<16x128xf32>
    %c0_55 = arith.constant 0 : index
    %c0_56 = arith.constant 0 : index
    %369 = vector.load %arg9[%c0_55, %c0_56] : memref<1x128xf32, #tpu.memory_space<vmem>>, vector<1x128xf32>
    %370 = vector.broadcast %369 : vector<1x128xf32> to vector<16x128xf32>
    %371 = arith.addf %368, %370 : vector<16x128xf32>
    %372 = tpu.iota {dimensions = array<i32: 1>} : vector<16x128xi32>
    %c10_i32 = arith.constant 10 : i32
    %373 = vector.broadcast %c10_i32 : i32 to vector<16x128xi32>
    %374 = arith.cmpi slt, %372, %373 : vector<16x128xi32>
    %cst_57 = arith.constant 0xFF800000 : f32
    %375 = vector.broadcast %cst_57 : f32 to vector<16x128xf32>
    %376 = arith.select %374, %371, %375 : vector<16x128xi1>, vector<16x128xf32>
    %cst_58 = arith.constant dense<0xFF800000> : vector<16xf32>
    %377 = vector.multi_reduction <maximumf>, %376, %cst_58 [1] : vector<16x128xf32> to vector<16xf32>
    %378 = vector.shape_cast %377 : vector<16xf32> to vector<16x1xf32>
    %379 = vector.broadcast %378 : vector<16x1xf32> to vector<16x128xf32>
    %380 = arith.subf %371, %379 : vector<16x128xf32>
    %381 = math.exp %380 : vector<16x128xf32>
    %cst_59 = arith.constant 0.000000e+00 : f32
    %382 = vector.broadcast %cst_59 : f32 to vector<16x128xf32>
    %383 = arith.select %374, %381, %382 : vector<16x128xi1>, vector<16x128xf32>
    %cst_60 = arith.constant dense<0.000000e+00> : vector<16xf32>
    %384 = vector.multi_reduction <add>, %383, %cst_60 [1] : vector<16x128xf32> to vector<16xf32>
    %385 = vector.shape_cast %384 : vector<16xf32> to vector<16x1xf32>
    %386 = tpu.reciprocal %385 {approx = true} : vector<16x1xf32> -> vector<16x1xf32>
    %387 = vector.broadcast %386 : vector<16x1xf32> to vector<16x128xf32>
    %388 = arith.mulf %383, %387 : vector<16x128xf32>
    %c0_61 = arith.constant 0 : index
    %c0_62 = arith.constant 0 : index
    %389 = vector.load %arg10[%c0_61, %c0_62] : memref<16x128xf32, #tpu.memory_space<vmem>>, vector<16x128xf32>
    tpu.vector_store %arg10[%c0_61, %c0_62], %388 {strides = array<i32>} : memref<16x128xf32, #tpu.memory_space<vmem>>, vector<16x128xf32>,
    return
  }
  func.func @transform_0(%arg0: i32) -> (i32, i32) {
    %c0_i32 = arith.constant 0 : i32
    %c0_i32_0 = arith.constant 0 : i32
    return %arg0, %c0_i32 : i32, i32
  }
  func.func @transform_1(%arg0: i32) -> (i32, i32) {
    %c0_i32 = arith.constant 0 : i32
    %c0_i32_0 = arith.constant 0 : i32
    return %arg0, %c0_i32 : i32, i32
  }
  func.func @transform_2(%arg0: i32) -> (i32, i32) {
    %c0_i32 = arith.constant 0 : i32
    %c0_i32_0 = arith.constant 0 : i32
    %c0_i32_1 = arith.constant 0 : i32
    return %c0_i32, %c0_i32_0 : i32, i32
  }
  func.func @transform_3(%arg0: i32) -> (i32, i32) {
    %c0_i32 = arith.constant 0 : i32
    %c0_i32_0 = arith.constant 0 : i32
    %c0_i32_1 = arith.constant 0 : i32
    return %c0_i32, %c0_i32_0 : i32, i32
  }
  func.func @transform_4(%arg0: i32) -> (i32, i32) {
    %c0_i32 = arith.constant 0 : i32
    %c0_i32_0 = arith.constant 0 : i32
    %c0_i32_1 = arith.constant 0 : i32
    return %c0_i32, %c0_i32_0 : i32, i32
  }
  func.func @transform_5(%arg0: i32) -> (i32, i32) {
    %c0_i32 = arith.constant 0 : i32
    %c0_i32_0 = arith.constant 0 : i32
    %c0_i32_1 = arith.constant 0 : i32
    return %c0_i32, %c0_i32_0 : i32, i32
  }
  func.func @transform_6(%arg0: i32) -> (i32, i32) {
    %c0_i32 = arith.constant 0 : i32
    %c0_i32_0 = arith.constant 0 : i32
    %c0_i32_1 = arith.constant 0 : i32
    return %c0_i32, %c0_i32_0 : i32, i32
  }
  func.func @transform_7(%arg0: i32) -> (i32, i32) {
    %c0_i32 = arith.constant 0 : i32
    %c0_i32_0 = arith.constant 0 : i32
    %c0_i32_1 = arith.constant 0 : i32
    return %c0_i32, %c0_i32_0 : i32, i32
  }
  func.func @transform_8(%arg0: i32) -> (i32, i32) {
    %c0_i32 = arith.constant 0 : i32
    %c0_i32_0 = arith.constant 0 : i32
    %c0_i32_1 = arith.constant 0 : i32
    return %c0_i32, %c0_i32_0 : i32, i32
  }
  func.func @transform_9(%arg0: i32) -> (i32, i32) {
    %c0_i32 = arith.constant 0 : i32
    %c0_i32_0 = arith.constant 0 : i32
    return %arg0, %c0_i32 : i32, i32
  }
}

</mosaic_0001>

<bundles_post_ra>
// kernel: tpu_custom_call.1
= control target key start
LH: loop header
LB: loop body
LE: loop exit
PB: predicated region body
PF: predicated region fallthrough
CT: control target
= control target key end

     0   :  { %14 = vsyncpa [#allocation3], 0  ;;  %s5935_s0 = inlined_call_operand.hbm [shape: bf16[16,2048], index: 0, kind: input, shape index: {}]   ;;  %s5936_s1 = inlined_call_operand.hbm [shape: bf16[16,1664], index: 1, kind: input, shape index: {}]   ;;  %s5937_s2 = inlined_call_operand.hbm [shape: f32[8,64], index: 2, kind: input, shape index: {}]   ;;  %s5938_s3 = inlined_call_operand.vmem [shape: f32[1,64], index: 3, kind: input, shape index: {}]   ;;  %s5939_s4 = inlined_call_operand.vmem [shape: f32[2,64], index: 4, kind: input, shape index: {}]   ;;  %s5940_s5 = inlined_call_operand.vmem [shape: f32[1,2], index: 5, kind: input, shape index: {}]   ;;  %s5941_s6 = inlined_call_operand.hbm [shape: bf16[2048,128], index: 6, kind: input, shape index: {}]   ;;  %s5942_s7 = inlined_call_operand.hbm [shape: bf16[1664,128], index: 7, kind: input, shape index: {}]   ;;  %s5943_s8 = inlined_call_operand.vmem [shape: f32[1,128], index: 8, kind: input, shape index: {}]   ;;  %s5944_s9 = inlined_call_operand.hbm [shape: f32[16,128], index: 9, kind: output, shape index: {}]  }
   0x1   :  { %15 = vsyncpa [#allocation6], 0 }
   0x2   :  { %16 = vsyncpa [#allocation9], 0 }
   0x3   :  { %17 = vsyncpa [#allocation4], 0  ;;  %s4776_s30 = smov [#allocation5]   ;;  %s4636_s13 = scalar_lea.hbm %s5936_s1, 1664 }
   0x4   :  { %s35_s10 = sshll.u32 %s4776_s30, 4  ;;  %p4637_p0 = scmp.ne.s32.totalorder %s5936_s1, %s4636_s13  ;;  %s36_s10 = int_to_ptr.vmem [resolvable:$true] %s35_s10 }
   0x5   :  { %p4640_p1 = scmp.lt.u32.totalorder %s4636_s13, %s5936_s1 }
   0x7   :  { %p4642_p2 = pnand %p4640_p1, %p4637_p0 }
   0x9   :  { %4645 = shalt.err (!%p4642_p2)
}
   0xa   :  { %s4646_s18 = scalar_lea.vmem %s36_s10, 1664  ;;  %p4651_p4 = scmp.lt.s32.totalorder %s36_s10, %s36_s10 }
   0xb   :  { %p4647_p3 = scmp.ne.s32.totalorder %s36_s10, %s4646_s18  ;;  %p4652_p5 = scmp.lt.s32.totalorder %s4646_s18, %s4646_s18 }
   0xd   :  { %p4653_p6 = por %p4652_p5, %p4651_p4 }
   0xf   :  { %p4654_p7 = pnand %p4653_p6, %p4647_p3 }
  0x11   :  { %4657 = shalt.err (!%p4654_p7)
}
  0x12   :  { %s4777_s19 = smov 832   ;;  %s4778_s20 = smov 52  }
  0x13   :  { %41 = dma.hbm_to_vmem [thread:$0]  %s5936_s1, 1664, %s36_s10, [#allocation6], %s4777_s19, %s4777_s19, %s4778_s20  }
  0x14   :  { %s4779_s23 = smov [#allocation8]   ;;  %s4780_s25 = smov [#allocation2]  }
  0x15   :  { %s63_s24 = sshll.u32 %s4779_s23, 4  ;;  %s23_s26 = sshll.u32 %s4780_s25, 4  ;;  %s64_s24 = int_to_ptr.vmem [resolvable:$true] %s63_s24  ;;  %s24_s26 = int_to_ptr.vmem [resolvable:$true] %s23_s26 }
  0x16   :  { %s4658_s29 = scalar_lea.hbm %s5941_s6, 16384 }
  0x17   :  { %p4659_p8 = scmp.ne.s32.totalorder %s5941_s6, %s4658_s29  ;;  %p4662_p9 = scmp.lt.u32.totalorder %s4658_s29, %s5941_s6 }
  0x19   :  { %p4664_p10 = pnand %p4662_p9, %p4659_p8 }
  0x1b   :  { %4667 = shalt.err (!%p4664_p10)
}
  0x1c   :  { %s4668_s1 = scalar_lea.vmem %s64_s24, 16384  ;;  %p4673_p12 = scmp.lt.s32.totalorder %s64_s24, %s64_s24 }
  0x1d   :  { %p4669_p11 = scmp.ne.s32.totalorder %s64_s24, %s4668_s1  ;;  %p4674_p13 = scmp.lt.s32.totalorder %s4668_s1, %s4668_s1 }
  0x1f   :  { %p4675_p0 = por %p4674_p13, %p4673_p12 }
  0x21   :  { %p4676_p1 = pnand %p4675_p0, %p4669_p11 }
  0x23   :  { %4679 = shalt.err (!%p4676_p1)
}
  0x24   :  { %s4781_s10 = smov 64   ;;  %s4782_s14 = smov 4  }
  0x25   :  { %69 = dma.hbm_to_vmem [thread:$0]  %s5941_s6, 16384, %s64_s24, [#allocation9], %s4781_s10, %s4781_s10, %s4782_s14  }
  0x26   :  { %s4680_s19 = scalar_lea.hbm %s5935_s0, 2048 }
  0x27   :  { %p4681_p2 = scmp.ne.s32.totalorder %s5935_s0, %s4680_s19  ;;  %p4684_p3 = scmp.lt.u32.totalorder %s4680_s19, %s5935_s0 }
  0x29   :  { %p4686_p4 = pnand %p4684_p3, %p4681_p2 }
  0x2b   :  { %4689 = shalt.err (!%p4686_p4)
}
  0x2c   :  { %s4690_s25 = scalar_lea.vmem %s24_s26, 2048  ;;  %p4695_p6 = scmp.lt.s32.totalorder %s24_s26, %s24_s26 }
  0x2d   :  { %p4691_p5 = scmp.ne.s32.totalorder %s24_s26, %s4690_s25  ;;  %p4696_p7 = scmp.lt.s32.totalorder %s4690_s25, %s4690_s25 }
  0x2f   :  { %p4697_p8 = por %p4696_p7, %p4695_p6 }
  0x31   :  { %p4698_p9 = pnand %p4697_p8, %p4691_p5 }
  0x33   :  { %4701 = shalt.err (!%p4698_p9)
}
  0x34   :  { %s4783_s6 = smov 1024   ;;  %s4784_s28 = smov [#allocation7]  }
  0x35   :  { %29 = dma.hbm_to_vmem [thread:$0]  %s5935_s0, 2048, %s24_s26, [#allocation3], %s4783_s6, %s4783_s6, %s4781_s10  }
  0x36   :  { %s48_s29 = sshll.u32 %s4784_s28, 4  ;;  %s4785_s30 = smov [#allocation10]   ;;  %s49_s29 = int_to_ptr.vmem [resolvable:$true] %s48_s29 }
  0x37   :  { %s75_s11 = sshll.u32 %s4785_s30, 4  ;;  %s4702_s1 = scalar_lea.hbm %s5937_s2, 128  ;;  %s4883_s11 = int_to_ptr.vmem [resolvable:$true] %s75_s11 }
  0x38   :  { %p4703_p10 = scmp.ne.s32.totalorder %s5937_s2, %s4702_s1  ;;  %p4706_p11 = scmp.lt.u32.totalorder %s4702_s1, %s5937_s2 }
  0x3a   :  { %p4708_p12 = pnand %p4706_p11, %p4703_p10 }
  0x3c   :  { %4711 = shalt.err (!%p4708_p12)
}
  0x3d   :  { %s4712_s0 = scalar_lea.vmem %s49_s29, 128  ;;  %p4717_p0 = scmp.lt.s32.totalorder %s49_s29, %s49_s29 }
  0x3e   :  { %p4713_p13 = scmp.ne.s32.totalorder %s49_s29, %s4712_s0  ;;  %p4718_p1 = scmp.lt.s32.totalorder %s4712_s0, %s4712_s0 }
  0x40   :  { %p4719_p2 = por %p4718_p1, %p4717_p0 }
  0x42   :  { %p4720_p3 = pnand %p4719_p2, %p4713_p13 }
  0x44   :  { %4723 = shalt.err (!%p4720_p3)
}
  0x45   :  { %51 = dma.hbm_to_vmem [thread:$0]  %s5937_s2, 128, %s49_s29, [#allocation6]  }
  0x46   :  { %s4724_s22 = scalar_lea.hbm %s5942_s7, 13312 }
  0x47   :  { %p4725_p4 = scmp.ne.s32.totalorder %s5942_s7, %s4724_s22  ;;  %p4728_p5 = scmp.lt.u32.totalorder %s4724_s22, %s5942_s7 }
  0x49   :  { %p4730_p6 = pnand %p4728_p5, %p4725_p4 }
  0x4b   :  { %4733 = shalt.err (!%p4730_p6)
}
  0x4c   :  { %s4734_s27 = scalar_lea.vmem %s4883_s11, 13312  ;;  %p4739_p8 = scmp.lt.s32.totalorder %s4883_s11, %s4883_s11 }
  0x4d   :  { %p4735_p7 = scmp.ne.s32.totalorder %s4883_s11, %s4734_s27  ;;  %p4740_p9 = scmp.lt.s32.totalorder %s4734_s27, %s4734_s27 }
  0x4f   :  { %p4741_p10 = por %p4740_p9, %p4739_p8 }
  0x51   :  { %p4742_p11 = pnand %p4741_p10, %p4735_p7 }
  0x53   :  { %4745 = shalt.err (!%p4742_p11)
}
  0x54   :  { %81 = dma.hbm_to_vmem [thread:$0]  %s5942_s7, 13312, %s4883_s11, [#allocation9], %s4781_s10, %s4781_s10, %s4782_s14  }
  0x55   :  { %4768 = dma.done.wait [#allocation3], 2048  }
  0x56   :  { %4769 = vsyncadd [#allocation3], 4294965248 }
  0x57   :  { %4770 = dma.done.wait [#allocation6], 1792  }
  0x58   :  { %4771 = vsyncadd [#allocation6], 4294965504 }
  0x59   :  { %4772 = dma.done.wait [#allocation9], 29696  }
  0x5a   :  { %4773 = vsyncadd [#allocation9], 4294937600  ;;  %v484_v0 = vlaneseq  ;;  %v118_v1 = vld [vmem:[#allocation5] sm:$0xff]  ;;  %v119_v2 = vld [vmem:[#allocation5 + $0x8] sm:$0xff]  ;;  %vm4788_vm2 = vmmov 0   ;;  %vm887_vm11 = vcmask 523264  }
  0x5b   :  { %v120_v3 = vld [vmem:[#allocation5 + $0x10] sm:$0xff]  ;;  %v121_v4 = vld [vmem:[#allocation5 + $0x18] sm:$0xff]  ;;  %v122_v5 = vld [vmem:[#allocation5 + $0x20] sm:$0xff] }
  0x5c   :  { %v123_v6 = vld [vmem:[#allocation5 + $0x28] sm:$0xff]  ;;  %v125_v7 = vld [vmem:[#allocation5 + $0x34] sm:$0xff]  ;;  %v126_v8 = vld [vmem:[#allocation5 + $0x3c] sm:$0xff]  ;;  %v4918_v10 = vand.u32 127, %v484_v0 }
  0x5d   :  { %v127_v9 = vld [vmem:[#allocation5 + $0x44] sm:$0xff]  ;;  %v128_v11 = vld [vmem:[#allocation5 + $0x4c] sm:$0xff]  ;;  %v129_v12 = vld [vmem:[#allocation5 + $0x54] sm:$0xff]  ;;  %v4920_v14 = vcombine.low %v118_v1, %v125_v7  ;;  %v4922_v15 = vcombine.high %v118_v1, %v125_v7  ;;  %v4924_v16 = vcombine.low %v119_v2, %v126_v8  ;;  %v4926_v17 = vcombine.high %v119_v2, %v126_v8 }
  0x5e   :  { %5964 = vst [vmem:[#allocation16_spill] sm:$0xff] %v4918_v10  ;;  %v130_v13 = vld [vmem:[#allocation5 + $0x5c] sm:$0xff]  ;;  %v4928_v18 = vcombine.low %v120_v3, %v127_v9  ;;  %v4930_v19 = vcombine.high %v120_v3, %v127_v9  ;;  %v4932_v20 = vcombine.low %v121_v4, %v128_v11  ;;  %v4934_v21 = vcombine.high %v121_v4, %v128_v11  ;;  %v4954_v31 = vld [vmem:[#allocation2 + $0x8] sm:$0xff]  ;;  %v4956_v32 = vld [vmem:[#allocation2 + $0x10] sm:$0xff] }
  0x5f   :  { %v4936_v22 = vcombine.low %v122_v5, %v129_v12  ;;  %v4938_v23 = vcombine.high %v122_v5, %v129_v12  ;;  %v4940_v24 = vcombine.low %v123_v6, %v130_v13  ;;  %v4942_v25 = vcombine.high %v123_v6, %v130_v13  ;;  %v4952_v30 = vld [vmem:[#allocation2] sm:$0xff]  ;;  %v4958_v33 = vld [vmem:[#allocation2 + $0x18] sm:$0xff]  ;;  %v4962_v35 = vld [vmem:[#allocation2 + $0x48] sm:$0xff] }
  0x60   :  { %v547_v26 = vmax.bf16 %v4928_v18, %v4920_v14  ;;  %v548_v27 = vmax.bf16 %v4930_v19, %v4922_v15  ;;  %v549_v28 = vmax.bf16 %v4932_v20, %v4924_v16  ;;  %v550_v29 = vmax.bf16 %v4934_v21, %v4926_v17  ;;  %v4960_v34 = vld [vmem:[#allocation2 + $0x40] sm:$0xff]  ;;  %v107_v41 = vld [vmem:[#allocation2 + $0x28] sm:$0xff]  ;;  %v4968_v42 = vld [vmem:[#allocation2 + $0x50] sm:$0xff] }
  0x61   :  { %v106_v40 = vld [vmem:[#allocation2 + $0x20] sm:$0xff]  ;;  %v4970_v43 = vld [vmem:[#allocation2 + $0x58] sm:$0xff]  ;;  %v108_v45 = vld [vmem:[#allocation2 + $0x30] sm:$0xff]  ;;  %v4974_v52 = vcombine.low %v4952_v30, %v4960_v34  ;;  %vm486_vm0 = vcmp.lt.s32.totalorder %v4918_v10, 97  ;;  %v4979_v54 = vcombine.high %v4952_v30, %v4960_v34  ;;  %v4983_v55 = vcombine.low %v4954_v31, %v4962_v35 }
  0x62   :  { %v551_v36 = vmax.bf16 %v4936_v22, %v547_v26  ;;  %v552_v37 = vmax.bf16 %v4938_v23, %v548_v27  ;;  %v553_v38 = vmax.bf16 %v4940_v24, %v549_v28  ;;  %v554_v39 = vmax.bf16 %v4942_v25, %v550_v29  ;;  %v114_v44 = vld [vmem:[#allocation2 + $0x60] sm:$0xff]  ;;  %v109_v46 = vld [vmem:[#allocation2 + $0x38] sm:$0xff]  ;;  %v115_v47 = vld [vmem:[#allocation2 + $0x68] sm:$0xff] }
  0x63   :  { %v116_v48 = vld [vmem:[#allocation2 + $0x70] sm:$0xff]  ;;  %v117_v49 = vld [vmem:[#allocation2 + $0x78] sm:$0xff]  ;;  %v4987_v56 = vcombine.high %v4954_v31, %v4962_v35  ;;  %v4991_v57 = vcombine.low %v4956_v32, %v4968_v42  ;;  %v4995_v60 = vcombine.high %v4956_v32, %v4968_v42  ;;  %v4999_v61 = vcombine.low %v4958_v33, %v4970_v43  ;;  %vm5024_vm1 = vmpackc.low %vm486_vm0, %vm486_vm0 }
  0x64   :  { %v555_v50 = vmax.bf16 %v552_v37, %v551_v36  ;;  %v556_v51 = vmax.bf16 %v554_v39, %v553_v38  ;;  %v4330_v53 = vld [vmem:[#allocation8 + $0x40] sm:$0xff]   ;;  %v5003_v62 = vcombine.high %v4958_v33, %v4970_v43  ;;  %v3672_v1 = vcombine.low %v106_v40, %v114_v44  ;;  %v4334_v11 = vld [vmem:[#allocation8 + $0x48] sm:$0xff]  }
  0x65   :  { %v4331_v58 = vld [vmem:[#allocation8] sm:$0xff]   ;;  %3960 = vmatprep.subr.bf16.mxu0 %v4330_v53  ;;  %v3673_v2 = vcombine.high %v106_v40, %v114_v44  ;;  %v3674_v3 = vcombine.low %v107_v41, %v115_v47  ;;  %v3675_v4 = vcombine.high %v107_v41, %v115_v47  ;;  %v5005_v6 = vcombine.low %v108_v45, %v116_v48  ;;  %v4335_v28 = vld [vmem:[#allocation8 + $0x8] sm:$0xff]  }
  0x66   :  { %v557_v59 = vmax.bf16 %v556_v51, %v555_v50  ;;  %v4332_v63 = vld [vmem:[#allocation8 + $0xc0] sm:$0xff]   ;;  %3961 = vmatpush3.bf16.msra.mxu0 %v4331_v58  ;;  %v5007_v7 = vcombine.high %v108_v45, %v116_v48  ;;  %v5009_v8 = vcombine.low %v109_v46, %v117_v49  ;;  %v5011_v9 = vcombine.high %v109_v46, %v117_v49  ;;  %v4336_v40 = vld [vmem:[#allocation8 + $0xc8] sm:$0xff]   ;;  %v4338_v49 = vld [vmem:[#allocation8 + $0x50] sm:$0xff]  }
  0x67   :  { %v4333_v5 = vld [vmem:[#allocation8 + $0x80] sm:$0xff]   ;;  %v212_v12 = vmax.bf16 %v4991_v57, %v4974_v52  ;;  %v213_v13 = vmax.bf16 %v4995_v60, %v4979_v54  ;;  %v214_v26 = vmax.bf16 %v4999_v61, %v4983_v55  ;;  %v215_v27 = vmax.bf16 %v5003_v62, %v4987_v56  ;;  %3982 = vmatprep.subr.bf16.mxu1 %v4332_v63  ;;  %v4337_v44 = vld [vmem:[#allocation8 + $0x88] sm:$0xff]   ;;  %v4339_v50 = vld [vmem:[#allocation8 + $0x10] sm:$0xff]  }
  0x68   :  { %558 = vmax.xlane.bf16.xlu1 %v557_v59  ;;  %3983 = vmatpush3.bf16.msra.mxu1 %v4333_v5  ;;  %v124_v41 = vld [vmem:[#allocation5 + $0x30] sm:$0xf]  ;;  %v4340_v51 = vld [vmem:[#allocation8 + $0xd0] sm:$0xff]  }
  0x69   :  { %3962 = vmatprep.subr.bf16.mxu0 %v4334_v11  ;;  %v216_v36 = vmax.bf16 %v3672_v1, %v212_v12  ;;  %v217_v37 = vmax.bf16 %v3673_v2, %v213_v13  ;;  %v218_v38 = vmax.bf16 %v3674_v3, %v214_v26  ;;  %v219_v39 = vmax.bf16 %v3675_v4, %v215_v27  ;;  %v131_v59 = vld [vmem:[#allocation5 + $0x64] sm:$0xf] }
  0x6a   :  { %3963 = vmatpush3.bf16.msra.mxu0 %v4335_v28  ;;  %3984 = vmatprep.subr.bf16.mxu1 %v4336_v40  ;;  %v4341_v63 = vld [vmem:[#allocation8 + $0x90] sm:$0xff]   ;;  %v561_v11 = vsel %vm5024_vm1, %v124_v41, 4286644096  ;;  %v562_v12 = vsel %vm5024_vm1, %v131_v59, 4286644096  ;;  %v231_v13 = vmin.bf16 %v4991_v57, %v4974_v52  ;;  %v232_v26 = vmin.bf16 %v4995_v60, %v4979_v54  ;;  %v4346_v40 = vld [vmem:[#allocation8 + $0x60] sm:$0xff]  }
  0x6b   :  { %v220_v45 = vmax.bf16 %v5005_v6, %v216_v36  ;;  %v221_v46 = vmax.bf16 %v5007_v7, %v217_v37  ;;  %v222_v47 = vmax.bf16 %v5009_v8, %v218_v38  ;;  %v223_v48 = vmax.bf16 %v5011_v9, %v219_v39  ;;  %3964 = vmatprep.subr.bf16.mxu0 %v4338_v49  ;;  %v4356_v49 = vld [vmem:[#allocation8 + $0xf0] sm:$0xff]  }
  0x6c   :  { %3985 = vmatpush3.bf16.msra.mxu1 %v4337_v44  ;;  %v233_v27 = vmin.bf16 %v4999_v61, %v4983_v55  ;;  %v3692_v28 = vcombine.low %v561_v11, %v562_v12  ;;  %v234_v36 = vmin.bf16 %v5003_v62, %v4987_v56  ;;  %v587_v37 = vsel %vm5024_vm1, %v124_v41, 2139127680  ;;  %v4350_v41 = vld [vmem:[#allocation8 + $0x68] sm:$0xff]   ;;  %v4361_v11 = vld [vmem:[#allocation8 + $0xb8] sm:$0xff]  }
  0x6d   :  { %v224_v53 = vmax.bf16 %v221_v46, %v220_v45  ;;  %v225_v58 = vmax.bf16 %v223_v48, %v222_v47  ;;  %3986 = vmatprep.subr.bf16.mxu1 %v4340_v51  ;;  %v588_v38 = vsel %vm5024_vm1, %v131_v59, 2139127680  ;;  %v235_v39 = vmin.bf16 %v3672_v1, %v231_v13  ;;  %v4351_v44 = vld [vmem:[#allocation8 + $0x28] sm:$0xff]   ;;  %v4354_v47 = vld [vmem:[#allocation8 + $0x70] sm:$0xff]   ;;  %v4358_v51 = vld [vmem:[#allocation8 + $0x78] sm:$0xff]  }
  0x6e   :  { %3965 = vmatpush3.bf16.msra.mxu0 %v4339_v50  ;;  %v236_v52 = vmin.bf16 %v3673_v2, %v232_v26  ;;  %v237_v57 = vmin.bf16 %v3674_v3, %v233_v27  ;;  %v238_v54 = vmin.bf16 %v3675_v4, %v234_v36  ;;  %v574_v55 = vmin.bf16 %v4928_v18, %v4920_v14  ;;  %v4352_v45 = vld [vmem:[#allocation8 + $0xe8] sm:$0xff]   ;;  %v4355_v48 = vld [vmem:[#allocation8 + $0x30] sm:$0xff]   ;;  %v4362_v13 = vld [vmem:[#allocation8 + $0x140] sm:$0xff]  }
  0x6f   :  { %v226_v5 = vmax.bf16 %v225_v58, %v224_v53  ;;  %v575_v60 = vmin.bf16 %v4930_v19, %v4922_v15  ;;  %v576_v56 = vmin.bf16 %v4932_v20, %v4924_v16  ;;  %v239_v61 = vmin.bf16 %v5005_v6, %v235_v39  ;;  %v4353_v46 = vld [vmem:[#allocation8 + $0xa8] sm:$0xff]   ;;  %v4357_v50 = vld [vmem:[#allocation8 + $0xb0] sm:$0xff]   ;;  %v4359_v53 = vld [vmem:[#allocation8 + $0x38] sm:$0xff]  }
  0x70   :  { %3987 = vmatpush3.bf16.msra.mxu1 %v4341_v63  ;;  %569 = vmax.xlane.bf16.xlu1 %v3692_v28  ;;  %v240_v62 = vmin.bf16 %v5007_v7, %v236_v52  ;;  %v241_v29 = vmin.bf16 %v5009_v8, %v237_v57  ;;  %v577_v1 = vmin.bf16 %v4934_v21, %v4926_v17  ;;  %v4342_v17 = vld [vmem:[#allocation8 + $0x58] sm:$0xff]   ;;  %v5945_v59 = vmov 0   ;;  %v4363_v28 = vld [vmem:[#allocation8 + $0x100] sm:$0xff]   ;;  %v4366_v39 = vld [vmem:[#allocation8 + $0x148] sm:$0xff]  }
  0x71   :  { %227 = vmax.xlane.bf16.xlu0 %v226_v5  ;;  %v242_v2 = vmin.bf16 %v5011_v9, %v238_v54  ;;  %v3693_v4 = vcombine.low %v587_v37, %v588_v38  ;;  %v578_v14 = vmin.bf16 %v4936_v22, %v574_v55  ;;  %v579_v15 = vmin.bf16 %v4938_v23, %v575_v60  ;;  %v4343_v21 = vld [vmem:[#allocation8 + $0x18] sm:$0xff]   ;;  %v4347_v23 = vld [vmem:[#allocation8 + $0x20] sm:$0xff]   ;;  %v4367_v52 = vld [vmem:[#allocation8 + $0x108] sm:$0xff]  }
  0x72   :  { %v243_v3 = vmin.bf16 %v240_v62, %v239_v61  ;;  %v580_v16 = vmin.bf16 %v4940_v24, %v576_v56  ;;  %v581_v19 = vmin.bf16 %v4942_v25, %v577_v1  ;;  %3966 = vmatprep.subr.bf16.mxu0 %v4342_v17  ;;  %v4344_v9 = vld [vmem:[#allocation8 + $0xd8] sm:$0xff]   ;;  %v4348_v24 = vld [vmem:[#allocation8 + $0xe0] sm:$0xff]   ;;  %v938_v63 = vmax.bf16 %v5945_v59, %v4952_v30  ;;  %v4368_v57 = vld [vmem:[#allocation8 + $0x1c8] sm:$0xff]  }
  0x73   :  { %v244_v18 = vmin.bf16 %v242_v2, %v241_v29  ;;  %v582_v6 = vmin.bf16 %v579_v15, %v578_v14  ;;  %3967 = vmatpush3.bf16.msra.mxu0 %v4343_v21  ;;  %v4345_v22 = vld [vmem:[#allocation8 + $0x98] sm:$0xff]   ;;  %3988 = vmatprep.subr.bf16.mxu1 %v4344_v9  ;;  %v4349_v25 = vld [vmem:[#allocation8 + $0xa0] sm:$0xff]   ;;  %v946_v5 = vmax.bf16 %v5945_v59, %v4960_v34  ;;  %v4372_v54 = vld [vmem:[#allocation8 + $0x1d0] sm:$0xff]  }
  0x74   :  { %v583_v7 = vmin.bf16 %v581_v19, %v580_v16  ;;  %3989 = vmatpush3.bf16.msra.mxu1 %v4345_v22  ;;  %3968 = vmatprep.subr.bf16.mxu0 %v4346_v40  ;;  %v4360_v58 = vld [vmem:[#allocation8 + $0xf8] sm:$0xff]   ;;  %v939_v26 = vmax.bf16 %v5945_v59, %v4954_v31  ;;  %v947_v27 = vmax.bf16 %v5945_v59, %v4962_v35  ;;  %v4364_v36 = vld [vmem:[#allocation8 + $0x1c0] sm:$0xff]   ;;  %v4370_v31 = vld [vmem:[#allocation8 + $0x150] sm:$0xff]  }
  0x75   :  { %v245_v20 = vmin.bf16 %v244_v18, %v243_v3  ;;  %3990 = vmatprep.subr.bf16.mxu1 %v4348_v24  ;;  %4315 = vset.pattern.permute.xlu1 %v5945_v59  ;;  %v3699_v12 = vcombine.high %v938_v63, %v946_v5  ;;  %v3698_v30 = vcombine.low %v938_v63, %v946_v5  ;;  %v4365_v38 = vld [vmem:[#allocation8 + $0x180] sm:$0xff]   ;;  %v4369_v35 = vld [vmem:[#allocation8 + $0x188] sm:$0xff]   ;;  %v4371_v55 = vld [vmem:[#allocation8 + $0x110] sm:$0xff]  }
  0x76   :  { %v584_v8 = vmin.bf16 %v583_v7, %v582_v6  ;;  %4314 = vset.pattern.permute.xlu0 %v5945_v59  ;;  %v3701_v34 = vcombine.high %v939_v26, %v947_v27  ;;  %v3700_v37 = vcombine.low %v939_v26, %v947_v27  ;;  %v4374_v60 = vld [vmem:[#allocation8 + $0x158] sm:$0xff]   ;;  %v4373_v56 = vld [vmem:[#allocation8 + $0x190] sm:$0xff]   ;;  %v4378_v29 = vld [vmem:[#allocation8 + $0x160] sm:$0xff]   ;;  %v940_v22 = vmax.bf16 %v5945_v59, %v4956_v32 }
  0x77   :  { %3969 = vmatpush3.bf16.msra.mxu0 %v4347_v23  ;;  %2090 = vmatprep.mubr.bf16.mxu0 %v3699_v12  ;;  %v4375_v61 = vld [vmem:[#allocation8 + $0x118] sm:$0xff]   ;;  %v4380_v2 = vld [vmem:[#allocation8 + $0x1e0] sm:$0xff]   ;;  %v4384_v18 = vld [vmem:[#allocation8 + $0x1e8] sm:$0xff]   ;;  %v948_v40 = vmax.bf16 %v5945_v59, %v4968_v42 }
  0x78   :  { %595 = vmin.xlane.bf16.xlu1 %v3693_v4  ;;  %3991 = vmatpush3.bf16.msra.mxu1 %v4349_v25  ;;  %v4376_v62 = vld [vmem:[#allocation8 + $0x1d8] sm:$0xff]   ;;  %v4379_v3 = vld [vmem:[#allocation8 + $0x120] sm:$0xff]   ;;  %v4382_v4 = vld [vmem:[#allocation8 + $0x168] sm:$0xff]   ;;  %v941_v25 = vmax.bf16 %v5945_v59, %v4958_v33 }
  0x79   :  { %246 = vmin.xlane.bf16.xlu0 %v245_v20  ;;  %3970 = vmatprep.subr.bf16.mxu0 %v4350_v41  ;;  %v4377_v1 = vld [vmem:[#allocation8 + $0x198] sm:$0xff]   ;;  %v4381_v14 = vld [vmem:[#allocation8 + $0x1a0] sm:$0xff]   ;;  %v4383_v15 = vld [vmem:[#allocation8 + $0x128] sm:$0xff]   ;;  %v949_v41 = vmax.bf16 %v5945_v59, %v4970_v43 }
  0x7a   :  { %3992 = vmatprep.subr.bf16.mxu1 %v4352_v45  ;;  %2131 = vmatprep.mubr.bf16.mxu1 %v3701_v34  ;;  %v4386_v16 = vld [vmem:[#allocation8 + $0x170] sm:$0xff]   ;;  %v4385_v19 = vld [vmem:[#allocation8 + $0x1a8] sm:$0xff]   ;;  %v4391_v17 = vld [vmem:[#allocation8 + $0x138] sm:$0xff]   ;;  %v3703_v45 = vcombine.high %v940_v22, %v948_v40 }
  0x7b   :  { %3971 = vmatpush3.bf16.msra.mxu0 %v4351_v44  ;;  %v4388_v20 = vld [vmem:[#allocation8 + $0x1f0] sm:$0xff]   ;;  %v4392_v21 = vld [vmem:[#allocation8 + $0x1f8] sm:$0xff]   ;;  %v4394_v23 = vld [vmem:[#allocation8 + $0x240] sm:$0xff]   ;;  %v3704_v32 = vcombine.low %v941_v25, %v949_v41 }
  0x7c   :  { %3993 = vmatpush3.bf16.msra.mxu1 %v4353_v46  ;;  %3972 = vmatprep.subr.bf16.mxu0 %v4354_v47  ;;  %v4387_v6 = vld [vmem:[#allocation8 + $0x130] sm:$0xff]   ;;  %v4393_v9 = vld [vmem:[#allocation8 + $0x1b8] sm:$0xff]   ;;  %v4395_v24 = vld [vmem:[#allocation8 + $0x200] sm:$0xff]   ;;  %v3702_v46 = vcombine.low %v940_v22, %v948_v40  ;;  %v3705_v47 = vcombine.high %v941_v25, %v949_v41 }
  0x7d   :  { %3994 = vmatprep.subr.bf16.mxu1 %v4356_v49  ;;  %v4389_v7 = vld [vmem:[#allocation8 + $0x1b0] sm:$0xff]   ;;  %v4396_v44 = vld [vmem:[#allocation8 + $0x2c0] sm:$0xff]   ;;  %v4399_v49 = vld [vmem:[#allocation8 + $0x208] sm:$0xff]  }
  0x7e   :  { %v4397_v42 = vld [vmem:[#allocation8 + $0x280] sm:$0xff]   ;;  %v4401_v33 = vld [vmem:[#allocation8 + $0x288] sm:$0xff]   ;;  %v4402_v43 = vld [vmem:[#allocation8 + $0x250] sm:$0xff]  }
  0x7f   :  { %3973 = vmatpush3.bf16.msra.mxu0 %v4355_v48  ;;  %v4398_v48 = vld [vmem:[#allocation8 + $0x248] sm:$0xff]   ;;  %v5088_v63 = vld [vmem:[#allocation2 + $0x60] sm:$0xff]  ;;  %v4425_v22 = vld [vmem:[#allocation8 + $0x2b8] sm:$0xff]  }
  0x80   :  { %3995 = vmatpush3.bf16.msra.mxu1 %v4357_v50  ;;  %3974 = vmatprep.subr.bf16.mxu0 %v4358_v51  ;;  %v4400_v50 = vld [vmem:[#allocation8 + $0x2c8] sm:$0xff]   ;;  %v4403_v51 = vld [vmem:[#allocation8 + $0x210] sm:$0xff]   ;;  %v5092_v5 = vmax.bf16 %v5945_v59, %v5088_v63 }
  0x81   :  { %585 = vmin.xlane.bf16.xlu0 %v584_v8  ;;  %3996 = vmatprep.subr.bf16.mxu1 %v4360_v58  ;;  %v4390_v8 = vld [vmem:[#allocation8 + $0x178] sm:$0xff]   ;;  %v4404_v27 = vld [vmem:[#allocation8 + $0x2d0] sm:$0xff]   ;;  %v5143_v41 = vld [vmem:[#allocation2 + $0x78] sm:$0xff] }
  0x83   :  { %3975 = vmatpush3.bf16.msra.mxu0 %v4359_v53  ;;  %v5082_v53 = vld [vmem:[#allocation2 + $0x20] sm:$0xff] }
  0x84   :  { %3997 = vmatpush3.bf16.msra.mxu1 %v4361_v11  ;;  %4004 = vmatprep.subr.bf16.mxu0 %v4362_v13  ;;  %5967 = vst [vmem:[#allocation17_spill] sm:$0xff] %v5082_v53  ;;  %v5086_v58 = vmax.bf16 %v5945_v59, %v5082_v53  ;;  %v5094_v11 = vld [vmem:[#allocation2 + $0x28] sm:$0xff] }
  0x85   :  { %4026 = vmatprep.subr.bf16.mxu1 %v4364_v36  ;;  %v5098_v12 = vmax.bf16 %v5945_v59, %v5094_v11  ;;  %v5100_v13 = vld [vmem:[#allocation2 + $0x68] sm:$0xff] }
  0x86   :  { %2091 = vmatmul.mubr.bf16.vlgmr.msra.gmra.mrb[0].mxu0 %v3698_v30  ;;  %v5104_v26 = vmax.bf16 %v5945_v59, %v5100_v13  ;;  %v4406_v30 = vld [vmem:[#allocation8 + $0x258] sm:$0xff]   ;;  %v3707_v34 = vcombine.high %v5086_v58, %v5092_v5  ;;  %v3706_v40 = vcombine.low %v5086_v58, %v5092_v5 }
  0x87   :  { %4005 = vmatpush3.bf16.msra.mxu0 %v4363_v28  ;;  %2132 = vmatmul.mubr.bf16.vlgmr.msra.gmra.mrb[0].mxu1 %v3700_v37  ;;  %v4405_v28 = vld [vmem:[#allocation8 + $0x290] sm:$0xff]   ;;  %v4407_v37 = vld [vmem:[#allocation8 + $0x218] sm:$0xff]  }
  0x88   :  { %4027 = vmatpush3.bf16.msra.mxu1 %v4365_v38  ;;  %4006 = vmatprep.subr.bf16.mxu0 %v4366_v39  ;;  %v3709_v36 = vcombine.high %v5098_v12, %v5104_v26  ;;  %v4408_v38 = vld [vmem:[#allocation8 + $0x2d8] sm:$0xff]   ;;  %v4410_v39 = vld [vmem:[#allocation8 + $0x260] sm:$0xff]  }
  0x89   :  { %4028 = vmatprep.subr.bf16.mxu1 %v4368_v57  ;;  %2172 = vmatprep.mubr.bf16.mxu0 %v3703_v45  ;;  %v4411_v57 = vld [vmem:[#allocation8 + $0x220] sm:$0xff]   ;;  %v5149_v45 = vld [vmem:[#allocation5 + $0x3c] sm:$0xff]  ;;  %v5162_v58 = vld [vmem:[#allocation2 + $0x8] sm:$0xff] }
  0x8a   :  { %2213 = vmatprep.mubr.bf16.mxu1 %v3705_v47  ;;  %v4428_v47 = vld [vmem:[#allocation8 + $0x3c0] sm:$0xff]   ;;  %v288_v5 = vrot.slane %v5162_v58, 4 }
  0x8b   :  { %4007 = vmatpush3.bf16.msra.mxu0 %v4367_v52  ;;  %v4409_v52 = vld [vmem:[#allocation8 + $0x298] sm:$0xff]  }
  0x8c   :  { %4008 = vmatprep.subr.bf16.mxu0 %v4370_v31  ;;  %4029 = vmatpush3.bf16.msra.mxu1 %v4369_v35  ;;  %v4412_v31 = vld [vmem:[#allocation8 + $0x2e0] sm:$0xff]   ;;  %v4414_v35 = vld [vmem:[#allocation8 + $0x268] sm:$0xff]  }
  0x8d   :  { %4030 = vmatprep.subr.bf16.mxu1 %v4372_v54  ;;  %v4413_v54 = vld [vmem:[#allocation8 + $0x2a0] sm:$0xff]  }
  0x8f   :  { %4009 = vmatpush3.bf16.msra.mxu0 %v4371_v55  ;;  %v4415_v55 = vld [vmem:[#allocation8 + $0x228] sm:$0xff]  }
  0x90   :  { %4010 = vmatprep.subr.bf16.mxu0 %v4374_v60  ;;  %4031 = vmatpush3.bf16.msra.mxu1 %v4373_v56  ;;  %v4416_v60 = vld [vmem:[#allocation8 + $0x2e8] sm:$0xff]   ;;  %v4418_v56 = vld [vmem:[#allocation8 + $0x270] sm:$0xff]  }
  0x91   :  { %4032 = vmatprep.subr.bf16.mxu1 %v4376_v62  ;;  %v4419_v62 = vld [vmem:[#allocation8 + $0x230] sm:$0xff]  }
  0x93   :  { %4011 = vmatpush3.bf16.msra.mxu0 %v4375_v61  ;;  %v4417_v61 = vld [vmem:[#allocation8 + $0x2a8] sm:$0xff]  }
  0x94   :  { %4012 = vmatprep.subr.bf16.mxu0 %v4378_v29  ;;  %4033 = vmatpush3.bf16.msra.mxu1 %v4377_v1  ;;  %v4420_v29 = vld [vmem:[#allocation8 + $0x2f0] sm:$0xff]   ;;  %v4422_v1 = vld [vmem:[#allocation8 + $0x278] sm:$0xff]  }
  0x95   :  { %4034 = vmatprep.subr.bf16.mxu1 %v4380_v2  ;;  %v5111_v2 = vshrl.u32 %v484_v0, 7 }
  0x97   :  { %4013 = vmatpush3.bf16.msra.mxu0 %v4379_v3  ;;  %5968 = vst [vmem:[#allocation18_spill] sm:$0xff] %v5111_v2  ;;  %v4421_v3 = vld [vmem:[#allocation8 + $0x2b0] sm:$0xff]  }
  0x98   :  { %4014 = vmatprep.subr.bf16.mxu0 %v4382_v4  ;;  %4035 = vmatpush3.bf16.msra.mxu1 %v4381_v14  ;;  %v4423_v4 = vld [vmem:[#allocation8 + $0x238] sm:$0xff]  }
  0x99   :  { %4036 = vmatprep.subr.bf16.mxu1 %v4384_v18  ;;  %v4424_v14 = vld [vmem:[#allocation8 + $0x2f8] sm:$0xff]   ;;  %v4426_v18 = vld [vmem:[#allocation8 + $0x340] sm:$0xff]  }
  0x9b   :  { %4015 = vmatpush3.bf16.msra.mxu0 %v4383_v15  ;;  %v5113_v15 = vld [vmem:[#allocation2 + $0x30] sm:$0xff] }
  0x9c   :  { %4016 = vmatprep.subr.bf16.mxu0 %v4386_v16  ;;  %4037 = vmatpush3.bf16.msra.mxu1 %v4385_v19  ;;  %5969 = vst [vmem:[#allocation19_spill] sm:$0xff] %v5113_v15  ;;  %v5117_v16 = vmax.bf16 %v5945_v59, %v5113_v15  ;;  %v5119_v19 = vld [vmem:[#allocation2 + $0x70] sm:$0xff] }
  0x9d   :  { %4038 = vmatprep.subr.bf16.mxu1 %v4388_v20  ;;  %v5123_v0 = vmax.bf16 %v5945_v59, %v5119_v19  ;;  %v5125_v20 = vld [vmem:[#allocation5] sm:$0xff] }
  0x9f   :  { %4017 = vmatpush3.bf16.msra.mxu0 %v4387_v6  ;;  %v614_v6 = vrot.slane %v5125_v20, 4 }
  0xa0   :  { %4039 = vmatpush3.bf16.msra.mxu1 %v4389_v7  ;;  %4018 = vmatprep.subr.bf16.mxu0 %v4390_v8  ;;  %v5128_v7 = vld [vmem:[#allocation5 + $0x8] sm:$0xff] }
  0xa1   :  { %4040 = vmatprep.subr.bf16.mxu1 %v4392_v21  ;;  %v638_v8 = vrot.slane %v5128_v7, 4  ;;  %v5132_v21 = vld [vmem:[#allocation5 + $0x34] sm:$0xff] }
  0xa3   :  { %4019 = vmatpush3.bf16.msra.mxu0 %v4391_v17  ;;  %v816_v17 = vsub.s32 0, %v5111_v2 }
  0xa4   :  { %4041 = vmatpush3.bf16.msra.mxu1 %v4393_v9  ;;  %4048 = vmatprep.subr.bf16.mxu0 %v4394_v23  ;;  %v615_v9 = vrot.slane %v5132_v21, 4  ;;  %v4427_v23 = vld [vmem:[#allocation8 + $0x300] sm:$0xff]  }
  0xa5   :  { %4070 = vmatprep.subr.bf16.mxu1 %v4396_v44  ;;  %v5147_v44 = vmax.bf16 %v5945_v59, %v5143_v41 }
  0xa6   :  { %2173 = vmatmul.mubr.bf16.vlgmr.msra.gmra.mrb[4].mxu0 %v3702_v46  ;;  %v639_v46 = vrot.slane %v5149_v45, 4 }
  0xa7   :  { %4049 = vmatpush3.bf16.msra.mxu0 %v4395_v24  ;;  %2214 = vmatmul.mubr.bf16.vlgmr.msra.gmra.mrb[4].mxu1 %v3704_v32  ;;  %v5137_v24 = vld [vmem:[#allocation2 + $0x38] sm:$0xff]  ;;  %v5152_v32 = vld [vmem:[#allocation2] sm:$0xff] }
  0xa8   :  { %4050 = vmatprep.subr.bf16.mxu0 %v4398_v48  ;;  %4071 = vmatpush3.bf16.msra.mxu1 %v4397_v42  ;;  %5970 = vst [vmem:[#allocation20_spill] sm:$0xff] %v5137_v24  ;;  %v5141_v25 = vmax.bf16 %v5945_v59, %v5137_v24  ;;  %v264_v42 = vrot.slane %v5152_v32, 4  ;;  %v4430_v48 = vld [vmem:[#allocation8 + $0x348] sm:$0xff]   ;;  %v360_v59 = vrot.slane %v5082_v53, 4 }
  0xa9   :  { %4072 = vmatprep.subr.bf16.mxu1 %v4400_v50  ;;  %2254 = vmatprep.mubr.bf16.mxu0 %v3707_v34  ;;  %v5157_v50 = vld [vmem:[#allocation2 + $0x40] sm:$0xff] }
  0xaa   :  { %2295 = vmatprep.mubr.bf16.mxu1 %v3709_v36  ;;  %v4432_v36 = vld [vmem:[#allocation8 + $0x3c8] sm:$0xff]  }
  0xab   :  { %4051 = vmatpush3.bf16.msra.mxu0 %v4399_v49  ;;  %v3711_v49 = vcombine.high %v5117_v16, %v5123_v0 }
  0xac   :  { %4073 = vmatpush3.bf16.msra.mxu1 %v4401_v33  ;;  %4052 = vmatprep.subr.bf16.mxu0 %v4402_v43  ;;  %v265_v33 = vrot.slane %v5157_v50, 4  ;;  %v3708_v43 = vcombine.low %v5098_v12, %v5104_v26  ;;  %v4434_v26 = vld [vmem:[#allocation8 + $0x350] sm:$0xff]  }
  0xad   :  { %4074 = vmatprep.subr.bf16.mxu1 %v4404_v27  ;;  %v4431_v27 = vld [vmem:[#allocation8 + $0x308] sm:$0xff]  }
  0xaf   :  { %4053 = vmatpush3.bf16.msra.mxu0 %v4403_v51  ;;  %v4429_v51 = vld [vmem:[#allocation8 + $0x380] sm:$0xff]  }
  0xb0   :  { %4054 = vmatprep.subr.bf16.mxu0 %v4406_v30  ;;  %4075 = vmatpush3.bf16.msra.mxu1 %v4405_v28  ;;  %v3713_v30 = vcombine.high %v5141_v25, %v5147_v44  ;;  %v5167_v28 = vld [vmem:[#allocation2 + $0x48] sm:$0xff] }
  0xb1   :  { %4076 = vmatprep.subr.bf16.mxu1 %v4408_v38  ;;  %v289_v34 = vrot.slane %v5167_v28, 4  ;;  %v385_v38 = vrot.slane %v5100_v13, 4 }
  0xb3   :  { %4055 = vmatpush3.bf16.msra.mxu0 %v4407_v37  ;;  %v5170_v37 = vld [vmem:[#allocation2 + $0x10] sm:$0xff] }
  0xb4   :  { %4056 = vmatprep.subr.bf16.mxu0 %v4410_v39  ;;  %4077 = vmatpush3.bf16.msra.mxu1 %v4409_v52  ;;  %v312_v12 = vrot.slane %v5170_v37, 4  ;;  %v5175_v52 = vld [vmem:[#allocation2 + $0x50] sm:$0xff]  ;;  %v5210_v39 = vunpack.c.l.bf16 %v288_v5  ;;  %v409_v5 = vrot.slane %v5119_v19, 4 }
  0xb5   :  { %4078 = vmatprep.subr.bf16.mxu1 %v4412_v31  ;;  %v4433_v31 = vld [vmem:[#allocation8 + $0x388] sm:$0xff]  }
  0xb7   :  { %4057 = vmatpush3.bf16.msra.mxu0 %v4411_v57  ;;  %v313_v57 = vrot.slane %v5175_v52, 4 }
  0xb8   :  { %4058 = vmatprep.subr.bf16.mxu0 %v4414_v35  ;;  %4079 = vmatpush3.bf16.msra.mxu1 %v4413_v54  ;;  %v5179_v54 = vunpack.c.l.bf16 %v614_v6  ;;  %v4440_v6 = vld [vmem:[#allocation8 + $0x3d8] sm:$0xff]   ;;  %v5218_v35 = vld [vmem:[#allocation2 + $0x18] sm:$0xff] }
  0xb9   :  { %4080 = vmatprep.subr.bf16.mxu1 %v4416_v60  ;;  %v361_v60 = vrot.slane %v5088_v63, 4  ;;  %5976 = vst [vmem:[#allocation26_spill] sm:$0xff] %v5218_v35 }
  0xba   :  { %5971 = vst [vmem:[#allocation21_spill] sm:$0xff] %v5179_v54  ;;  %v5255_v54 = vunpack.c.l.bf16 %v385_v38  ;;  %v4448_v38 = vld [vmem:[#allocation8 + $0x3e8] sm:$0xff]  }
  0xbb   :  { %4059 = vmatpush3.bf16.msra.mxu0 %v4415_v55  ;;  %v5181_v55 = vld [vmem:[#allocation5 + $0x10] sm:$0xff] }
  0xbc   :  { %4060 = vmatprep.subr.bf16.mxu0 %v4418_v56  ;;  %4081 = vmatpush3.bf16.msra.mxu1 %v4417_v61  ;;  %v848_v56 = vsub.s32 4, %v5111_v2  ;;  %v4435_v61 = vld [vmem:[#allocation8 + $0x310] sm:$0xff]  }
  0xbd   :  { %4082 = vmatprep.subr.bf16.mxu1 %v4420_v29  ;;  %v5216_v29 = vunpack.c.l.bf16 %v312_v12  ;;  %v4441_v12 = vld [vmem:[#allocation8 + $0x398] sm:$0xff]  }
  0xbf   :  { %4061 = vmatpush3.bf16.msra.mxu0 %v4419_v62  ;;  %v5185_v62 = vunpack.c.l.bf16 %v615_v9  ;;  %v5197_v9 = vld [vmem:[#allocation2 + $0x58] sm:$0xff]  ;;  %5975 = vst [vmem:[#allocation25_spill] sm:$0xff] %v5216_v29 }
  0xc0   :  { %4062 = vmatprep.subr.bf16.mxu0 %v4422_v1  ;;  %4083 = vmatpush3.bf16.msra.mxu1 %v4421_v3  ;;  %v5188_v1 = vunpack.c.l.bf16 %v638_v8  ;;  %v824_v3 = vsub.s32 1, %v5111_v2  ;;  %v4438_v8 = vld [vmem:[#allocation8 + $0x358] sm:$0xff]   ;;  %v5294_v29 = vld [vmem:[#allocation5 + $0x5c] sm:$0xff] }
  0xc1   :  { %4084 = vmatprep.subr.bf16.mxu1 %v4424_v14  ;;  %5972 = vst [vmem:[#allocation22_spill] sm:$0xff] %v5185_v62  ;;  %v5191_v14 = vunpack.c.l.bf16 %v639_v46  ;;  %v856_v46 = vsub.s32 5, %v5111_v2  ;;  %v5269_v2 = vunpack.c.l.bf16 %v360_v59  ;;  %v5271_v62 = vld [vmem:[#allocation5 + $0x4c] sm:$0xff]  ;;  %5986 = vst [vmem:[#allocation33_spill] sm:$0xff] %v5294_v29 }
  0xc2   :  { %5973 = vst [vmem:[#allocation23_spill] sm:$0xff] %v5188_v1 }
  0xc3   :  { %4063 = vmatpush3.bf16.msra.mxu0 %v4423_v4  ;;  %v4436_v4 = vld [vmem:[#allocation8 + $0x3d0] sm:$0xff]   ;;  %5974 = vst [vmem:[#allocation24_spill] sm:$0xff] %v5191_v14  ;;  %v4447_v14 = vld [vmem:[#allocation8 + $0x328] sm:$0xff]   ;;  %5980 = vst [vmem:[#allocation28_spill] sm:$0xff] %v5269_v2 }
  0xc4   :  { %4092 = vmatprep.subr.bf16.mxu0 %v4426_v18  ;;  %4085 = vmatpush3.bf16.msra.mxu1 %v4425_v22  ;;  %v5193_v18 = vld [vmem:[#allocation5 + $0x44] sm:$0xff] }
  0xc5   :  { %4114 = vmatprep.subr.bf16.mxu1 %v4428_v47  ;;  %v4446_v47 = vld [vmem:[#allocation8 + $0x368] sm:$0xff]  }
  0xc6   :  { %2255 = vmatmul.mubr.bf16.vlgmr.msra.gmra.mrb[8].mxu0 %v3706_v40  ;;  %v806_v40 = vld [vmem:[#allocation7] sm:$0xff] }
  0xc7   :  { %4093 = vmatpush3.bf16.msra.mxu0 %v4427_v23  ;;  %2336 = vmatprep.mubr.bf16.mxu0 %v3711_v49  ;;  %v337_v23 = vrot.slane %v5197_v9, 4  ;;  %v5203_v49 = vunpack.c.l.bf16 %v265_v33  ;;  %v817_v22 = vrot.slane %v806_v40, %v816_v17 }
  0xc8   :  { %4094 = vmatprep.subr.bf16.mxu0 %v4430_v48  ;;  %2296 = vmatmul.mubr.bf16.vlgmr.msra.gmra.mrb[8].mxu1 %v3708_v43  ;;  %v5201_v48 = vunpack.c.l.bf16 %v264_v42  ;;  %v4437_v43 = vld [vmem:[#allocation8 + $0x390] sm:$0xff]   ;;  %v5212_v42 = vunpack.c.l.bf16 %v289_v34  ;;  %v4442_v34 = vld [vmem:[#allocation8 + $0x360] sm:$0xff]  }
  0xc9   :  { %4115 = vmatpush3.bf16.msra.mxu1 %v4429_v51  ;;  %2377 = vmatprep.mubr.bf16.mxu1 %v3713_v30  ;;  %v5223_v51 = vunpack.c.l.bf16 %v313_v57  ;;  %v5232_v30 = vunpack.c.l.bf16 %v337_v23  ;;  %v4443_v57 = vld [vmem:[#allocation8 + $0x320] sm:$0xff]   ;;  %v5241_v23 = vunpack.c.l.bf16 %v361_v60  ;;  %v408_v60 = vrot.slane %v5113_v15, 4  ;;  %v5318_v15 = vld [vmem:[#allocation5 + $0x20] sm:$0xff] }
  0xca   :  { %4116 = vmatprep.subr.bf16.mxu1 %v4432_v36 }
  0xcb   :  { %4095 = vmatpush3.bf16.msra.mxu0 %v4431_v27  ;;  %v5230_v27 = vrot.slane %v806_v40, %v824_v3  ;;  %v4444_v3 = vld [vmem:[#allocation8 + $0x3e0] sm:$0xff]  }
  0xcc   :  { %4096 = vmatprep.subr.bf16.mxu0 %v4434_v26  ;;  %v4439_v26 = vld [vmem:[#allocation8 + $0x318] sm:$0xff]  }
  0xcd   :  { %4117 = vmatpush3.bf16.msra.mxu1 %v4433_v31  ;;  %v5257_v31 = vunpack.c.l.bf16 %v409_v5  ;;  %v5286_v5 = vld [vmem:[#allocation5 + $0x54] sm:$0xff] }
  0xce   :  { %4118 = vmatprep.subr.bf16.mxu1 %v4436_v4  ;;  %v433_v4 = vrot.slane %v5143_v41, 4  ;;  %5984 = vst [vmem:[#allocation31_spill] sm:$0xff] %v5286_v5  ;;  %v711_v2 = vrot.slane %v5286_v5, 4  ;;  %v710_v5 = vrot.slane %v5318_v15, 4 }
  0xcf   :  { %4097 = vmatpush3.bf16.msra.mxu0 %v4435_v61  ;;  %v849_v61 = vrot.slane %v806_v40, %v848_v56  ;;  %v5238_v56 = vrot.slane %v806_v40, %v856_v46 }
  0xd0   :  { %4098 = vmatprep.subr.bf16.mxu0 %v4438_v8  ;;  %v336_v8 = vrot.slane %v5218_v35, 4  ;;  %v5292_v35 = vunpack.c.l.bf16 %v408_v60  ;;  %v5315_v60 = vld [vmem:[#allocation5 + $0x64] sm:$0xf] }
  0xd1   :  { %4119 = vmatpush3.bf16.msra.mxu1 %v4437_v43  ;;  %v384_v43 = vrot.slane %v5094_v11, 4  ;;  %5992 = vst [vmem:[#allocation39_spill] sm:$0xff] %v5315_v60 }
  0xd2   :  { %4120 = vmatprep.subr.bf16.mxu1 %v4440_v6  ;;  %5985 = vst [vmem:[#allocation32_spill] sm:$0xff] %v5292_v35 }
  0xd3   :  { %4099 = vmatpush3.bf16.msra.mxu0 %v4439_v26  ;;  %v4445_v26 = vld [vmem:[#allocation8 + $0x3a0] sm:$0xff]   ;;  %v5289_v53 = vunpack.c.l.bf16 %v384_v43  ;;  %v4452_v43 = vld [vmem:[#allocation8 + $0x3f0] sm:$0xff]  }
  0xd4   :  { %4100 = vmatprep.subr.bf16.mxu0 %v4442_v34  ;;  %v432_v34 = vrot.slane %v5137_v24, 4 }
  0xd5   :  { %4121 = vmatpush3.bf16.msra.mxu1 %v4441_v12  ;;  %v687_v12 = vrot.slane %v5271_v62, 4 }
  0xd6   :  { %4122 = vmatprep.subr.bf16.mxu1 %v4444_v3  ;;  %v5298_v59 = vunpack.c.l.bf16 %v432_v34  ;;  %v4454_v34 = vld [vmem:[#allocation8 + $0x378] sm:$0xff]  }
  0xd7   :  { %4101 = vmatpush3.bf16.msra.mxu0 %v4443_v57  ;;  %v5304_v35 = vunpack.c.l.bf16 %v687_v12 }
  0xd8   :  { %4102 = vmatprep.subr.bf16.mxu0 %v4446_v47  ;;  %v4449_v47 = vld [vmem:[#allocation8 + $0x3a8] sm:$0xff]   ;;  %5987 = vst [vmem:[#allocation34_spill] sm:$0xff] %v5298_v59  ;;  %v5310_v59 = vunpack.c.l.bf16 %v711_v2 }
  0xd9   :  { %4123 = vmatpush3.bf16.msra.mxu1 %v4445_v26  ;;  %5989 = vst [vmem:[#allocation36_spill] sm:$0xff] %v5304_v35  ;;  %v5307_v26 = vld [vmem:[#allocation5 + $0x18] sm:$0xff] }
  0xda   :  { %4124 = vmatprep.subr.bf16.mxu1 %v4448_v38  ;;  %5990 = vst [vmem:[#allocation37_spill] sm:$0xff] %v5310_v59 }
  0xdb   :  { %4103 = vmatpush3.bf16.msra.mxu0 %v4447_v14 }
  0xdd   :  { %4125 = vmatpush3.bf16.msra.mxu1 %v4449_v47 }
  0xde   :  { %4126 = vmatprep.subr.bf16.mxu1 %v4452_v43 }
  0xf9   :  { %v559_v36 = vpop.xlane.xlu1 %558 }
 0x101   :  { %v570_v10 = vpop.xlane.xlu1 %569 }
 0x102   :  { %v5228_v33 = vpop.xlane.xlu0 %227  ;;  %v5252_v6 = vmax.bf16 %v570_v10, %v559_v36  ;;  %v663_v10 = vrot.slane %v5193_v18, 4  ;;  %v5266_v36 = vunpack.c.l.bf16 %v336_v8 }
 0x103   :  { %v5977_v17 = vunpack.c.l.bf16 %v5228_v33  ;;  %v5978_v46 = vunpack.c.h.bf16 %v5228_v33  ;;  %v5993_v2 = vunpack.c.h.bf16 %v5228_v33 }
 0x104   :  { %5979 = vst [vmem:[#allocation27_spill] sm:$0xff] %v5266_v36  ;;  %v5981_v57 = vunpack.c.l.bf16 %v5252_v6 }
 0x105   :  { %v818_v40 = vmul.f32 %v817_v22, %v5977_v17  ;;  %v5250_v1 = vmul.f32 %v817_v22, %v5978_v46  ;;  %v5953_v22 = vunpack.c.h.bf16 %v5252_v6  ;;  %v5263_v46 = vunpack.c.l.bf16 %v433_v4  ;;  %v4450_v17 = vld [vmem:[#allocation8 + $0x370] sm:$0xff]  }
 0x106   :  { %v3694_v4 = vld [vmem:[%s5938_s3] ss:$0 sm:$0xff]  ;;  %v5279_v3 = vmul.f32 %v849_v61, %v5981_v57  ;;  %v735_v57 = vrot.slane %v5294_v29, 4  ;;  %4104 = vmatprep.subr.bf16.mxu0 %v4450_v17 }
 0x107   :  { %v5283_v8 = vmul.f32 %v849_v61, %v5953_v22  ;;  %v4451_v61 = vld [vmem:[#allocation8 + $0x330] sm:$0xff]   ;;  %v686_v22 = vrot.slane %v5307_v26, 4  ;;  %v820_v38 = vadd.f32 %v3694_v4, %v818_v40  ;;  %v821_v35 = vadd.f32 %v3694_v4, %v5250_v1  ;;  %v4456_v1 = vld [vmem:[#allocation8 + $0x3f8] sm:$0xff]  }
 0x108   :  { %5982 = vst [vmem:[#allocation29_spill] sm:$0xff] %v5279_v3  ;;  %v5300_v3 = vunpack.c.l.bf16 %v663_v10  ;;  %v5313_v24 = vunpack.c.l.bf16 %v735_v57  ;;  %v4453_v17 = vld [vmem:[#allocation8 + $0x3b0] sm:$0xff]   ;;  %4105 = vmatpush3.bf16.msra.mxu0 %v4451_v61  ;;  %v4455_v57 = vld [vmem:[#allocation8 + $0x338] sm:$0xff]  }
 0x109   :  { %5983 = vst [vmem:[#allocation30_spill] sm:$0xff] %v5283_v8  ;;  %v662_v8 = vrot.slane %v5181_v55, 4  ;;  %v5331_v47 = vunpack.c.l.bf16 %v686_v22  ;;  %4106 = vmatprep.subr.bf16.mxu0 %v4454_v34  ;;  %4127 = vmatpush3.bf16.msra.mxu1 %v4453_v17  ;;  %v5999_v34 = vunpack.c.l.bf16 %v5157_v50 }
 0x10a   :  { %5988 = vst [vmem:[#allocation35_spill] sm:$0xff] %v5300_v3  ;;  %v247_v36 = vpop.xlane.xlu0 %246  ;;  %5991 = vst [vmem:[#allocation38_spill] sm:$0xff] %v5313_v24  ;;  %v5994_v24 = vunpack.c.l.bf16 %v5228_v33  ;;  %v596_v33 = vpop.xlane.xlu1 %595  ;;  %4128 = vmatprep.subr.bf16.mxu1 %v4456_v1 }
 0x10b   :  { %v248_v10 = vunpack.c.l.bf16 %v247_v36  ;;  %v249_v3 = vunpack.c.h.bf16 %v247_v36  ;;  %v5328_v60 = vunpack.c.l.bf16 %v662_v8  ;;  %v5998_v8 = vmov 0  }
 0x10c   :  { %v5342_v61 = vmax.bf16 %v5998_v8, %v5125_v20  ;;  %v5346_v22 = vmax.bf16 %v5998_v8, %v5132_v21  ;;  %v5350_v43 = vmax.bf16 %v5998_v8, %v5128_v7  ;;  %4107 = vmatpush3.bf16.msra.mxu0 %v4455_v57 }
 0x10d   :  { %v251_v36 = vadd.f32 %v249_v3, %v5993_v2  ;;  %v826_v14 = vmul.f32 %v5230_v27, %v248_v10  ;;  %v827_v40 = vmul.f32 %v5230_v27, %v249_v3  ;;  %v250_v12 = vadd.f32 %v248_v10, %v5994_v24  ;;  %v4458_v3 = vld [vmem:[#allocation10 + $0x40] sm:$0xff]   ;;  %v4457_v24 = vld [vmem:[#allocation8 + $0x3b8] sm:$0xff]  }
 0x10e   :  { %4136 = vmatprep.subr.bf16.mxu0 %v4458_v3  ;;  %4129 = vmatpush3.bf16.msra.mxu1 %v4457_v24  ;;  %v4474_v24 = vld [vmem:[#allocation10 + $0x80] sm:$0xff]  }
 0x10f   :  { %v5333_v4 = vmul.f32 0.5, %v251_v36  ;;  %v5335_v2 = vadd.f32 %v826_v14, %v820_v38  ;;  %v5337_v59 = vadd.f32 %v827_v40, %v821_v35  ;;  %v5354_v35 = vmax.bf16 %v5998_v8, %v5149_v45  ;;  %v5365_v38 = vld [vmem:[#allocation5 + $0x28] sm:$0xff]  ;;  %v4472_v40 = vld [vmem:[#allocation10 + $0xc0] sm:$0xff]  }
 0x110   :  { %6000 = vst [vmem:[#allocation43_spill] sm:$0xff] %v5365_v38  ;;  %v734_v17 = vrot.slane %v5365_v38, 4  ;;  %v3710_v36 = vcombine.low %v5117_v16, %v5123_v0  ;;  %v5370_v27 = vmul.f32 0.5, %v250_v12  ;;  %v6002_v16 = vunpack.c.l.bf16 %v5167_v28  ;;  %v4460_v12 = vld [vmem:[#allocation10 + $0x48] sm:$0xff]   ;;  %4158 = vmatprep.subr.bf16.mxu1 %v4472_v40  ;;  %v4463_v38 = vld [vmem:[#allocation10 + $0x10] sm:$0xff]  }
 0x111   :  { %5995 = vst [vmem:[#allocation40_spill] sm:$0xff] %v5333_v4  ;;  %5996 = vst [vmem:[#allocation41_spill] sm:$0xff] %v5335_v2  ;;  %v5359_v10 = vsub.f32 %v5999_v34, %v5333_v4  ;;  %v5363_v14 = vsub.f32 %v5203_v49, %v5333_v4  ;;  %v5372_v2 = vunpack.c.l.bf16 %v710_v5  ;;  %v3712_v49 = vcombine.low %v5141_v25, %v5147_v44  ;;  %v4459_v34 = vld [vmem:[#allocation10] sm:$0xff]   ;;  %v4461_v40 = vld [vmem:[#allocation10 + $0x8] sm:$0xff]  }
 0x112   :  { %5997 = vst [vmem:[#allocation42_spill] sm:$0xff] %v5337_v59  ;;  %v586_v29 = vpop.xlane.xlu0 %585  ;;  %v5382_v0 = vsub.f32 %v6002_v16, %v5333_v4  ;;  %v5386_v5 = vmax.bf16 %v5998_v8, %v5181_v55  ;;  %v3843_v25 = vcombine.high %v5342_v61, %v5346_v22  ;;  %v5396_v28 = vmax.bf16 %v5998_v8, %v5193_v18 }
 0x113   :  { %6001 = vst [vmem:[#allocation44_spill] sm:$0xff] %v5372_v2  ;;  %v597_v59 = vmin.bf16 %v596_v33, %v586_v29  ;;  %v273_v57 = vadd.f32 %v5363_v14, %v5359_v10  ;;  %2337 = vmatmul.mubr.bf16.vlgmr.msra.gmra.mrb[12].mxu0 %v3710_v36  ;;  %v5403_v50 = vsub.f32 %v5212_v42, %v5333_v4  ;;  %v6005_v29 = vunpack.c.l.bf16 %v5175_v52 }
 0x114   :  { %6003 = vst [vmem:[#allocation45_spill] sm:$0xff] %v5386_v5  ;;  %6004 = vst [vmem:[#allocation46_spill] sm:$0xff] %v5396_v28  ;;  %v5417_v36 = vsub.f32 %v5201_v48, %v5370_v27  ;;  %4137 = vmatpush3.bf16.msra.mxu0 %v4459_v34  ;;  %v5427_v52 = vsub.f32 %v5223_v51, %v5333_v4  ;;  %2378 = vmatmul.mubr.bf16.vlgmr.msra.gmra.mrb[12].mxu1 %v3712_v49  ;;  %v4462_v48 = vld [vmem:[#allocation10 + $0x50] sm:$0xff]   ;;  %v6010_v51 = vunpack.c.l.bf16 %v5162_v58  ;;  %v4477_v58 = vld [vmem:[#allocation10 + $0x88] sm:$0xff]  }
 0x115   :  { %v598_v1 = vunpack.c.l.bf16 %v597_v59  ;;  %v599_v3 = vunpack.c.h.bf16 %v597_v59  ;;  %v283_v33 = vadd.f32 %v5382_v0, %v273_v57  ;;  %v5408_v44 = vsub.f32 %v6005_v29, %v5333_v4  ;;  %4138 = vmatprep.subr.bf16.mxu0 %v4460_v12  ;;  %4159 = vmatpush3.bf16.msra.mxu1 %v4474_v24 }
 0x116   :  { %v6006_v59 = vunpack.c.l.bf16 %v5152_v32  ;;  %v6009_v32 = vunpack.c.l.bf16 %v5197_v9  ;;  %v5444_v16 = vsub.f32 %v6010_v51, %v5370_v27  ;;  %v4476_v9 = vld [vmem:[#allocation10 + $0xc8] sm:$0xff]   ;;  %3330 = vmatprep.mubr.bf16.mxu0 %v3843_v25  ;;  %v6014_v12 = vunpack.c.h.bf16 %v5252_v6 }
 0x117   :  { %v5420_v57 = vmul.f32 %v5238_v56, %v598_v1  ;;  %v5423_v42 = vmul.f32 %v5238_v56, %v599_v3  ;;  %v297_v34 = vadd.f32 %v5403_v50, %v283_v33  ;;  %v6012_v33 = vunpack.c.l.bf16 %v5088_v63  ;;  %4160 = vmatprep.subr.bf16.mxu1 %v4476_v9 }
 0x118   :  { %v5413_v8 = vsub.f32 %v6006_v59, %v5370_v27  ;;  %v5432_v29 = vsub.f32 %v6009_v32, %v5333_v4  ;;  %v5437_v59 = vsub.f32 %v5232_v30, %v5333_v4  ;;  %v6011_v32 = vunpack.c.l.bf16 %v5252_v6  ;;  %4139 = vmatpush3.bf16.msra.mxu0 %v4461_v40 }
 0x119   :  { %6007 = vst [vmem:[#allocation47_spill] sm:$0xff] %v5420_v57  ;;  %6008 = vst [vmem:[#allocation48_spill] sm:$0xff] %v5423_v42  ;;  %v5451_v57 = vsub.f32 %v6012_v33, %v5333_v4  ;;  %v5455_v30 = vsub.f32 %v5241_v23, %v5333_v4  ;;  %v5457_v42 = vunpack.c.l.bf16 %v734_v17  ;;  %v601_v51 = vadd.f32 %v599_v3, %v6014_v12  ;;  %v4465_v33 = vld [vmem:[#allocation10 + $0x18] sm:$0xff]  }
 0x11a   :  { %v272_v56 = vadd.f32 %v5417_v36, %v5413_v8  ;;  %v600_v49 = vadd.f32 %v598_v1, %v6011_v32  ;;  %v307_v1 = vadd.f32 %v5408_v44, %v297_v34  ;;  %v5465_v63 = vsub.f32 %v5210_v39, %v5370_v27  ;;  %4140 = vmatprep.subr.bf16.mxu0 %v4462_v48  ;;  %v4464_v39 = vld [vmem:[#allocation10 + $0x58] sm:$0xff]  }
 0x11b   :  { %6013 = vst [vmem:[#allocation49_spill] sm:$0xff] %v5457_v42  ;;  %v6015_v23 = vunpack.c.l.bf16 %v5100_v13  ;;  %v5474_v25 = vsub.f32 %v5255_v54, %v5333_v4  ;;  %v6016_v6 = vunpack.c.l.bf16 %v5119_v19  ;;  %v5483_v24 = vsub.f32 %v5257_v31, %v5333_v4  ;;  %v4480_v31 = vld [vmem:[#allocation10 + $0xd0] sm:$0xff]   ;;  %4161 = vmatpush3.bf16.msra.mxu1 %v4477_v58  ;;  %v6023_v42 = vld [vmem:[#allocation17_spill] sm:$0xff] }
 0x11c   :  { %v282_v32 = vadd.f32 %v5444_v16, %v272_v56  ;;  %v321_v40 = vadd.f32 %v5427_v52, %v307_v1  ;;  %v6017_v13 = vunpack.c.l.bf16 %v5143_v41  ;;  %v6018_v19 = vunpack.c.l.bf16 %v5170_v37  ;;  %v4481_v37 = vld [vmem:[#allocation10 + $0x90] sm:$0xff]   ;;  %4141 = vmatpush3.bf16.msra.mxu0 %v4463_v38  ;;  %4162 = vmatprep.subr.bf16.mxu1 %v4480_v31  ;;  %v6027_v31 = vld [vmem:[#allocation19_spill] sm:$0xff] }
 0x11d   :  { %v5470_v17 = vsub.f32 %v6015_v23, %v5333_v4  ;;  %v5479_v3 = vsub.f32 %v6016_v6, %v5333_v4  ;;  %v5497_v12 = vmul.f32 0.5, %v600_v49  ;;  %v5501_v48 = vsub.f32 %v5263_v46, %v5333_v4  ;;  %v6019_v6 = vld [vmem:[#allocation25_spill] sm:$0xff]  ;;  %4142 = vmatprep.subr.bf16.mxu0 %v4464_v39 }
 0x11e   :  { %v5489_v34 = vsub.f32 %v6017_v13, %v5333_v4  ;;  %v296_v54 = vadd.f32 %v5465_v63, %v282_v32  ;;  %v5495_v56 = vsub.f32 %v6018_v19, %v5370_v27  ;;  %v261_v41 = vmul.f32 %v5359_v10, %v5359_v10  ;;  %v4466_v32 = vld [vmem:[#allocation10 + $0x60] sm:$0xff]   ;;  %v4484_v46 = vld [vmem:[#allocation10 + $0xd8] sm:$0xff]  }
 0x11f   :  { %v275_v1 = vmul.f32 %v5363_v14, %v5363_v14  ;;  %v5507_v23 = vmul.f32 0.5, %v601_v51  ;;  %v331_v9 = vadd.f32 %v5432_v29, %v321_v40  ;;  %v5513_v13 = vsub.f32 %v6019_v6, %v5370_v27  ;;  %v6020_v10 = vld [vmem:[#allocation26_spill] sm:$0xff]  ;;  %v6022_v14 = vld [vmem:[#allocation27_spill] sm:$0xff]  ;;  %4163 = vmatpush3.bf16.msra.mxu1 %v4481_v37 }
 0x120   :  { %v306_v49 = vadd.f32 %v5495_v56, %v296_v54  ;;  %v6021_v19 = vunpack.c.l.bf16 %v6020_v10  ;;  %v5522_v58 = vsub.f32 %v6022_v14, %v5370_v27  ;;  %v285_v40 = vmul.f32 %v5382_v0, %v5382_v0  ;;  %v4485_v54 = vld [vmem:[#allocation10 + $0x98] sm:$0xff]   ;;  %v4467_v14 = vld [vmem:[#allocation10 + $0x20] sm:$0xff]   ;;  %4143 = vmatpush3.bf16.msra.mxu0 %v4465_v33  ;;  %4164 = vmatprep.subr.bf16.mxu1 %v4484_v46 }
 0x121   :  { %v277_v51 = vadd.f32 %v275_v1, %v261_v41  ;;  %v345_v6 = vadd.f32 %v5437_v59, %v331_v9  ;;  %v6024_v5 = vunpack.c.l.bf16 %v6023_v42  ;;  %v6026_v0 = vunpack.c.l.bf16 %v5094_v11  ;;  %v4468_v42 = vld [vmem:[#allocation10 + $0x68] sm:$0xff]   ;;  %4144 = vmatprep.subr.bf16.mxu0 %v4466_v32 }
 0x122   :  { %v5518_v4 = vsub.f32 %v6021_v19, %v5370_v27  ;;  %v320_v38 = vadd.f32 %v5513_v13, %v306_v49  ;;  %v6025_v19 = vld [vmem:[#allocation28_spill] sm:$0xff]  ;;  %v5544_v41 = vsub.f32 %v5289_v53, %v5370_v27  ;;  %v4488_v53 = vld [vmem:[#allocation10 + $0xe0] sm:$0xff]   ;;  %v260_v37 = vmul.f32 %v5413_v8, %v5413_v8 }
 0x123   :  { %v5531_v10 = vsub.f32 %v6024_v5, %v5370_v27  ;;  %v5535_v28 = vsub.f32 %v6025_v19, %v5370_v27  ;;  %v5540_v39 = vsub.f32 %v6026_v0, %v5370_v27  ;;  %v287_v1 = vadd.f32 %v285_v40, %v277_v51  ;;  %v6029_v0 = vld [vmem:[#allocation32_spill] sm:$0xff]  ;;  %4165 = vmatpush3.bf16.msra.mxu1 %v4485_v54  ;;  %v4493_v54 = vld [vmem:[#allocation10 + $0xa8] sm:$0xff]  }
 0x124   :  { %v299_v5 = vmul.f32 %v5403_v50, %v5403_v50  ;;  %v355_v9 = vadd.f32 %v5451_v57, %v345_v6  ;;  %v330_v49 = vadd.f32 %v5518_v4, %v320_v38  ;;  %v6028_v19 = vunpack.c.l.bf16 %v6027_v31  ;;  %v4489_v6 = vld [vmem:[#allocation10 + $0xa0] sm:$0xff]   ;;  %4145 = vmatpush3.bf16.msra.mxu0 %v4467_v14  ;;  %v4471_v14 = vld [vmem:[#allocation10 + $0x30] sm:$0xff]   ;;  %4166 = vmatprep.subr.bf16.mxu1 %v4488_v53 }
 0x125   :  { %v5557_v2 = vsub.f32 %v6029_v0, %v5370_v27  ;;  %v309_v50 = vmul.f32 %v5408_v44, %v5408_v44  ;;  %v274_v40 = vmul.f32 %v5417_v36, %v5417_v36  ;;  %v323_v36 = vmul.f32 %v5427_v52, %v5427_v52  ;;  %4146 = vmatprep.subr.bf16.mxu0 %v4468_v42  ;;  %v4473_v42 = vld [vmem:[#allocation10 + $0x78] sm:$0xff]   ;;  %v4496_v53 = vld [vmem:[#allocation10 + $0xf0] sm:$0xff]  }
 0x126   :  { %v5553_v11 = vsub.f32 %v6028_v19, %v5370_v27  ;;  %v301_v51 = vadd.f32 %v299_v5, %v287_v1  ;;  %v369_v38 = vadd.f32 %v5455_v30, %v355_v9  ;;  %v344_v31 = vadd.f32 %v5522_v58, %v330_v49  ;;  %v6030_v19 = vld [vmem:[#allocation20_spill] sm:$0xff]  ;;  %v6032_v1 = vld [vmem:[#allocation34_spill] sm:$0xff]  ;;  %v4469_v5 = vld [vmem:[#allocation10 + $0x28] sm:$0xff]  }
 0x127   :  { %v6031_v33 = vunpack.c.l.bf16 %v6030_v19  ;;  %v5574_v44 = vsub.f32 %v6032_v1, %v5370_v27  ;;  %v276_v32 = vadd.f32 %v274_v40, %v260_v37  ;;  %v284_v9 = vmul.f32 %v5444_v16, %v5444_v16  ;;  %v4470_v49 = vld [vmem:[#allocation10 + $0x70] sm:$0xff]   ;;  %4167 = vmatpush3.bf16.msra.mxu1 %v4489_v6  ;;  %v6034_v6 = vld [vmem:[#allocation22_spill] sm:$0xff] }
 0x128   :  { %v311_v8 = vadd.f32 %v309_v50, %v301_v51  ;;  %v379_v19 = vadd.f32 %v5470_v17, %v369_v38  ;;  %v333_v1 = vmul.f32 %v5432_v29, %v5432_v29  ;;  %v347_v46 = vmul.f32 %v5437_v59, %v5437_v59  ;;  %v4492_v51 = vld [vmem:[#allocation10 + $0xe8] sm:$0xff]   ;;  %4147 = vmatpush3.bf16.msra.mxu0 %v4469_v5 }
 0x129   :  { %v5570_v0 = vsub.f32 %v6031_v33, %v5370_v27  ;;  %v354_v33 = vadd.f32 %v5531_v10, %v344_v31  ;;  %v357_v52 = vmul.f32 %v5451_v57, %v5451_v57  ;;  %v286_v37 = vadd.f32 %v284_v9, %v276_v32  ;;  %4148 = vmatprep.subr.bf16.mxu0 %v4470_v49 }
 0x12a   :  { %v325_v50 = vadd.f32 %v323_v36, %v311_v8  ;;  %v298_v16 = vmul.f32 %v5465_v63, %v5465_v63  ;;  %v393_v40 = vadd.f32 %v5474_v25, %v379_v19  ;;  %v371_v29 = vmul.f32 %v5455_v30, %v5455_v30  ;;  %4168 = vmatprep.subr.bf16.mxu1 %v4492_v51 }
 0x12b   :  { %v368_v38 = vadd.f32 %v5535_v28, %v354_v33  ;;  %v381_v59 = vmul.f32 %v5470_v17, %v5470_v17  ;;  %v395_v57 = vmul.f32 %v5474_v25, %v5474_v25  ;;  %v308_v63 = vmul.f32 %v5495_v56, %v5495_v56  ;;  %4169 = vmatpush3.bf16.msra.mxu1 %v4493_v54  ;;  %v4500_v54 = vld [vmem:[#allocation10 + $0xf8] sm:$0xff]  }
 0x12c   :  { %v335_v31 = vadd.f32 %v333_v1, %v325_v50  ;;  %v300_v8 = vadd.f32 %v298_v16, %v286_v37  ;;  %v403_v36 = vadd.f32 %v5479_v3, %v393_v40  ;;  %v405_v30 = vmul.f32 %v5479_v3, %v5479_v3  ;;  %v4497_v1 = vld [vmem:[#allocation10 + $0xb0] sm:$0xff]   ;;  %v4475_v40 = vld [vmem:[#allocation10 + $0x38] sm:$0xff]   ;;  %4149 = vmatpush3.bf16.msra.mxu0 %v4471_v14 }
 0x12d   :  { %v378_v32 = vadd.f32 %v5540_v39, %v368_v38  ;;  %v322_v17 = vmul.f32 %v5513_v13, %v5513_v13  ;;  %v6033_v19 = vunpack.c.l.bf16 %v5132_v21  ;;  %v5613_v33 = vsub.f32 %v6034_v6, %v5507_v23  ;;  %4150 = vmatprep.subr.bf16.mxu0 %v4473_v42  ;;  %4170 = vmatprep.subr.bf16.mxu1 %v4496_v53  ;;  %v6038_v6 = vld [vmem:[#allocation35_spill] sm:$0xff] }
 0x12e   :  { %v349_v9 = vadd.f32 %v347_v46, %v335_v31  ;;  %v310_v25 = vadd.f32 %v308_v63, %v300_v8  ;;  %v417_v3 = vadd.f32 %v5483_v24, %v403_v36  ;;  %v419_v13 = vmul.f32 %v5483_v24, %v5483_v24  ;;  %v6036_v63 = vld [vmem:[#allocation24_spill] sm:$0xff] }
 0x12f   :  { %v5609_v56 = vsub.f32 %v6033_v19, %v5507_v23  ;;  %v392_v50 = vadd.f32 %v5544_v41, %v378_v32  ;;  %v332_v5 = vmul.f32 %v5518_v4, %v5518_v4  ;;  %v6035_v49 = vunpack.c.l.bf16 %v5149_v45  ;;  %4171 = vmatpush3.bf16.msra.mxu1 %v4497_v1 }
 0x130   :  { %v359_v21 = vadd.f32 %v357_v52, %v349_v9  ;;  %v324_v46 = vadd.f32 %v322_v17, %v310_v25  ;;  %v427_v38 = vadd.f32 %v5489_v34, %v417_v3  ;;  %v429_v4 = vmul.f32 %v5489_v34, %v5489_v34  ;;  %v4478_v52 = vld [vmem:[#allocation10 + $0x140] sm:$0xff]   ;;  %4151 = vmatpush3.bf16.msra.mxu0 %v4475_v40 }
 0x131   :  { %v623_v37 = vadd.f32 %v5613_v33, %v5609_v56  ;;  %v5626_v16 = vsub.f32 %v6035_v49, %v5507_v23  ;;  %v402_v24 = vadd.f32 %v5553_v11, %v392_v50  ;;  %v346_v51 = vmul.f32 %v5522_v58, %v5522_v58  ;;  %v4479_v3 = vld [vmem:[#allocation10 + $0x100] sm:$0xff]   ;;  %4180 = vmatprep.subr.bf16.mxu0 %v4478_v52 }
 0x132   :  { %v373_v31 = vadd.f32 %v371_v29, %v359_v21  ;;  %v334_v8 = vadd.f32 %v332_v5, %v324_v46  ;;  %v5637_v36 = vsub.f32 %v6036_v63, %v5507_v23  ;;  %v441_v32 = vadd.f32 %v5501_v48, %v427_v38  ;;  %v6040_v5 = vld [vmem:[#allocation21_spill] sm:$0xff]  ;;  %4172 = vmatprep.subr.bf16.mxu1 %v4500_v54  ;;  %v4483_v63 = vld [vmem:[#allocation10 + $0x108] sm:$0xff]  }
 0x133   :  { %v633_v45 = vadd.f32 %v5626_v16, %v623_v37  ;;  %v416_v17 = vadd.f32 %v5557_v2, %v402_v24  ;;  %v443_v34 = vmul.f32 %v5501_v48, %v5501_v48  ;;  %v356_v58 = vmul.f32 %v5531_v10, %v5531_v10  ;;  %v4501_v24 = vld [vmem:[#allocation10 + $0xb8] sm:$0xff]  }
 0x134   :  { %v383_v29 = vadd.f32 %v381_v59, %v373_v31  ;;  %v348_v14 = vadd.f32 %v346_v51, %v334_v8  ;;  %v6037_v25 = vunpack.c.l.bf16 %v5193_v18  ;;  %448 = vadd.xlane.f32.xlu1 %v441_v32  ;;  %v370_v48 = vmul.f32 %v5535_v28, %v5535_v28  ;;  %v4482_v28 = vld [vmem:[#allocation10 + $0x148] sm:$0xff]   ;;  %4173 = vmatpush3.bf16.msra.mxu1 %v4501_v24 }
 0x135   :  { %v647_v9 = vadd.f32 %v5637_v36, %v633_v45  ;;  %v426_v19 = vadd.f32 %v5570_v0, %v416_v17  ;;  %v5656_v10 = vsub.f32 %v6038_v6, %v5507_v23  ;;  %v6039_v59 = vunpack.c.l.bf16 %v5125_v20 }
 0x136   :  { %v5649_v42 = vsub.f32 %v6037_v25, %v5507_v23  ;;  %v397_v18 = vadd.f32 %v395_v57, %v383_v29  ;;  %v358_v50 = vadd.f32 %v356_v58, %v348_v14  ;;  %v5666_v21 = vsub.f32 %v6040_v5, %v5497_v12  ;;  %v6046_v14 = vld [vmem:[#allocation31_spill] sm:$0xff] }
 0x137   :  { %v5661_v53 = vsub.f32 %v6039_v59, %v5497_v12  ;;  %v440_v46 = vadd.f32 %v5574_v44, %v426_v19  ;;  %v380_v37 = vmul.f32 %v5540_v39, %v5540_v39  ;;  %v6041_v20 = vunpack.c.l.bf16 %v5271_v62  ;;  %v6049_v59 = vld [vmem:[#allocation37_spill] sm:$0xff] }
 0x138   :  { %v657_v1 = vadd.f32 %v5649_v42, %v647_v9  ;;  %v6042_v57 = vunpack.c.l.bf16 %v5128_v7  ;;  %v407_v51 = vadd.f32 %v405_v30, %v397_v18  ;;  %v372_v40 = vadd.f32 %v370_v48, %v358_v50  ;;  %v6043_v7 = vld [vmem:[#allocation36_spill] sm:$0xff]  ;;  %v6044_v30 = vld [vmem:[#allocation23_spill] sm:$0xff] }
 0x139   :  { %v5674_v49 = vsub.f32 %v6041_v20, %v5507_v23  ;;  %v622_v8 = vadd.f32 %v5666_v21, %v5661_v53  ;;  %446 = vadd.xlane.f32.xlu0 %v440_v46  ;;  %v394_v62 = vmul.f32 %v5544_v41, %v5544_v41  ;;  %v404_v39 = vmul.f32 %v5553_v11, %v5553_v11  ;;  %v4486_v48 = vld [vmem:[#allocation10 + $0x150] sm:$0xff]  }
 0x13a   :  { %v5679_v38 = vsub.f32 %v6042_v57, %v5497_v12  ;;  %v671_v31 = vadd.f32 %v5656_v10, %v657_v1  ;;  %v5690_v45 = vsub.f32 %v6043_v7, %v5507_v23  ;;  %v5694_v52 = vsub.f32 %v6044_v30, %v5497_v12  ;;  %v6055_v7 = vld [vmem:[#allocation39_spill] sm:$0xff] }
 0x13b   :  { %v421_v32 = vadd.f32 %v419_v13, %v407_v51  ;;  %v382_v17 = vadd.f32 %v380_v37, %v372_v40  ;;  %v6045_v41 = vcombine.low %v5342_v61, %v5346_v22  ;;  %v418_v11 = vmul.f32 %v5557_v2, %v5557_v2 }
 0x13c   :  { %v681_v54 = vadd.f32 %v5674_v49, %v671_v31  ;;  %v632_v58 = vadd.f32 %v5679_v38, %v622_v8  ;;  %v428_v29 = vmul.f32 %v5570_v0, %v5570_v0  ;;  %v6047_v9 = vunpack.c.l.bf16 %v6046_v14  ;;  %v4504_v0 = vld [vmem:[#allocation10 + $0x1c0] sm:$0xff]   ;;  %v4490_v8 = vld [vmem:[#allocation10 + $0x158] sm:$0xff]  }
 0x13d   :  { %3331 = vmatmul.mubr.bf16.vlgmr.msra.gmra.mrb[16].mxu0 %v6045_v41  ;;  %v6048_v13 = vunpack.c.l.bf16 %v5181_v55  ;;  %v431_v61 = vadd.f32 %v429_v4, %v421_v32  ;;  %v396_v22 = vadd.f32 %v394_v62, %v382_v17  ;;  %v5719_v18 = vsub.f32 %v6049_v59, %v5507_v23  ;;  %v6054_v62 = vld [vmem:[#allocation38_spill] sm:$0xff]  ;;  %4202 = vmatprep.subr.bf16.mxu1 %v4504_v0 }
 0x13e   :  { %v5708_v25 = vsub.f32 %v6047_v9, %v5507_v23  ;;  %4181 = vmatpush3.bf16.msra.mxu0 %v4479_v3  ;;  %v695_v6 = vadd.f32 %v5690_v45, %v681_v54  ;;  %v646_v2 = vadd.f32 %v5694_v52, %v632_v58  ;;  %v5723_v50 = vsub.f32 %v5328_v60, %v5497_v12  ;;  %v4487_v3 = vld [vmem:[#allocation10 + $0x110] sm:$0xff]   ;;  %v4506_v0 = vld [vmem:[#allocation10 + $0x180] sm:$0xff]  }
 0x13f   :  { %v5713_v19 = vsub.f32 %v6048_v13, %v5497_v12  ;;  %4182 = vmatprep.subr.bf16.mxu0 %v4482_v28  ;;  %v611_v55 = vmul.f32 %v5609_v56, %v5609_v56  ;;  %v625_v4 = vmul.f32 %v5613_v33, %v5613_v33  ;;  %v445_v1 = vadd.f32 %v443_v34, %v431_v61  ;;  %v6051_v56 = vld [vmem:[#allocation33_spill] sm:$0xff] }
 0x140   :  { %v406_v5 = vadd.f32 %v404_v39, %v396_v22  ;;  %v705_v28 = vadd.f32 %v5708_v25, %v695_v6  ;;  %v6050_v37 = vcombine.high %v5350_v43, %v5354_v35  ;;  %v442_v60 = vmul.f32 %v5574_v44, %v5574_v44  ;;  %v4494_v6 = vld [vmem:[#allocation10 + $0x160] sm:$0xff]  }
 0x141   :  { %v656_v46 = vadd.f32 %v5713_v19, %v646_v2  ;;  %v6052_v20 = vunpack.c.l.bf16 %v6051_v56  ;;  %v627_v33 = vadd.f32 %v625_v4, %v611_v55  ;;  %v635_v34 = vmul.f32 %v5626_v16, %v5626_v16  ;;  %452 = vadd.xlane.f32.xlu1 %v445_v1  ;;  %v6059_v55 = vld [vmem:[#allocation44_spill] sm:$0xff]  ;;  %v6061_v1 = vld [vmem:[#allocation45_spill] sm:$0xff] }
 0x142   :  { %3371 = vmatprep.mubr.bf16.mxu1 %v6050_v37  ;;  %4183 = vmatpush3.bf16.msra.mxu0 %v4483_v63  ;;  %v420_v24 = vadd.f32 %v418_v11, %v406_v5  ;;  %v719_v51 = vadd.f32 %v5719_v18, %v705_v28  ;;  %v6053_v31 = vunpack.c.l.bf16 %v5307_v26  ;;  %v5752_v39 = vsub.f32 %v6054_v62, %v5507_v23  ;;  %v6064_v62 = vld [vmem:[#allocation49_spill] sm:$0xff] }
 0x143   :  { %v5739_v57 = vsub.f32 %v6052_v20, %v5507_v23  ;;  %v670_v40 = vadd.f32 %v5723_v50, %v656_v46  ;;  %v6056_v16 = vunpack.c.l.bf16 %v6055_v7  ;;  %v637_v63 = vadd.f32 %v635_v34, %v627_v33  ;;  %4184 = vmatprep.subr.bf16.mxu0 %v4486_v48  ;;  %v4495_v46 = vld [vmem:[#allocation10 + $0x120] sm:$0xff]  }
 0x144   :  { %v5748_v44 = vsub.f32 %v6053_v31, %v5497_v12  ;;  %v649_v32 = vmul.f32 %v5637_v36, %v5637_v36  ;;  %v430_v17 = vadd.f32 %v428_v29, %v420_v24  ;;  %v5765_v58 = vsub.f32 %v5331_v47, %v5497_v12  ;;  %v4491_v29 = vld [vmem:[#allocation10 + $0x118] sm:$0xff]   ;;  %v5803_v33 = vld [vmem:[#allocation5 + $0x30] sm:$0xf]  ;;  %v4498_v24 = vld [vmem:[#allocation10 + $0x168] sm:$0xff]  }
 0x145   :  { %v5757_v30 = vsub.f32 %v6056_v16, %v5507_v23  ;;  %v729_v26 = vadd.f32 %v5739_v57, %v719_v51  ;;  %v659_v11 = vmul.f32 %v5649_v42, %v5649_v42  ;;  %v610_v14 = vmul.f32 %v5661_v53, %v5661_v53  ;;  %v4509_v31 = vld [vmem:[#allocation10 + $0x188] sm:$0xff]   ;;  %v4512_v16 = vld [vmem:[#allocation10 + $0x1d0] sm:$0xff]  }
 0x146   :  { %v680_v54 = vadd.f32 %v5748_v44, %v670_v40  ;;  %v651_v41 = vadd.f32 %v649_v32, %v637_v63  ;;  %v624_v36 = vmul.f32 %v5666_v21, %v5666_v21  ;;  %4185 = vmatpush3.bf16.msra.mxu0 %v4487_v3  ;;  %v444_v9 = vadd.f32 %v442_v60, %v430_v17  ;;  %v6060_v3 = vld [vmem:[#allocation46_spill] sm:$0xff]  ;;  %v6062_v60 = vld [vmem:[#allocation43_spill] sm:$0xff] }
 0x147   :  { %v743_v13 = vadd.f32 %v5752_v39, %v729_v26  ;;  %v6057_v47 = vunpack.c.l.bf16 %v5318_v15  ;;  %4186 = vmatprep.subr.bf16.mxu0 %v4490_v8  ;;  %v673_v53 = vmul.f32 %v5656_v10, %v5656_v10  ;;  %v634_v21 = vmul.f32 %v5679_v38, %v5679_v38  ;;  %v4508_v10 = vld [vmem:[#allocation10 + $0x1c8] sm:$0xff]  }
 0x148   :  { %v694_v48 = vadd.f32 %v5765_v58, %v680_v54  ;;  %v661_v42 = vadd.f32 %v659_v11, %v651_v41  ;;  %v626_v22 = vadd.f32 %v624_v36, %v610_v14  ;;  %v6058_v2 = vcombine.low %v5350_v43, %v5354_v35  ;;  %450 = vadd.xlane.f32.xlu0 %v444_v9  ;;  %v4502_v41 = vld [vmem:[#allocation10 + $0x170] sm:$0xff]  }
 0x149   :  { %v5778_v61 = vsub.f32 %v6057_v47, %v5497_v12  ;;  %v753_v15 = vadd.f32 %v5757_v30, %v743_v13  ;;  %v5791_v4 = vsub.f32 %v6059_v55, %v5497_v12  ;;  %v3847_v5 = vcombine.high %v6061_v1, %v6060_v3  ;;  %v4510_v55 = vld [vmem:[#allocation10 + $0x240] sm:$0xff]  }
 0x14a   :  { %3372 = vmatmul.mubr.bf16.vlgmr.msra.gmra.mrb[16].mxu1 %v6058_v2  ;;  %v675_v38 = vadd.f32 %v673_v53, %v661_v42  ;;  %v683_v28 = vmul.f32 %v5674_v49, %v5674_v49  ;;  %v636_v43 = vadd.f32 %v634_v21, %v626_v22  ;;  %v648_v35 = vmul.f32 %v5694_v52, %v5694_v52  ;;  %v4503_v53 = vld [vmem:[#allocation10 + $0x130] sm:$0xff]   ;;  %v4517_v2 = vld [vmem:[#allocation10 + $0x198] sm:$0xff]  }
 0x14b   :  { %v704_v59 = vadd.f32 %v5778_v61, %v694_v48  ;;  %4187 = vmatpush3.bf16.msra.mxu0 %v4491_v29  ;;  %760 = vadd.xlane.f32.xlu1 %v753_v15  ;;  %v6063_v56 = vunpack.c.l.bf16 %v6062_v60  ;;  %v748_v34 = vunpack.c.l.bf16 %v5803_v33  ;;  %v697_v49 = vmul.f32 %v5690_v45, %v5690_v45  ;;  %v4518_v60 = vld [vmem:[#allocation10 + $0x250] sm:$0xff]  }
 0x14c   :  { %v685_v51 = vadd.f32 %v683_v28, %v675_v38  ;;  %v650_v40 = vadd.f32 %v648_v35, %v636_v43  ;;  %v658_v52 = vmul.f32 %v5713_v19, %v5713_v19  ;;  %4188 = vmatprep.subr.bf16.mxu0 %v4494_v6  ;;  %4203 = vmatpush3.bf16.msra.mxu1 %v4506_v0  ;;  %v4499_v19 = vld [vmem:[#allocation10 + $0x128] sm:$0xff]  }
 0x14d   :  { %v718_v37 = vadd.f32 %v5791_v4, %v704_v59  ;;  %v726_v20 = vsub.f32 %v6063_v56, %v5497_v12  ;;  %v740_v7 = vsub.f32 %v6064_v62, %v5497_v12  ;;  %4204 = vmatprep.subr.bf16.mxu1 %v4508_v10  ;;  %3412 = vmatprep.mubr.bf16.mxu0 %v3847_v5  ;;  %v4507_v59 = vld [vmem:[#allocation10 + $0x138] sm:$0xff]   ;;  %v4514_v43 = vld [vmem:[#allocation10 + $0x248] sm:$0xff]   ;;  %v4519_v56 = vld [vmem:[#allocation10 + $0x210] sm:$0xff]  }
 0x14e   :  { %v699_v63 = vadd.f32 %v697_v49, %v685_v51  ;;  %v707_v45 = vmul.f32 %v5708_v25, %v5708_v25  ;;  %v660_v32 = vadd.f32 %v658_v52, %v650_v40  ;;  %v672_v17 = vmul.f32 %v5723_v50, %v5723_v50  ;;  %v4513_v25 = vld [vmem:[#allocation10 + $0x190] sm:$0xff]   ;;  %v4516_v50 = vld [vmem:[#allocation10 + $0x1d8] sm:$0xff]   ;;  %v4524_v49 = vld [vmem:[#allocation10 + $0x1e8] sm:$0xff]  }
 0x14f   :  { %v728_v8 = vadd.f32 %v726_v20, %v718_v37  ;;  %4189 = vmatpush3.bf16.msra.mxu0 %v4495_v46  ;;  %v750_v54 = vsub.f32 %v748_v34, %v5497_v12  ;;  %v721_v14 = vmul.f32 %v5719_v18, %v5719_v18  ;;  %v682_v29 = vmul.f32 %v5748_v44, %v5748_v44  ;;  %v4505_v18 = vld [vmem:[#allocation10 + $0x178] sm:$0xff]   ;;  %v4515_v37 = vld [vmem:[#allocation10 + $0x208] sm:$0xff]   ;;  %v4526_v51 = vld [vmem:[#allocation10 + $0x260] sm:$0xff]  }
 0x150   :  { %4190 = vmatprep.subr.bf16.mxu0 %v4498_v24  ;;  %v709_v11 = vadd.f32 %v707_v45, %v699_v63  ;;  %v674_v36 = vadd.f32 %v672_v17, %v660_v32  ;;  %4205 = vmatpush3.bf16.msra.mxu1 %v4509_v31  ;;  %v731_v48 = vmul.f32 %v5739_v57, %v5739_v57  ;;  %v4523_v34 = vld [vmem:[#allocation10 + $0x218] sm:$0xff]   ;;  %v4525_v24 = vld [vmem:[#allocation10 + $0x1a8] sm:$0xff]   ;;  %v4527_v40 = vld [vmem:[#allocation10 + $0x220] sm:$0xff]   ;;  %v6065_v32 = vmov 0  }
 0x151   :  { %v742_v26 = vadd.f32 %v740_v7, %v728_v8  ;;  %4206 = vmatprep.subr.bf16.mxu1 %v4512_v16  ;;  %v696_v42 = vmul.f32 %v5765_v58, %v5765_v58  ;;  %v745_v44 = vmul.f32 %v5752_v39, %v5752_v39  ;;  %v706_v6 = vmul.f32 %v5778_v61, %v5778_v61  ;;  %v4528_v52 = vld [vmem:[#allocation10 + $0x1f0] sm:$0xff]   ;;  %v4530_v8 = vld [vmem:[#allocation10 + $0x268] sm:$0xff]   ;;  %v4533_v16 = vld [vmem:[#allocation10 + $0x1b8] sm:$0xff]  }
 0x152   :  { %v723_v13 = vadd.f32 %v721_v14, %v709_v11  ;;  %v684_v47 = vadd.f32 %v682_v29, %v674_v36  ;;  %v755_v58 = vmul.f32 %v5757_v30, %v5757_v30  ;;  %v720_v15 = vmul.f32 %v5791_v4, %v5791_v4  ;;  %v4511_v30 = vld [vmem:[#allocation10 + $0x200] sm:$0xff]   ;;  %v4529_v31 = vld [vmem:[#allocation10 + $0x1b0] sm:$0xff]   ;;  %v4531_v62 = vld [vmem:[#allocation10 + $0x228] sm:$0xff]  }
 0x153   :  { %v752_v9 = vadd.f32 %v750_v54, %v742_v26  ;;  %4191 = vmatpush3.bf16.msra.mxu0 %v4499_v19  ;;  %v730_v5 = vmul.f32 %v726_v20, %v726_v20  ;;  %v3846_v61 = vcombine.low %v6061_v1, %v6060_v3  ;;  %v744_v28 = vmul.f32 %v740_v7, %v740_v7  ;;  %v4520_v3 = vld [vmem:[#allocation10 + $0x1e0] sm:$0xff]   ;;  %v4522_v20 = vld [vmem:[#allocation10 + $0x258] sm:$0xff]   ;;  %v4534_v63 = vld [vmem:[#allocation10 + $0x270] sm:$0xff]  }
 0x154   :  { %4192 = vmatprep.subr.bf16.mxu0 %v4502_v41  ;;  %v733_v22 = vadd.f32 %v731_v48, %v723_v13  ;;  %v698_v21 = vadd.f32 %v696_v42, %v684_v47  ;;  %4207 = vmatpush3.bf16.msra.mxu1 %v4513_v25  ;;  %v754_v4 = vmul.f32 %v750_v54, %v750_v54  ;;  %v4521_v1 = vld [vmem:[#allocation10 + $0x1a0] sm:$0xff]   ;;  %v4532_v7 = vld [vmem:[#allocation10 + $0x1f8] sm:$0xff]   ;;  %v4628_v45 = vld [vmem:[#allocation5 + $0x18] sm:$0xff] }
 0x155   :  { %758 = vadd.xlane.f32.xlu0 %v752_v9  ;;  %4208 = vmatprep.subr.bf16.mxu1 %v4516_v50  ;;  %v2389_v17 = vmax.bf16 %v6065_v32, %v4628_v45  ;;  %v4629_v19 = vld [vmem:[#allocation5 + $0x4c] sm:$0xff]  ;;  %v4630_v54 = vld [vmem:[#allocation5 + $0x20] sm:$0xff]  ;;  %v4631_v11 = vld [vmem:[#allocation5 + $0x54] sm:$0xff] }
 0x156   :  { %v747_v57 = vadd.f32 %v745_v44, %v733_v22  ;;  %v708_v0 = vadd.f32 %v706_v6, %v698_v21  ;;  %v2396_v26 = vmax.bf16 %v6065_v32, %v4629_v19  ;;  %v2390_v41 = vmax.bf16 %v6065_v32, %v4630_v54  ;;  %v4535_v36 = vld [vmem:[#allocation10 + $0x230] sm:$0xff]   ;;  %v4536_v29 = vld [vmem:[#allocation10 + $0x2c0] sm:$0xff]   ;;  %v4537_v25 = vld [vmem:[#allocation10 + $0x278] sm:$0xff]  }
 0x157   :  { %4193 = vmatpush3.bf16.msra.mxu0 %v4503_v53  ;;  %v2397_v14 = vmax.bf16 %v6065_v32, %v4631_v11  ;;  %v4632_v9 = vld [vmem:[#allocation5 + $0x28] sm:$0xff]  ;;  %v4633_v13 = vld [vmem:[#allocation5 + $0x5c] sm:$0xff]  ;;  %v2392_v54 = vmax.bf16 %v6065_v32, %v5803_v33 }
 0x158   :  { %4194 = vmatprep.subr.bf16.mxu0 %v4505_v18  ;;  %v757_v39 = vadd.f32 %v755_v58, %v747_v57  ;;  %v722_v10 = vadd.f32 %v720_v15, %v708_v0  ;;  %4209 = vmatpush3.bf16.msra.mxu1 %v4517_v2  ;;  %v5840_v50 = vmax.bf16 %v6065_v32, %v4632_v9  ;;  %v4538_v18 = vld [vmem:[#allocation10 + $0x280] sm:$0xff]   ;;  %v4539_v44 = vld [vmem:[#allocation10 + $0x238] sm:$0xff]   ;;  %v4540_v21 = vld [vmem:[#allocation10 + $0x2c8] sm:$0xff]   ;;  %v4787_v0 = vmov 0.0  }
 0x159   :  { %4210 = vmatprep.subr.bf16.mxu1 %v4520_v3  ;;  %v5843_v48 = vmax.bf16 %v6065_v32, %v4633_v13  ;;  %v3849_v47 = vcombine.high %v2389_v17, %v2396_v26  ;;  %v3848_v42 = vcombine.low %v2389_v17, %v2396_v26  ;;  %v3851_v53 = vcombine.high %v2390_v41, %v2397_v14  ;;  %v4541_v6 = vld [vmem:[#allocation10 + $0x288] sm:$0xff]   ;;  %v4542_v57 = vld [vmem:[#allocation10 + $0x300] sm:$0xff]   ;;  %v4543_v58 = vld [vmem:[#allocation10 + $0x2d0] sm:$0xff]  }
 0x15a   :  { %764 = vadd.xlane.f32.xlu1 %v757_v39  ;;  %v732_v38 = vadd.f32 %v730_v5, %v722_v10  ;;  %v3850_v2 = vcombine.low %v2390_v41, %v2397_v14  ;;  %v4544_v15 = vld [vmem:[#allocation10 + $0x290] sm:$0xff]   ;;  %v4547_v39 = vld [vmem:[#allocation10 + $0x298] sm:$0xff]   ;;  %v4549_v5 = vld [vmem:[#allocation10 + $0x2e0] sm:$0xff]  }
 0x15b   :  { %4195 = vmatpush3.bf16.msra.mxu0 %v4507_v59  ;;  %v3853_v22 = vcombine.high %v5840_v50, %v5843_v48  ;;  %3453 = vmatprep.mubr.bf16.mxu1 %v3849_v47  ;;  %v4545_v59 = vld [vmem:[#allocation10 + $0x308] sm:$0xff]   ;;  %v4548_v10 = vld [vmem:[#allocation10 + $0x310] sm:$0xff]   ;;  %v3852_v17 = vcombine.low %v5840_v50, %v5843_v48 }
 0x15c   :  { %4224 = vmatprep.subr.bf16.mxu0 %v4510_v55  ;;  %v746_v35 = vadd.f32 %v744_v28, %v732_v38  ;;  %4211 = vmatpush3.bf16.msra.mxu1 %v4521_v1  ;;  %v4546_v55 = vld [vmem:[#allocation10 + $0x2d8] sm:$0xff]   ;;  %v4552_v28 = vld [vmem:[#allocation10 + $0x2e8] sm:$0xff]   ;;  %v4634_v41 = vld [vmem:[#allocation5 + $0x64] sm:$0xf] }
 0x15d   :  { %4212 = vmatprep.subr.bf16.mxu1 %v4524_v49  ;;  %v4551_v38 = vld [vmem:[#allocation10 + $0x318] sm:$0xff]   ;;  %v4557_v3 = vld [vmem:[#allocation10 + $0x328] sm:$0xff]   ;;  %v2399_v11 = vmax.bf16 %v6065_v32, %v4634_v41  ;;  %v767_v41 = vmul.f32 31.0, %v5507_v23 }
 0x15e   :  { %3413 = vmatmul.mubr.bf16.vlgmr.msra.gmra.mrb[20].mxu0 %v3846_v61  ;;  %v756_v46 = vadd.f32 %v754_v4, %v746_v35  ;;  %v4550_v61 = vld [vmem:[#allocation10 + $0x2a0] sm:$0xff]   ;;  %v4555_v35 = vld [vmem:[#allocation10 + $0x2f0] sm:$0xff]   ;;  %v3976_v4 = vpop.f32.mrb[0].mxu0  ;;  %v4558_v1 = vld [vmem:[#allocation10 + $0x2f8] sm:$0xff]  }
 0x15f   :  { %4225 = vmatpush3.bf16.msra.mxu0 %v4511_v30  ;;  %3494 = vmatprep.mubr.bf16.mxu0 %v3851_v53  ;;  %v4553_v30 = vld [vmem:[#allocation10 + $0x2a8] sm:$0xff]   ;;  %v3854_v13 = vcombine.low %v2392_v54, %v2399_v11 }
 0x160   :  { %4226 = vmatprep.subr.bf16.mxu0 %v4514_v43  ;;  %762 = vadd.xlane.f32.xlu0 %v756_v46  ;;  %v4554_v43 = vld [vmem:[#allocation10 + $0x320] sm:$0xff]   ;;  %v3998_v46 = vpop.f32.mrb[0].mxu1 }
 0x161   :  { %4213 = vmatpush3.bf16.msra.mxu1 %v4525_v24 }
 0x162   :  { %4214 = vmatprep.subr.bf16.mxu1 %v4528_v52 }
 0x163   :  { %4227 = vmatpush3.bf16.msra.mxu0 %v4515_v37  ;;  %v4556_v37 = vld [vmem:[#allocation10 + $0x2b0] sm:$0xff]  }
 0x164   :  { %4228 = vmatprep.subr.bf16.mxu0 %v4518_v60  ;;  %v3977_v60 = vpop.f32.mrb[1].mxu0 }
 0x165   :  { %4215 = vmatpush3.bf16.msra.mxu1 %v4529_v31 }
 0x166   :  { %4216 = vmatprep.subr.bf16.mxu1 %v4532_v7  ;;  %v4560_v7 = vld [vmem:[#allocation10 + $0x330] sm:$0xff]  }
 0x167   :  { %4229 = vmatpush3.bf16.msra.mxu0 %v4519_v56  ;;  %v3999_v56 = vpop.f32.mrb[1].mxu1 }
 0x168   :  { %4230 = vmatprep.subr.bf16.mxu0 %v4522_v20  ;;  %v3978_v20 = vadd.f32 %v3977_v60, %v3976_v4  ;;  %v4000_v49 = vadd.f32 %v3999_v56, %v3998_v46  ;;  %v4001_v24 = vpop.f32.mrb[2].mxu1 }
 0x169   :  { %4217 = vmatpush3.bf16.msra.mxu1 %v4533_v16 }
 0x16a   :  { %4246 = vmatprep.subr.bf16.mxu1 %v4536_v29  ;;  %v2134_v31 = vadd.f32 %v4000_v49, %v3978_v20 }
 0x16b   :  { %4231 = vmatpush3.bf16.msra.mxu0 %v4523_v34  ;;  %v3979_v34 = vpop.f32.mrb[2].mxu0 }
 0x16c   :  { %4232 = vmatprep.subr.bf16.mxu0 %v4526_v51  ;;  %3454 = vmatmul.mubr.bf16.vlgmr.msra.gmra.mrb[20].mxu1 %v3848_v42  ;;  %v3980_v51 = vpop.f32.mrb[3].mxu0 }
 0x16d   :  { %4247 = vmatpush3.bf16.msra.mxu1 %v4538_v18  ;;  %3535 = vmatprep.mubr.bf16.mxu1 %v3853_v22  ;;  %v3981_v52 = vadd.f32 %v3980_v51, %v3979_v34  ;;  %v6066_v22 = vld [vmem:[#allocation18_spill] sm:$0xff] }
 0x16e   :  { %4248 = vmatprep.subr.bf16.mxu1 %v4540_v21  ;;  %v840_v11 = vsub.s32 3, %v6066_v22 }
 0x16f   :  { %4233 = vmatpush3.bf16.msra.mxu0 %v4527_v40  ;;  %v4002_v40 = vpop.f32.mrb[3].mxu1 }
 0x170   :  { %4234 = vmatprep.subr.bf16.mxu0 %v4530_v8  ;;  %v4003_v8 = vadd.f32 %v4002_v40, %v4001_v24 }
 0x171   :  { %4249 = vmatpush3.bf16.msra.mxu1 %v4541_v6  ;;  %v5862_v6 = vld [vmem:[#allocation7] sm:$0xff] }
 0x172   :  { %4250 = vmatprep.subr.bf16.mxu1 %v4543_v58  ;;  %v6067_v58 = vld [vmem:[#allocation40_spill] sm:$0xff] }
 0x173   :  { %4235 = vmatpush3.bf16.msra.mxu0 %v4531_v62  ;;  %v4559_v62 = vld [vmem:[#allocation10 + $0x2b8] sm:$0xff]  }
 0x174   :  { %4236 = vmatprep.subr.bf16.mxu0 %v4534_v63  ;;  %v2137_v63 = vadd.f32 %v4003_v8, %v3981_v52 }
 0x175   :  { %4251 = vmatpush3.bf16.msra.mxu1 %v4544_v15 }
 0x176   :  { %4252 = vmatprep.subr.bf16.mxu1 %v4546_v55 }
 0x177   :  { %4237 = vmatpush3.bf16.msra.mxu0 %v4535_v36  ;;  %v4561_v36 = vld [vmem:[#allocation10 + $0x338] sm:$0xff]  }
 0x178   :  { %4238 = vmatprep.subr.bf16.mxu0 %v4537_v25 }
 0x179   :  { %4253 = vmatpush3.bf16.msra.mxu1 %v4547_v39  ;;  %v4020_v16 = vpop.f32.mrb[4].mxu0 }
 0x17a   :  { %4254 = vmatprep.subr.bf16.mxu1 %v4549_v5  ;;  %v4021_v45 = vpop.f32.mrb[5].mxu0  ;;  %v4042_v50 = vpop.f32.mrb[4].mxu1 }
 0x17b   :  { %4239 = vmatpush3.bf16.msra.mxu0 %v4539_v44  ;;  %v4022_v19 = vadd.f32 %v4021_v45, %v4020_v16  ;;  %v4023_v26 = vpop.f32.mrb[6].mxu0  ;;  %v4043_v48 = vpop.f32.mrb[5].mxu1  ;;  %v832_v44 = vsub.s32 2, %v6066_v22 }
 0x17c   :  { %4277 = vmatprep.subr.bf16.mxu0 %v4787_v0  ;;  %v4024_v14 = vpop.f32.mrb[7].mxu0  ;;  %v4044_v47 = vadd.f32 %v4043_v48, %v4042_v50  ;;  %v4045_v42 = vpop.f32.mrb[6].mxu1  ;;  %v771_v48 = vmul.f32 %v5507_v23, %v5507_v23 }
 0x17d   :  { %4255 = vmatpush3.bf16.msra.mxu1 %v4550_v61  ;;  %v2175_v29 = vadd.f32 %v4022_v19, %v2134_v31  ;;  %v4025_v25 = vadd.f32 %v4024_v14, %v4023_v26  ;;  %v4046_v53 = vpop.f32.mrb[7].mxu1 }
 0x17e   :  { %3495 = vmatmul.mubr.bf16.vlgmr.msra.gmra.mrb[24].mxu0 %v3850_v2  ;;  %4256 = vmatprep.subr.bf16.mxu1 %v4552_v28  ;;  %v4047_v18 = vadd.f32 %v4046_v53, %v4045_v42  ;;  %v833_v2 = vrot.slane %v5862_v6, %v832_v44  ;;  %v864_v42 = vsub.s32 6, %v6066_v22  ;;  %v770_v44 = vmul.f32 %v5497_v12, %v5497_v12 }
 0x17f   :  { %4278 = vmatpush3.bf16.msra.mxu0 %v4542_v57  ;;  %4293 = vmatprep.mubr.msk.bf16.mxu0 %vm4788_vm2, %v4787_v0  ;;  %v2178_v9 = vadd.f32 %v4025_v25, %v2137_v63  ;;  %v2216_v33 = vadd.f32 %v4044_v47, %v2175_v29  ;;  %v766_v29 = vmul.f32 31.0, %v5497_v12 }
 0x180   :  { %4279 = vmatprep.subr.bf16.mxu0 %v4787_v0 }
 0x181   :  { %4257 = vmatpush3.bf16.msra.mxu1 %v4553_v30  ;;  %v2219_v32 = vadd.f32 %v4047_v18, %v2178_v9 }
 0x182   :  { %4258 = vmatprep.subr.bf16.mxu1 %v4555_v35 }
 0x183   :  { %4280 = vmatpush3.bf16.msra.mxu0 %v4545_v59 }
 0x184   :  { %4281 = vmatprep.subr.bf16.mxu0 %v4787_v0 }
 0x185   :  { %4259 = vmatpush3.bf16.msra.mxu1 %v4556_v37  ;;  %v6069_v37 = vld [vmem:[#allocation41_spill] sm:$0xff] }
 0x186   :  { %4260 = vmatprep.subr.bf16.mxu1 %v4558_v1 }
 0x187   :  { %4282 = vmatpush3.bf16.msra.mxu0 %v4548_v10  ;;  %v6068_v10 = vld [vmem:[#allocation42_spill] sm:$0xff] }
 0x188   :  { %4283 = vmatprep.subr.bf16.mxu0 %v4787_v0 }
 0x189   :  { %4261 = vmatpush3.bf16.msra.mxu1 %v4559_v62 }
 0x18b   :  { %4284 = vmatpush3.bf16.msra.mxu0 %v4551_v38 }
 0x18c   :  { %4285 = vmatprep.subr.bf16.mxu0 %v4787_v0  ;;  %3536 = vmatmul.mubr.bf16.vlgmr.msra.gmra.mrb[24].mxu1 %v3852_v17 }
 0x18f   :  { %4286 = vmatpush3.bf16.msra.mxu0 %v4554_v43 }
 0x190   :  { %4287 = vmatprep.subr.bf16.mxu0 %v4787_v0 }
 0x193   :  { %4288 = vmatpush3.bf16.msra.mxu0 %v4557_v3 }
 0x194   :  { %4289 = vmatprep.subr.bf16.mxu0 %v4787_v0 }
 0x197   :  { %4290 = vmatpush3.bf16.msra.mxu0 %v4560_v7 }
 0x198   :  { %4291 = vmatprep.subr.bf16.mxu0 %v4787_v0 }
 0x199   :  { %v4064_v28 = vpop.f32.mrb[8].mxu0 }
 0x19a   :  { %v4065_v43 = vpop.f32.mrb[9].mxu0 }
 0x19b   :  { %4292 = vmatpush3.bf16.msra.mxu0 %v4561_v36  ;;  %v4066_v35 = vadd.f32 %v4065_v43, %v4064_v28  ;;  %v4067_v4 = vpop.f32.mrb[10].mxu0  ;;  %v4086_v3 = vpop.f32.mrb[8].mxu1 }
 0x19c   :  { %v4068_v34 = vpop.f32.mrb[11].mxu0  ;;  %v4087_v49 = vpop.f32.mrb[9].mxu1 }
 0x19d   :  { %v2257_v20 = vadd.f32 %v4066_v35, %v2216_v33  ;;  %v4069_v24 = vadd.f32 %v4068_v34, %v4067_v4  ;;  %v4088_v51 = vadd.f32 %v4087_v49, %v4086_v3  ;;  %v4089_v40 = vpop.f32.mrb[10].mxu1 }
 0x19e   :  { %4294 = vmatmul.mubr.bf16.vlgmr.msra.gmra.mrb[28].mxu0 %v3854_v13  ;;  %v4090_v52 = vpop.f32.mrb[11].mxu1  ;;  %v841_v13 = vrot.slane %v5862_v6, %v840_v11 }
 0x19f   :  { %v2260_v8 = vadd.f32 %v4069_v24, %v2219_v32  ;;  %v5871_v62 = vadd.f32 %v4088_v51, %v2257_v20  ;;  %v4091_v7 = vadd.f32 %v4090_v52, %v4089_v40 }
 0x1a1   :  { %v5873_v45 = vadd.f32 %v4091_v7, %v2260_v8 }
 0x1c1   :  { %v449_v21 = vpop.xlane.xlu1 %448 }
 0x1c2   :  { %v456_v57 = vmul.f32 0.00048828125, %v449_v21  ;;  %v460_v15 = vmul.f32 %v449_v21, %v449_v21 }
 0x1c4   :  { %v458_v0 = vadd.f32 %v456_v57, %v6067_v58  ;;  %v462_v38 = vmul.f32 0.00048828125, %v460_v15  ;;  %v773_v57 = vmul.f32 31.0, %v771_v48  ;;  %v865_v58 = vrot.slane %v5862_v6, %v864_v42 }
 0x1c5   :  { %v872_v42 = vsub.s32 7, %v6066_v22 }
 0x1c6   :  { %v447_v59 = vpop.xlane.xlu0 %446  ;;  %v835_v55 = vmul.f32 %v833_v2, %v458_v0 }
 0x1c7   :  { %v455_v39 = vmul.f32 0.00048828125, %v447_v59  ;;  %v459_v46 = vmul.f32 %v447_v59, %v447_v59 }
 0x1c8   :  { %v837_v5 = vadd.f32 %v835_v55, %v6068_v10 }
 0x1c9   :  { %v457_v61 = vadd.f32 %v455_v39, %v5370_v27  ;;  %v461_v31 = vmul.f32 0.00048828125, %v459_v46 }
 0x1cb   :  { %v834_v30 = vmul.f32 %v833_v2, %v457_v61 }
 0x1cd   :  { %v5869_v60 = vadd.f32 %v834_v30, %v6069_v37  ;;  %v6070_v30 = vld [vmem:[#allocation30_spill] sm:$0xff] }
 0x1ce   :  { %v453_v56 = vpop.xlane.xlu1 %452 }
 0x1cf   :  { %v464_v1 = vsub.f32 %v453_v56, %v462_v38  ;;  %v772_v38 = vmul.f32 31.0, %v770_v44  ;;  %v6071_v56 = vld [vmem:[#allocation48_spill] sm:$0xff] }
 0x1d1   :  { %v466_v27 = vmax.f32 %v464_v1, 0.0 }
 0x1d3   :  { %v469_v16 = vmul.f32 0.0004885198, %v466_v27 }
 0x1d5   :  { %v451_v63 = vpop.xlane.xlu0 %450  ;;  %4562 = vrsqrt.f32 %v469_v16  ;;  %vm479_vm3 = vcmp.eq.f32.partialorder %v469_v16, inf  ;;  %v482_v47 = vand.u32 2147483648, %v469_v16  ;;  %vm481_vm4 = vcmp.eq.f32.partialorder %v469_v16, 0.0 }
 0x1d6   :  { %v463_v17 = vsub.f32 %v451_v63, %v461_v31  ;;  %v6072_v63 = vld [vmem:[#allocation29_spill] sm:$0xff] }
 0x1d8   :  { %v465_v19 = vmax.f32 %v463_v17, 0.0  ;;  %v761_v26 = vpop.xlane.xlu1 %760 }
 0x1d9   :  { %v769_v14 = vadd.f32 %v767_v41, %v761_v26 }
 0x1da   :  { %v468_v54 = vmul.f32 0.0004885198, %v465_v19 }
 0x1db   :  { %v782_v50 = vmul.f32 %v769_v14, %v769_v14  ;;  %v778_v53 = vmul.f32 0.00061236985, %v769_v14 }
 0x1dc   :  { %4564 = vrsqrt.f32 %v468_v54  ;;  %vm472_vm5 = vcmp.eq.f32.partialorder %v468_v54, inf  ;;  %v475_v28 = vand.u32 2147483648, %v468_v54  ;;  %vm474_vm6 = vcmp.eq.f32.partialorder %v468_v54, 0.0 }
 0x1dd   :  { %v784_v2 = vmul.f32 0.00061236985, %v782_v50  ;;  %v780_v0 = vadd.f32 %v778_v53, %v5507_v23 }
 0x1df   :  { %v4563_v36 = vpop.eup %4562  ;;  %v867_v46 = vmul.f32 %v865_v58, %v780_v0 }
 0x1e0   :  { %v478_v9 = vmul.f32 %v4563_v36, %v469_v16 }
 0x1e2   :  { %v759_v25 = vpop.xlane.xlu0 %758  ;;  %v480_v33 = vsel %vm479_vm3, %v469_v16, %v478_v9 }
 0x1e3   :  { %v768_v18 = vadd.f32 %v766_v29, %v759_v25  ;;  %v483_v32 = vsel %vm481_vm4, %v482_v47, %v480_v33  ;;  %v6073_v29 = vld [vmem:[#allocation47_spill] sm:$0xff] }
 0x1e4   :  { %v843_v21 = vmul.f32 %v841_v13, %v483_v32 }
 0x1e5   :  { %v781_v39 = vmul.f32 %v768_v18, %v768_v18  ;;  %v777_v37 = vmul.f32 0.00061236985, %v768_v18  ;;  %v873_v18 = vrot.slane %v5862_v6, %v872_v42 }
 0x1e6   :  { %v4565_v59 = vpop.eup %4564  ;;  %v845_v55 = vadd.f32 %v843_v21, %v837_v5  ;;  %v4108_v40 = vpop.f32.mrb[12].mxu0 }
 0x1e7   :  { %v765_v15 = vpop.xlane.xlu1 %764  ;;  %v471_v61 = vmul.f32 %v4565_v59, %v468_v54  ;;  %v783_v23 = vmul.f32 0.00061236985, %v781_v39  ;;  %v779_v52 = vadd.f32 %v777_v37, %v5497_v12  ;;  %v4109_v31 = vpop.f32.mrb[13].mxu0  ;;  %v3695_v39 = vld [vmem:[%s5939_s4] ss:$0 sm:$0xff] }
 0x1e8   :  { %v775_v10 = vsub.f32 %v765_v15, %v773_v57  ;;  %v853_v43 = vadd.f32 %v6070_v30, %v845_v55  ;;  %v4111_v7 = vpop.f32.mrb[14].mxu0  ;;  %v4130_v16 = vpop.f32.mrb[12].mxu1  ;;  %v4110_v19 = vadd.f32 %v4109_v31, %v4108_v40 }
 0x1e9   :  { %v473_v4 = vsel %vm472_vm5, %v468_v54, %v471_v61  ;;  %v4112_v26 = vpop.f32.mrb[15].mxu0  ;;  %v4131_v54 = vpop.f32.mrb[13].mxu1  ;;  %v866_v9 = vmul.f32 %v865_v58, %v779_v52  ;;  %v3697_v61 = vld [vmem:[%s5939_s4 + $0x1] ss:$0 sm:$0xff] }
 0x1ea   :  { %v786_v35 = vsub.f32 %v775_v10, %v784_v2  ;;  %v861_v3 = vadd.f32 %v6071_v56, %v853_v43  ;;  %v476_v1 = vsel %vm474_vm6, %v475_v28, %v473_v4  ;;  %v4113_v11 = vadd.f32 %v4112_v26, %v4111_v7  ;;  %v4133_v36 = vpop.f32.mrb[14].mxu1 }
 0x1eb   :  { %v842_v34 = vmul.f32 %v841_v13, %v476_v1  ;;  %v4132_v14 = vadd.f32 %v4131_v54, %v4130_v16  ;;  %v4134_v12 = vpop.f32.mrb[15].mxu1 }
 0x1ec   :  { %v788_v20 = vmax.f32 %v786_v35, 0.0  ;;  %v869_v49 = vadd.f32 %v867_v46, %v861_v3  ;;  %v2342_v50 = vadd.f32 %v4113_v11, %v5873_v45  ;;  %v4135_v48 = vadd.f32 %v4134_v12, %v4133_v36 }
 0x1ed   :  { %v763_v5 = vpop.xlane.xlu0 %762  ;;  %v844_v27 = vadd.f32 %v842_v34, %v5869_v60  ;;  %v2339_v60 = vadd.f32 %v4110_v19, %v5871_v62 }
 0x1ee   :  { %v791_v24 = vmul.f32 0.0006127451, %v788_v20  ;;  %v774_v51 = vsub.f32 %v763_v5, %v772_v38  ;;  %v5896_v22 = vadd.f32 %v4135_v48, %v2342_v50 }
 0x1ef   :  { %v852_v17 = vadd.f32 %v6072_v63, %v844_v27  ;;  %v5898_v59 = vadd.f32 %v4132_v14, %v2339_v60 }
 0x1f0   :  { %4566 = vrsqrt.f32 %v791_v24  ;;  %v785_v8 = vsub.f32 %v774_v51, %v783_v23  ;;  %vm801_vm7 = vcmp.eq.f32.partialorder %v791_v24, inf  ;;  %v804_v32 = vand.u32 2147483648, %v791_v24 }
 0x1f1   :  { %v860_v25 = vadd.f32 %v6073_v29, %v852_v17  ;;  %vm803_vm8 = vcmp.eq.f32.partialorder %v791_v24, 0.0 }
 0x1f2   :  { %v787_v41 = vmax.f32 %v785_v8, 0.0 }
 0x1f3   :  { %v868_v47 = vadd.f32 %v866_v9, %v860_v25 }
 0x1f4   :  { %v790_v13 = vmul.f32 0.0006127451, %v787_v41 }
 0x1f6   :  { %4568 = vrsqrt.f32 %v790_v13  ;;  %vm794_vm9 = vcmp.eq.f32.partialorder %v790_v13, inf  ;;  %v797_v45 = vand.u32 2147483648, %v790_v13  ;;  %vm796_vm10 = vcmp.eq.f32.partialorder %v790_v13, 0.0 }
 0x1fa   :  { %v4567_v53 = vpop.eup %4566 }
 0x1fb   :  { %v800_v33 = vmul.f32 %v4567_v53, %v791_v24 }
 0x1fd   :  { %v802_v44 = vsel %vm801_vm7, %v791_v24, %v800_v33 }
 0x1fe   :  { %v805_v21 = vsel %vm803_vm8, %v804_v32, %v802_v44 }
 0x1ff   :  { %v875_v2 = vmul.f32 %v873_v18, %v805_v21 }
 0x200   :  { %v4569_v62 = vpop.eup %4568 }
 0x201   :  { %v793_v57 = vmul.f32 %v4569_v62, %v790_v13  ;;  %v877_v58 = vadd.f32 %v875_v2, %v869_v49 }
 0x203   :  { %4570 = vtanh.f32 %v877_v58  ;;  %v795_v0 = vsel %vm794_vm9, %v790_v13, %v793_v57 }
 0x204   :  { %v798_v15 = vsel %vm796_vm10, %v797_v45, %v795_v0 }
 0x205   :  { %v874_v6 = vmul.f32 %v873_v18, %v798_v15 }
 0x207   :  { %v876_v55 = vadd.f32 %v874_v6, %v868_v47 }
 0x209   :  { %4572 = vtanh.f32 %v876_v55 }
 0x20d   :  { %v4571_v10 = vpop.eup %4570 }
 0x20e   :  { %v886_v38 = vmul.f32 %v4571_v10, %v3695_v39  ;;  %v909_v30 = vmul.f32 %v4571_v10, %v3697_v61 }
 0x210   :  { %v891_v28 = vsel %vm887_vm11, %v886_v38, 0.0  ;;  %v913_v4 = vsel %vm887_vm11, %v909_v30, 0.0  ;;  %v4152_v3 = vpop.f32.mrb[16].mxu0 }
 0x211   :  { %892 = vadd.xlane.f32.xlu1 %v891_v28  ;;  %v4153_v23 = vpop.f32.mrb[17].mxu0 }
 0x212   :  { %v4154_v34 = vadd.f32 %v4153_v23, %v4152_v3  ;;  %v4155_v5 = vpop.f32.mrb[18].mxu0 }
 0x213   :  { %v4573_v43 = vpop.eup %4572  ;;  %v4156_v51 = vpop.f32.mrb[19].mxu0 }
 0x214   :  { %v885_v35 = vmul.f32 %v4573_v43, %v3695_v39  ;;  %v908_v37 = vmul.f32 %v4573_v43, %v3697_v61  ;;  %v4157_v27 = vadd.f32 %v4156_v51, %v4155_v5  ;;  %v3696_v61 = vld [vmem:[%s5940_s5] ss:$0 sm:$0xff] }
 0x215   :  { %914 = vadd.xlane.f32.xlu1 %v913_v4 }
 0x216   :  { %v888_v46 = vsel %vm887_vm11, %v885_v35, 0.0  ;;  %v910_v56 = vsel %vm887_vm11, %v908_v37, 0.0 }
 0x217   :  { %889 = vadd.xlane.f32.xlu0 %v888_v46 }
 0x21b   :  { %911 = vadd.xlane.f32.xlu0 %v910_v56 }
 0x21d   :  { %v4174_v1 = vpop.f32.mrb[16].mxu1 }
 0x21e   :  { %v4175_v20 = vpop.f32.mrb[17].mxu1 }
 0x21f   :  { %v4176_v49 = vadd.f32 %v4175_v20, %v4174_v1  ;;  %v4177_v24 = vpop.f32.mrb[18].mxu1 }
 0x220   :  { %v4178_v40 = vpop.f32.mrb[19].mxu1 }
 0x221   :  { %v3374_v52 = vadd.f32 %v4176_v49, %v4154_v34  ;;  %v4179_v8 = vadd.f32 %v4178_v40, %v4177_v24 }
 0x223   :  { %v3377_v16 = vadd.f32 %v4179_v8, %v4157_v27 }
 0x231   :  { %v4196_v31 = vpop.f32.mrb[20].mxu0 }
 0x232   :  { %v4197_v7 = vpop.f32.mrb[21].mxu0 }
 0x233   :  { %v4198_v63 = vadd.f32 %v4197_v7, %v4196_v31  ;;  %v4199_v17 = vpop.f32.mrb[22].mxu0 }
 0x234   :  { %v4200_v19 = vpop.f32.mrb[23].mxu0 }
 0x235   :  { %v3415_v26 = vadd.f32 %v4198_v63, %v3374_v52  ;;  %v4201_v54 = vadd.f32 %v4200_v19, %v4199_v17  ;;  %v4789_v63 = vmov 1  }
 0x237   :  { %v3418_v41 = vadd.f32 %v4201_v54, %v3377_v16 }
 0x23f   :  { %v4218_v11 = vpop.f32.mrb[20].mxu1 }
 0x240   :  { %v4219_v14 = vpop.f32.mrb[21].mxu1 }
 0x241   :  { %v4220_v36 = vadd.f32 %v4219_v14, %v4218_v11  ;;  %v4221_v29 = vpop.f32.mrb[22].mxu1 }
 0x242   :  { %v4222_v25 = vpop.f32.mrb[23].mxu1 }
 0x243   :  { %v3456_v9 = vadd.f32 %v4220_v36, %v3415_v26  ;;  %v4223_v60 = vadd.f32 %v4222_v25, %v4221_v29  ;;  %v3959_v29 = vld [vmem:[%s5943_s8] ss:$0 sm:$0xff]  ;;  %s4790_s8 = smov [#allocation11]  }
 0x244   :  { %s3650_s13 = sshll.u32 %s4790_s8, 4  ;;  %s3651_s13 = int_to_ptr.vmem [resolvable:$true] %s3650_s13 }
 0x245   :  { %v3459_v13 = vadd.f32 %v4223_v60, %v3418_v41  ;;  %v6074_v60 = vld [vmem:[#allocation16_spill] sm:$0xff]  ;;  %s4746_s1 = scalar_lea.vmem %s3651_s13, 256  ;;  %p4751_p13 = scmp.lt.s32.totalorder %s3651_s13, %s3651_s13 }
 0x246   :  { %vm3620_vm12 = vcmp.lt.s32.totalorder %v6074_v60, 10  ;;  %p4747_p12 = scmp.ne.s32.totalorder %s3651_s13, %s4746_s1  ;;  %p4752_p0 = scmp.lt.s32.totalorder %s4746_s1, %s4746_s1 }
 0x248   :  { %p4753_p1 = por %p4752_p0, %p4751_p13 }
 0x24a   :  { %p4754_p2 = pnand %p4753_p1, %p4747_p12 }
 0x251   :  { %v4240_v12 = vpop.f32.mrb[24].mxu0 }
 0x252   :  { %v4241_v50 = vpop.f32.mrb[25].mxu0 }
 0x253   :  { %v4242_v48 = vadd.f32 %v4241_v50, %v4240_v12  ;;  %v4243_v47 = vpop.f32.mrb[26].mxu0 }
 0x254   :  { %v4244_v42 = vpop.f32.mrb[27].mxu0 }
 0x255   :  { %v3497_v53 = vadd.f32 %v4242_v48, %v3456_v9  ;;  %v4245_v33 = vadd.f32 %v4244_v42, %v4243_v47 }
 0x257   :  { %v3500_v18 = vadd.f32 %v4245_v33, %v3459_v13 }
 0x25f   :  { %v4262_v32 = vpop.f32.mrb[24].mxu1 }
 0x260   :  { %v4263_v44 = vpop.f32.mrb[25].mxu1 }
 0x261   :  { %v4264_v21 = vadd.f32 %v4263_v44, %v4262_v32  ;;  %v4265_v2 = vpop.f32.mrb[26].mxu1 }
 0x262   :  { %v4266_v62 = vpop.f32.mrb[27].mxu1 }
 0x263   :  { %v4267_v57 = vadd.f32 %v4266_v62, %v4265_v2  ;;  %v3538_v58 = vadd.f32 %v4264_v21, %v3497_v53 }
 0x265   :  { %v3541_v6 = vadd.f32 %v4267_v57, %v3500_v18 }
 0x271   :  { %v3578_v45 = vpop.f32.mrb[28].mxu0 }
 0x272   :  { %v3579_v0 = vadd.f32 %v3578_v45, %v3538_v58  ;;  %v4295_v15 = vpop.f32.mrb[29].mxu0 }
 0x273   :  { %v3581_v55 = vpop.f32.mrb[30].mxu0 }
 0x274   :  { %v3582_v39 = vadd.f32 %v3581_v55, %v3541_v6  ;;  %v4296_v10 = vpop.f32.mrb[31].mxu0 }
 0x29e   :  { %v893_v38 = vpop.xlane.xlu1 %892 }
 0x29f   :  { %v902_v28 = vadd.f32 %v3696_v61, %v893_v38 }
 0x2a1   :  { %v919_v30 = vsub.f32 0.0, %v902_v28 }
 0x2a2   :  { %v915_v43 = vpop.xlane.xlu1 %914 }
 0x2a3   :  { %v922_v35 = vmul.f32 1.442695, %v919_v30  ;;  %v917_v4 = vadd.f32 %v3696_v61, %v915_v43 }
 0x2a4   :  { %v890_v46 = vpop.xlane.xlu0 %889 }
 0x2a5   :  { %4574 = vpow2.f32 %v922_v35  ;;  %v901_v37 = vadd.f32 %v3696_v61, %v890_v46  ;;  %v929_v56 = vsub.f32 0.0, %v917_v4 }
 0x2a7   :  { %v918_v3 = vsub.f32 0.0, %v901_v37  ;;  %v932_v34 = vmul.f32 1.442695, %v929_v56 }
 0x2a8   :  { %v912_v1 = vpop.xlane.xlu0 %911 }
 0x2a9   :  { %v920_v23 = vmul.f32 1.442695, %v918_v3  ;;  %v916_v20 = vadd.f32 %v3696_v61, %v912_v1 }
 0x2ab   :  { %4576 = vpow2.f32 %v920_v23  ;;  %v928_v5 = vsub.f32 0.0, %v916_v20 }
 0x2ac   :  { %4578 = vpow2.f32 %v932_v34 }
 0x2ad   :  { %v930_v49 = vmul.f32 1.442695, %v928_v5 }
 0x2af   :  { %v4575_v24 = vpop.eup %4574  ;;  %4580 = vpow2.f32 %v930_v49 }
 0x2b0   :  { %v925_v51 = vadd.f32 1.0, %v4575_v24 }
 0x2b2   :  { %4582 = vrcp.f32 %v925_v51 }
 0x2b5   :  { %v4577_v40 = vpop.eup %4576 }
 0x2b6   :  { %v924_v27 = vadd.f32 1.0, %v4577_v40  ;;  %v4579_v52 = vpop.eup %4578 }
 0x2b7   :  { %v935_v16 = vadd.f32 1.0, %v4579_v52 }
 0x2b8   :  { %4584 = vrcp.f32 %v924_v27 }
 0x2b9   :  { %v4581_v31 = vpop.eup %4580 }
 0x2ba   :  { %v934_v8 = vadd.f32 1.0, %v4581_v31 }
 0x2bc   :  { %v4583_v7 = vpop.eup %4582  ;;  %4586 = vrcp.f32 %v934_v8 }
 0x2bd   :  { %3592 = vperm.xlu1 %4315, %v4583_v7   ;;  %4588 = vrcp.f32 %v935_v16 }
 0x2c1   :  { %4316 = vset.pattern.permute.xlu1 %v4789_v63 }
 0x2c2   :  { %v4585_v17 = vpop.eup %4584 }
 0x2c3   :  { %3587 = vperm.xlu0 %4314, %v4585_v17  }
 0x2c6   :  { %v4587_v19 = vpop.eup %4586 }
 0x2c7   :  { %3599 = vperm.xlu1 %4316, %v4587_v19   ;;  %4317 = vset.pattern.permute.xlu0 %v4789_v63  ;;  %v4589_v26 = vpop.eup %4588 }
 0x2cb   :  { %3604 = vperm.xlu1 %4316, %v4589_v26  }
 0x33c   :  { %v3593_v54 = vpop.permute.xlu1 %3592 }
 0x33d   :  { %v3596_v12 = vmul.f32 %v3593_v54, %v5896_v22 }
 0x342   :  { %v3588_v41 = vpop.permute.xlu0 %3587 }
 0x343   :  { %v3595_v14 = vmul.f32 %v3588_v41, %v5898_v59 }
 0x346   :  { %v3600_v11 = vpop.permute.xlu1 %3599 }
 0x347   :  { %v3607_v36 = vmul.f32 %v3600_v11, %v3579_v0 }
 0x349   :  { %v3609_v25 = vadd.f32 %v3607_v36, %v3595_v14 }
 0x34a   :  { %v3605_v9 = vpop.permute.xlu1 %3604 }
 0x34b   :  { %v3608_v13 = vmul.f32 %v3605_v9, %v3582_v39  ;;  %v3618_v50 = vadd.f32 %v3959_v29, %v3609_v25 }
 0x34d   :  { %v3610_v48 = vadd.f32 %v3608_v13, %v3596_v12  ;;  %v3621_v47 = vsel %vm3620_vm12, %v3618_v50, -inf }
 0x34e   :  { %3623 = vmax.xlane.f32.xlu1 %v3621_v47 }
 0x34f   :  { %v3619_v42 = vadd.f32 %v3959_v29, %v3610_v48 }
 0x351   :  { %v3622_v59 = vsel %vm3620_vm12, %v3619_v42, -inf }
 0x352   :  { %3625 = vmax.xlane.f32.xlu0 %v3622_v59 }
 0x3db   :  { %v3624_v53 = vpop.xlane.xlu1 %3623 }
 0x3dc   :  { %v3627_v33 = vsub.f32 %v3618_v50, %v3624_v53 }
 0x3de   :  { %v3629_v18 = vmul.f32 1.442695, %v3627_v33 }
 0x3df   :  { %v3626_v32 = vpop.xlane.xlu0 %3625 }
 0x3e0   :  { %4590 = vpow2.f32 %v3629_v18  ;;  %v3628_v44 = vsub.f32 %v3619_v42, %v3626_v32 }
 0x3e2   :  { %v3631_v21 = vmul.f32 1.442695, %v3628_v44 }
 0x3e4   :  { %4592 = vpow2.f32 %v3631_v21 }
 0x3ea   :  { %v4591_v22 = vpop.eup %4590 }
 0x3eb   :  { %v3633_v2 = vsel %vm3620_vm12, %v4591_v22, 0.0 }
 0x3ec   :  { %3635 = vadd.xlane.f32.xlu1 %v3633_v2 }
 0x3ee   :  { %v4593_v62 = vpop.eup %4592 }
 0x3ef   :  { %v3634_v57 = vsel %vm3620_vm12, %v4593_v62, 0.0 }
 0x3f0   :  { %3637 = vadd.xlane.f32.xlu1 %v3634_v57 }
 0x479   :  { %v3636_v58 = vpop.xlane.xlu1 %3635 }
 0x47a   :  { %4594 = vrcp.f32 %v3636_v58 }
 0x47d   :  { %v3638_v45 = vpop.xlane.xlu1 %3637 }
 0x47e   :  { %4596 = vrcp.f32 %v3638_v45 }
 0x484   :  { %v4595_v0 = vpop.eup %4594 }
 0x485   :  { %v3641_v15 = vmul.f32 %v4595_v0, %v3633_v2 }
 0x487   :  { %3643 = vst [vmem:[#allocation11] sm:$0xff] %v3641_v15 }
 0x488   :  { %v4597_v6 = vpop.eup %4596 }
 0x489   :  { %v3642_v55 = vmul.f32 %v4597_v6, %v3634_v57 }
 0x48b   :  { %3644 = vst [vmem:[#allocation11 + $0x8] sm:$0xff] %v3642_v55 }
 0x48c   :  { %4757 = shalt.err (!%p4754_p2)
}
 0x48d   :  { %s4758_s17 = scalar_lea.hbm %s5944_s9, 256 }
 0x48e   :  { %p4759_p3 = scmp.ne.s32.totalorder %s5944_s9, %s4758_s17  ;;  %p4762_p4 = scmp.lt.u32.totalorder %s4758_s17, %s5944_s9 }
 0x490   :  { %p4764_p5 = pnand %p4762_p4, %p4759_p3 }
 0x492   :  { %4767 = shalt.err (!%p4764_p5)
}
 0x493   :  { %s4791_s20 = smov 128   ;;  %s4792_s21 = smov 8  }
 0x494   :  { %3656 = dma.vmem_to_hbm [thread:$0]  %s3651_s13, 256, %s5944_s9, [#allocation4], %s4791_s20, %s4791_s20, %s4792_s21  }
 0x495   :  { %4774 = dma.done.wait [#allocation4], 256  }
 0x496   :  { %4775 = vsyncadd [#allocation4], 4294967040 }
 0x497   :  { %3660 = vsyncpa [#allocation3], 1 }
 0x498   :  { %3661 = vsyncpa [#allocation6], 1 }
 0x499   :  { %3662 = vsyncpa [#allocation9], 1 }
 0x49a   :  { %3663 = vsyncpa [#allocation4], 1 }

</bundles_post_ra>
